<compile_context>
chip_gen: v7x
topology: tpu7x:2x2x1
jax: 0.10.0
libtpu: 0.0.40
codegen_flags: <defaults>
</compile_context>

<pallas_src>
import functools

import jax
import jax.numpy as jnp
from jax.experimental import pallas as pl
from jax.experimental.pallas import tpu as pltpu


def _round_up(x, m):
    return (x + m - 1) // m * m


# ---------------------------------------------------------------------------
# Fused whole-module kernel (one grid step = one (n, t) frame, all blocks)
# ---------------------------------------------------------------------------

def _module_kernel(x_ref, mask_ref, wr_ref, br_ref, wc_ref, bc_ref, wa_ref, ba_ref,
                   out_ref, carry_ref, *, Np, Wp8, half, padt, nblocks):
    C = 2 * half
    t = pl.program_id(1)
    T = pl.num_programs(1)
    wdt = wr_ref.dtype                     # MXU operand dtype (io dtype)
    rows = pl.ds(padt, Np)

    # Reset all per-block causal-time carries (and the permanently-zero pad rows)
    # at the first frame of every sequence.
    @pl.when(t == 0)
    def _():
        carry_ref[...] = jnp.zeros_like(carry_ref)

    mask = mask_ref[...]                   # (Np, 1) f32, 1 on interior pixels

    def reduce_and_carry(b, y_op):
        # Fused 1x1x1 reduce convs (+folded BN + ReLU) of all three paths in ONE
        # matmul; the multiplicative mask exactly zeroes the padding ring.
        r = jnp.dot(y_op, wr_ref[b], preferred_element_type=jnp.float32)
        r = jnp.maximum(r + br_ref[b], 0.0) * mask            # (Np, 3*half) f32
        # Carry columns: [cur_h0 | cur_h1 | prev_h0].  Rotate prev <- old cur_h0,
        # then write the current frame's h0/h1 (single full-width store, no
        # lane-sliced ref stores).
        old = carry_ref[b, rows, :]
        new = jnp.concatenate(
            [r[:, :C].astype(carry_ref.dtype), old[:, :half]], axis=1)
        carry_ref[b, rows, :] = new
        return r[:, C:]                                        # h2 (path2), f32

    def taps_and_agg(b, h2, y_skip):
        # All 27 causal-conv taps of path0 (2,3,3) + path1 (1,3,3) folded into 9
        # (Np, 3*half) x (3*half, 2*half) matmuls via block-structured weights.
        acc = jnp.zeros((Np, C), jnp.float32)
        for dh in range(3):
            for dw in range(3):
                s = (dh - 1) * Wp8 + (dw - 1)
                src = carry_ref[b, pl.ds(padt + s, Np), :]
                acc = acc + jnp.dot(src, wc_ref[b, dh * 3 + dw],
                                    preferred_element_type=jnp.float32)
        p01 = jnp.maximum(acc + bc_ref[b], 0.0)                # (Np, 2*half)
        # Aggregation: single (Np, 3*half) @ (3*half, C) matmul + skip connection.
        agg_in = jnp.concatenate([p01, h2], axis=1).astype(wdt)
        y = jnp.dot(agg_in, wa_ref[b], preferred_element_type=jnp.float32)
        return jnp.maximum(y + ba_ref[b], 0.0) + y_skip

    y = x_ref[...].astype(jnp.float32)                         # (Np, C)
    for b in range(nblocks):
        h2 = reduce_and_carry(b, y.astype(wdt))
        if b < nblocks - 1:
            y = taps_and_agg(b, h2, y)
        else:
            # Last block: only the final frame is needed by the module output,
            # so skip its spatial convs + aggregation for t < T-1 (the reduce +
            # carry update above still runs every step to feed the causal conv).
            @pl.when(t == T - 1)
            def _():
                out_ref[...] = taps_and_agg(b, h2, y).astype(out_ref.dtype)


# ---------------------------------------------------------------------------
# Parameter packing (BN folded; kernel-ready block-structured layout)
# ---------------------------------------------------------------------------

def pack_module_params(block_params_list, C, io_dtype):
    half = C // 2
    f32 = jnp.float32
    wr_l, br_l, wc_l, bc_l, wa_l, ba_l = [], [], [], [], [], []
    for p in block_params_list:
        wr = jnp.concatenate([p['path0']['w_reduce'],
                              p['path1']['w_reduce'],
                              p['path2']['w_reduce']], axis=1)            # (C, 3h)
        br = jnp.concatenate([p['path0']['b_reduce'],
                              p['path1']['b_reduce'],
                              p['path2']['b_reduce']]).reshape(1, 3 * half)
        w0 = p['path0']['w_conv']      # (18, h, h): [0:9]=frame t-1, [9:18]=frame t
        w1 = p['path1']['w_conv']      # (9, h, h)
        # Combined tap weights, K-rows ordered [cur_h0 | cur_h1 | prev_h0],
        # output columns [p0 | p1].
        wc = jnp.zeros((9, 3 * half, 2 * half), f32)
        wc = wc.at[:, 0:half, 0:half].set(w0[9:18])            # cur_h0  -> p0
        wc = wc.at[:, half:2 * half, half:2 * half].set(w1)    # cur_h1  -> p1
        wc = wc.at[:, 2 * half:, 0:half].set(w0[0:9])          # prev_h0 -> p0
        bc = jnp.concatenate([p['path0']['b_conv'],
                              p['path1']['b_conv']]).reshape(1, 2 * half)
        wa = p['agg']['w']                                      # (3h, C)
        ba = p['agg']['b'].reshape(1, C)
        wr_l.append(wr); br_l.append(br); wc_l.append(wc)
        bc_l.append(bc); wa_l.append(wa); ba_l.append(ba)

    def stk(xs, dt):
        return jnp.stack(xs).astype(dt)

    return dict(wr=stk(wr_l, io_dtype), br=stk(br_l, f32),
                wc=stk(wc_l, io_dtype), bc=stk(bc_l, f32),
                wa=stk(wa_l, io_dtype), ba=stk(ba_l, f32))


def _default_vmem_limit(Np, C, nb, Pn, io_bytes):
    half = C // 2
    blk = Np * C * io_bytes                                   # x / out block
    weights = nb * io_bytes * (C * 3 * half + 9 * 3 * half * 2 * half
                               + 3 * half * C) + nb * 4 * (3 * half + 2 * half + C)
    carry = nb * Pn * 3 * half * io_bytes
    temps = Np * 4 * (3 * half + 2 * C + 3 * half + 2 * C)    # f32 live temporaries
    est = 2 * (2 * blk + Np * 4 + weights) + carry + temps
    # Floor above compiler defaults, cap at 64 MiB so it is safe on v7x.
    # TODO(synk): with spatial row tiling this could target the full 128 MiB on
    #             v5e/v6e for big frames.
    return int(min(max(2 * est, 48 << 20), 64 << 20))


# ---------------------------------------------------------------------------
# Wrapper: TemporalConv_module forward (layout glue done ONCE at the boundaries)
# ---------------------------------------------------------------------------

def temporal_conv_module_forward(x_ncthw, block_params_list, *, io_dtype=None,
                                 vmem_limit_bytes=None):
    """TemporalConv_module (use_pyramid_pooling=False, extra_in_channels=0,
    start_out_channels == in_channels): chained TemporalBlocks fused in one
    pallas_call; returns the last frame, PyTorch layout (N, C, H, W)."""
    N, C, T, H, W = x_ncthw.shape
    nb = len(block_params_list)
    half = C // 2
    Hp = H + 2
    Wp8 = _round_up(W + 2, 8)          # 8-sublane-aligned row pitch of padded raster
    Np = Hp * Wp8
    padt = _round_up(Wp8 + 1, 8)       # zero head/tail rows so shifted taps stay in-bounds
    Pn = Np + 2 * padt
    io_dtype = jnp.dtype(io_dtype) if io_dtype is not None else x_ncthw.dtype

    # NCTHW -> NTHWC once for the whole module; zero-pad H by 1 and W up to the
    # aligned pitch; flatten each padded frame to a (Np, C) channels-last tile.
    x = jnp.transpose(x_ncthw, (0, 2, 3, 4, 1)).astype(io_dtype)
    xin = jnp.pad(x, ((0, 0), (0, 0), (1, 1), (1, Wp8 - (W + 1)), (0, 0)))
    xin = xin.reshape(N, T, Np, C)

    # (Np, 1) interior mask: exact multiplicative zeroing of the padding ring.
    rr = jnp.arange(Hp)[:, None]
    cc = jnp.arange(Wp8)[None, :]
    mask = ((rr >= 1) & (rr <= H) & (cc >= 1) & (cc <= W)).astype(jnp.float32)
    mask = mask.reshape(Np, 1)

    kp = pack_module_params(block_params_list, C, io_dtype)

    if vmem_limit_bytes is None:
        vmem_limit_bytes = _default_vmem_limit(Np, C, nb, Pn, io_dtype.itemsize)

    kernel = functools.partial(_module_kernel, Np=Np, Wp8=Wp8, half=half,
                               padt=padt, nblocks=nb)

    grid_spec = pltpu.PrefetchScalarGridSpec(
        num_scalar_prefetch=0,
        grid=(N, T),
        in_specs=[
            pl.BlockSpec((None, None, Np, C), lambda n, t: (n, t, 0, 0)),
            pl.BlockSpec((Np, 1), lambda n, t: (0, 0)),
            pl.BlockSpec((nb, C, 3 * half), lambda n, t: (0, 0, 0)),
            pl.BlockSpec((nb, 1, 3 * half), lambda n, t: (0, 0, 0)),
            pl.BlockSpec((nb, 9, 3 * half, 2 * half), lambda n, t: (0, 0, 0, 0)),
            pl.BlockSpec((nb, 1, 2 * half), lambda n, t: (0, 0, 0)),
            pl.BlockSpec((nb, 3 * half, C), lambda n, t: (0, 0, 0)),
            pl.BlockSpec((nb, 1, C), lambda n, t: (0, 0, 0)),
        ],
        out_specs=pl.BlockSpec((None, Np, C), lambda n, t: (n, 0, 0)),
        scratch_shapes=[pltpu.VMEM((nb, Pn, 3 * half), io_dtype)],
    )

    out = pl.pallas_call(
        kernel,
        out_shape=jax.ShapeDtypeStruct((N, Np, C), io_dtype),
        grid_spec=grid_spec,
        compiler_params=pltpu.CompilerParams(
            dimension_semantics=("parallel", "arbitrary"),   # N megacore, T sequential
            vmem_limit_bytes=vmem_limit_bytes),
    )(xin, mask, kp['wr'], kp['br'], kp['wc'], kp['bc'], kp['wa'], kp['ba'])

    out = out.reshape(N, Hp, Wp8, C)[:, 1:H + 1, 1:W + 1, :]
    return jnp.transpose(out, (0, 3, 1, 2))                   # (N, C, H, W)


# ---------------------------------------------------------------------------
# Deterministic parameter construction (BN folded into scale/bias, eval mode)
# ---------------------------------------------------------------------------

def _make_bn_fold(key, c, eps=1e-5):
    k1, k2, k3, k4 = jax.random.split(key, 4)
    gamma = 1.0 + 0.1 * jax.random.normal(k1, (c,), jnp.float32)
    beta = 0.1 * jax.random.normal(k2, (c,), jnp.float32)
    mean = 0.1 * jax.random.normal(k3, (c,), jnp.float32)
    var = 1.0 + 0.1 * jnp.abs(jax.random.normal(k4, (c,), jnp.float32))
    scale = gamma / jnp.sqrt(var + eps)
    bias = beta - mean * scale
    return scale, bias


def init_params(key, C):
    half = C // 2
    keys = iter(jax.random.split(key, 8))

    def pw_params(k, cin, cout):
        k1, k2 = jax.random.split(k)
        w = 0.2 * jax.random.normal(k1, (cin, cout), jnp.float32)
        scale, bias = _make_bn_fold(k2, cout)
        return w * scale[None, :], bias

    params = {}
    for i, kt in enumerate((2, 1)):
        k1, k2, k3 = jax.random.split(next(keys), 3)
        w_r, b_r = pw_params(k1, C, half)
        w_c = 0.2 * jax.random.normal(k2, (kt * 3 * 3, half, half), jnp.float32)
        scale, bias = _make_bn_fold(k3, half)
        params[f'path{i}'] = dict(w_reduce=w_r, b_reduce=b_r,
                                  w_conv=w_c * scale[None, None, :], b_conv=bias)
    w_r, b_r = pw_params(next(keys), C, half)
    params['path2'] = dict(w_reduce=w_r, b_reduce=b_r)
    w_a, b_a = pw_params(next(keys), 3 * half, C)
    params['agg'] = dict(w=w_a, b=b_a)
    return params


# ---------------------------------------------------------------------------
# Pure-JAX reference (for correctness check)
# ---------------------------------------------------------------------------

def ref_block_forward(x_ncthw, params):
    x = jnp.transpose(x_ncthw, (0, 2, 3, 4, 1)).astype(jnp.float32)
    hi = jax.lax.Precision.HIGHEST

    def pw(y, w, b):
        return jnp.maximum(jnp.einsum('nthwc,cd->nthwd', y, w, precision=hi) + b, 0.0)

    def causal(y, w_k, b, kt, kh=3, kw=3):
        n, T, H, W, _ = y.shape
        yp = jnp.pad(y, ((0, 0), (kt - 1, 0), (1, 1), (1, 1), (0, 0)))
        acc, k = 0.0, 0
        for dt in range(kt):
            for dh in range(kh):
                for dw in range(kw):
                    acc = acc + jnp.einsum(
                        'nthwc,cd->nthwd',
                        yp[:, dt:dt + T, dh:dh + H, dw:dw + W, :], w_k[k],
                        precision=hi)
                    k += 1
        return jnp.maximum(acc + b, 0.0)

    outs = []
    for i, kt in enumerate((2, 1)):
        p = params[f'path{i}']
        h = pw(x, p['w_reduce'], p['b_reduce'])
        outs.append(causal(h, p['w_conv'], p['b_conv'], kt))
    p = params['path2']
    outs.append(pw(x, p['w_reduce'], p['b_reduce']))
    xr = jnp.concatenate(outs, axis=-1)
    out = x + pw(xr, params['agg']['w'], params['agg']['b'])
    return jnp.transpose(out, (0, 4, 1, 2, 3))


def ref_module_forward(x_ncthw, block_params_list):
    h = x_ncthw
    for p in block_params_list:
        h = ref_block_forward(h, p)
    return h[:, :, -1]


# ---------------------------------------------------------------------------

if __name__ == "__main__":
    key = jax.random.PRNGKey(0)
    kx, kp = jax.random.split(key)

    # TemporalConv_module(in_channels=C, receptive_field=3, use_pyramid_pooling=False,
    #                     start_out_channels=C) -> 2 TemporalBlocks, last frame out.
    N, C, T, H, W = 2, 16, 4, 10, 12
    receptive_field = 3
    x = jax.random.normal(kx, (N, C, T, H, W), jnp.float32)
    params_list = [init_params(k, C)
                   for k in jax.random.split(kp, receptive_field - 1)]

    # f32 path (checked against the pure-JAX HIGHEST-precision reference;
    # in-kernel matmuls use the MXU at default precision, hence the tolerance).
    out = jax.block_until_ready(temporal_conv_module_forward(x, params_list))
    assert out.shape == (N, C, H, W)

    ref = ref_module_forward(x, params_list)
    if not jnp.allclose(out, ref, atol=5e-3, rtol=5e-3):
        max_diff = float(jnp.max(jnp.abs(out - ref)))
        raise AssertionError(
            f"Pallas TemporalConv_module mismatch vs reference (max |diff|={max_diff})")

    # bf16 I/O path (MXU operands / carries bf16, f32 accumulation) -- smoke check.
    out_bf16 = jax.block_until_ready(
        temporal_conv_module_forward(x, params_list, io_dtype=jnp.bfloat16)
    ).astype(jnp.float32)
    assert bool(jnp.all(jnp.isfinite(out_bf16)))
    assert float(jnp.max(jnp.abs(out_bf16 - ref))) < 0.5

    print("KERNEL_OK")
</pallas_src>

<mosaic_0001>
module attributes {stable_mosaic.version = 11 : i64} {
  func.func @_module_kernel(%arg0: i32, %arg1: i32, %arg2: memref<1x1x192x16xf32, #tpu.memory_space<vmem>>, %arg3: memref<192x1xf32, #tpu.memory_space<vmem>>, %arg4: memref<2x16x24xf32, #tpu.memory_space<vmem>>, %arg5: memref<2x1x24xf32, #tpu.memory_space<vmem>>, %arg6: memref<2x9x24x16xf32, #tpu.memory_space<vmem>>, %arg7: memref<2x1x16xf32, #tpu.memory_space<vmem>>, %arg8: memref<2x24x16xf32, #tpu.memory_space<vmem>>, %arg9: memref<2x1x16xf32, #tpu.memory_space<vmem>>, %arg10: memref<1x192x16xf32, #tpu.memory_space<vmem>>, %arg11: memref<2x240x24xf32, #tpu.memory_space<vmem>>) attributes {dimension_semantics = [#tpu.dimension_semantics<parallel>, #tpu.dimension_semantics<arbitrary>], iteration_bounds = array<i64: 2, 4>, scalar_prefetch = 0 : i64, scratch_operands = 1 : i64, tpu.core_type = #tpu.core_type<tc>, window_params = [{transform_indices = @transform_0, window_bounds = array<i64: 1, 1, 192, 16>}, {pipeline_mode = #tpu.pipeline_mode<synchronous>, transform_indices = @transform_1, window_bounds = array<i64: 192, 1>}, {pipeline_mode = #tpu.pipeline_mode<synchronous>, transform_indices = @transform_2, window_bounds = array<i64: 2, 16, 24>}, {pipeline_mode = #tpu.pipeline_mode<synchronous>, transform_indices = @transform_3, window_bounds = array<i64: 2, 1, 24>}, {pipeline_mode = #tpu.pipeline_mode<synchronous>, transform_indices = @transform_4, window_bounds = array<i64: 2, 9, 24, 16>}, {pipeline_mode = #tpu.pipeline_mode<synchronous>, transform_indices = @transform_5, window_bounds = array<i64: 2, 1, 16>}, {pipeline_mode = #tpu.pipeline_mode<synchronous>, transform_indices = @transform_6, window_bounds = array<i64: 2, 24, 16>}, {pipeline_mode = #tpu.pipeline_mode<synchronous>, transform_indices = @transform_7, window_bounds = array<i64: 2, 1, 16>}, {transform_indices = @transform_8, window_bounds = array<i64: 1, 192, 16>}]} {
    %c0_i32 = arith.constant 0 : i32
    %0 = arith.cmpi eq, %arg1, %c0_i32 : i32
    %1 = arith.extui %0 : i1 to i32
    %c0_i32_0 = arith.constant 0 : i32
    %2 = arith.cmpi ne, %1, %c0_i32_0 : i32
    scf.if %2 {
      %cst_104 = arith.constant 0.000000e+00 : f32
      %121 = vector.broadcast %cst_104 : f32 to vector<2x240x24xf32>
      %c0_105 = arith.constant 0 : index
      %c0_106 = arith.constant 0 : index
      %c0_107 = arith.constant 0 : index
      %122 = vector.load %arg11[%c0_105, %c0_106, %c0_107] : memref<2x240x24xf32, #tpu.memory_space<vmem>>, vector<2x240x24xf32>
      tpu.vector_store %arg11[%c0_105, %c0_106, %c0_107], %121 {strides = array<i32>} : memref<2x240x24xf32, #tpu.memory_space<vmem>>, vector<2x240x24xf32>,
    } else {
    }
    %c0 = arith.constant 0 : index
    %c0_1 = arith.constant 0 : index
    %3 = vector.load %arg3[%c0, %c0_1] : memref<192x1xf32, #tpu.memory_space<vmem>>, vector<192x1xf32>
    %c0_2 = arith.constant 0 : index
    %c0_3 = arith.constant 0 : index
    %c0_4 = arith.constant 0 : index
    %c0_5 = arith.constant 0 : index
    %4 = vector.load %arg2[%c0_2, %c0_3, %c0_4, %c0_5] : memref<1x1x192x16xf32, #tpu.memory_space<vmem>>, vector<1x1x192x16xf32>
    %5 = vector.shape_cast %4 : vector<1x1x192x16xf32> to vector<192x16xf32>
    %c0_6 = arith.constant 0 : index
    %c0_7 = arith.constant 0 : index
    %c0_8 = arith.constant 0 : index
    %6 = vector.load %arg4[%c0_6, %c0_7, %c0_8] : memref<2x16x24xf32, #tpu.memory_space<vmem>>, vector<1x16x24xf32>
    %7 = vector.shape_cast %6 : vector<1x16x24xf32> to vector<16x24xf32>
    %cst = arith.constant dense<0.000000e+00> : vector<192x24xf32>
    %8 = tpu.matmul %5, %7, %cst {dimension_numbers = #tpu.dot_dimension_numbers<[1], [0], [0], [1], [0, 0, 1, 1], [], []>} : vector<192x16xf32>, vector<16x24xf32>, vector<192x24xf32> -> vector<192x24xf32>
    %c0_9 = arith.constant 0 : index
    %c0_10 = arith.constant 0 : index
    %c0_11 = arith.constant 0 : index
    %9 = vector.load %arg5[%c0_9, %c0_10, %c0_11] : memref<2x1x24xf32, #tpu.memory_space<vmem>>, vector<1x1x24xf32>
    %10 = vector.shape_cast %9 : vector<1x1x24xf32> to vector<1x24xf32>
    %11 = vector.broadcast %10 : vector<1x24xf32> to vector<192x24xf32>
    %12 = arith.addf %8, %11 : vector<192x24xf32>
    %cst_12 = arith.constant 0.000000e+00 : f32
    %13 = vector.broadcast %cst_12 : f32 to vector<192x24xf32>
    %14 = arith.maximumf %12, %13 : vector<192x24xf32>
    %15 = vector.broadcast %3 : vector<192x1xf32> to vector<192x24xf32>
    %16 = arith.mulf %14, %15 : vector<192x24xf32>
    %c0_13 = arith.constant 0 : index
    %c24 = arith.constant 24 : index
    %c0_14 = arith.constant 0 : index
    %17 = vector.load %arg11[%c0_13, %c24, %c0_14] : memref<2x240x24xf32, #tpu.memory_space<vmem>>, vector<1x192x24xf32>
    %18 = vector.shape_cast %17 : vector<1x192x24xf32> to vector<192x24xf32>
    %19 = vector.extract_strided_slice %16 {offsets = [0, 0], sizes = [192, 16], strides = [1, 1]} : vector<192x24xf32> to vector<192x16xf32>
    %20 = vector.extract_strided_slice %18 {offsets = [0, 0], sizes = [192, 8], strides = [1, 1]} : vector<192x24xf32> to vector<192x8xf32>
    %21 = tpu.concatenate %19, %20 in 1 : vector<192x16xf32>, vector<192x8xf32> -> vector<192x24xf32>
    %c0_15 = arith.constant 0 : index
    %c24_16 = arith.constant 24 : index
    %c0_17 = arith.constant 0 : index
    %22 = vector.load %arg11[%c0_15, %c24_16, %c0_17] : memref<2x240x24xf32, #tpu.memory_space<vmem>>, vector<1x192x24xf32>
    %23 = vector.shape_cast %22 : vector<1x192x24xf32> to vector<192x24xf32>
    %24 = vector.shape_cast %21 : vector<192x24xf32> to vector<1x192x24xf32>
    tpu.vector_store %arg11[%c0_15, %c24_16, %c0_17], %24 {strides = array<i32>} : memref<2x240x24xf32, #tpu.memory_space<vmem>>, vector<1x192x24xf32>,
    %25 = vector.extract_strided_slice %16 {offsets = [0, 16], sizes = [192, 8], strides = [1, 1]} : vector<192x24xf32> to vector<192x8xf32>
    %cst_18 = arith.constant 0.000000e+00 : f32
    %26 = vector.broadcast %cst_18 : f32 to vector<192x16xf32>
    %c0_19 = arith.constant 0 : index
    %c7 = arith.constant 7 : index
    %c0_20 = arith.constant 0 : index
    %27 = vector.load %arg11[%c0_19, %c7, %c0_20] : memref<2x240x24xf32, #tpu.memory_space<vmem>>, vector<1x192x24xf32>
    %28 = vector.shape_cast %27 : vector<1x192x24xf32> to vector<192x24xf32>
    %c0_21 = arith.constant 0 : index
    %c0_22 = arith.constant 0 : index
    %c0_23 = arith.constant 0 : index
    %c0_24 = arith.constant 0 : index
    %29 = vector.load %arg6[%c0_21, %c0_22, %c0_23, %c0_24] : memref<2x9x24x16xf32, #tpu.memory_space<vmem>>, vector<1x1x24x16xf32>
    %30 = vector.shape_cast %29 : vector<1x1x24x16xf32> to vector<24x16xf32>
    %cst_25 = arith.constant dense<0.000000e+00> : vector<192x16xf32>
    %31 = tpu.matmul %28, %30, %cst_25 {dimension_numbers = #tpu.dot_dimension_numbers<[1], [0], [0], [1], [0, 0, 1, 1], [], []>} : vector<192x24xf32>, vector<24x16xf32>, vector<192x16xf32> -> vector<192x16xf32>
    %32 = arith.addf %26, %31 : vector<192x16xf32>
    %c0_26 = arith.constant 0 : index
    %c8 = arith.constant 8 : index
    %c0_27 = arith.constant 0 : index
    %33 = vector.load %arg11[%c0_26, %c8, %c0_27] : memref<2x240x24xf32, #tpu.memory_space<vmem>>, vector<1x192x24xf32>
    %34 = vector.shape_cast %33 : vector<1x192x24xf32> to vector<192x24xf32>
    %c0_28 = arith.constant 0 : index
    %c1 = arith.constant 1 : index
    %c0_29 = arith.constant 0 : index
    %c0_30 = arith.constant 0 : index
    %35 = vector.load %arg6[%c0_28, %c1, %c0_29, %c0_30] : memref<2x9x24x16xf32, #tpu.memory_space<vmem>>, vector<1x1x24x16xf32>
    %36 = vector.shape_cast %35 : vector<1x1x24x16xf32> to vector<24x16xf32>
    %cst_31 = arith.constant dense<0.000000e+00> : vector<192x16xf32>
    %37 = tpu.matmul %34, %36, %cst_31 {dimension_numbers = #tpu.dot_dimension_numbers<[1], [0], [0], [1], [0, 0, 1, 1], [], []>} : vector<192x24xf32>, vector<24x16xf32>, vector<192x16xf32> -> vector<192x16xf32>
    %38 = arith.addf %32, %37 : vector<192x16xf32>
    %c0_32 = arith.constant 0 : index
    %c9 = arith.constant 9 : index
    %c0_33 = arith.constant 0 : index
    %39 = vector.load %arg11[%c0_32, %c9, %c0_33] : memref<2x240x24xf32, #tpu.memory_space<vmem>>, vector<1x192x24xf32>
    %40 = vector.shape_cast %39 : vector<1x192x24xf32> to vector<192x24xf32>
    %c0_34 = arith.constant 0 : index
    %c2 = arith.constant 2 : index
    %c0_35 = arith.constant 0 : index
    %c0_36 = arith.constant 0 : index
    %41 = vector.load %arg6[%c0_34, %c2, %c0_35, %c0_36] : memref<2x9x24x16xf32, #tpu.memory_space<vmem>>, vector<1x1x24x16xf32>
    %42 = vector.shape_cast %41 : vector<1x1x24x16xf32> to vector<24x16xf32>
    %cst_37 = arith.constant dense<0.000000e+00> : vector<192x16xf32>
    %43 = tpu.matmul %40, %42, %cst_37 {dimension_numbers = #tpu.dot_dimension_numbers<[1], [0], [0], [1], [0, 0, 1, 1], [], []>} : vector<192x24xf32>, vector<24x16xf32>, vector<192x16xf32> -> vector<192x16xf32>
    %44 = arith.addf %38, %43 : vector<192x16xf32>
    %c0_38 = arith.constant 0 : index
    %c23 = arith.constant 23 : index
    %c0_39 = arith.constant 0 : index
    %45 = vector.load %arg11[%c0_38, %c23, %c0_39] : memref<2x240x24xf32, #tpu.memory_space<vmem>>, vector<1x192x24xf32>
    %46 = vector.shape_cast %45 : vector<1x192x24xf32> to vector<192x24xf32>
    %c0_40 = arith.constant 0 : index
    %c3 = arith.constant 3 : index
    %c0_41 = arith.constant 0 : index
    %c0_42 = arith.constant 0 : index
    %47 = vector.load %arg6[%c0_40, %c3, %c0_41, %c0_42] : memref<2x9x24x16xf32, #tpu.memory_space<vmem>>, vector<1x1x24x16xf32>
    %48 = vector.shape_cast %47 : vector<1x1x24x16xf32> to vector<24x16xf32>
    %cst_43 = arith.constant dense<0.000000e+00> : vector<192x16xf32>
    %49 = tpu.matmul %46, %48, %cst_43 {dimension_numbers = #tpu.dot_dimension_numbers<[1], [0], [0], [1], [0, 0, 1, 1], [], []>} : vector<192x24xf32>, vector<24x16xf32>, vector<192x16xf32> -> vector<192x16xf32>
    %50 = arith.addf %44, %49 : vector<192x16xf32>
    %c0_44 = arith.constant 0 : index
    %c24_45 = arith.constant 24 : index
    %c0_46 = arith.constant 0 : index
    %51 = vector.load %arg11[%c0_44, %c24_45, %c0_46] : memref<2x240x24xf32, #tpu.memory_space<vmem>>, vector<1x192x24xf32>
    %52 = vector.shape_cast %51 : vector<1x192x24xf32> to vector<192x24xf32>
    %c0_47 = arith.constant 0 : index
    %c4 = arith.constant 4 : index
    %c0_48 = arith.constant 0 : index
    %c0_49 = arith.constant 0 : index
    %53 = vector.load %arg6[%c0_47, %c4, %c0_48, %c0_49] : memref<2x9x24x16xf32, #tpu.memory_space<vmem>>, vector<1x1x24x16xf32>
    %54 = vector.shape_cast %53 : vector<1x1x24x16xf32> to vector<24x16xf32>
    %cst_50 = arith.constant dense<0.000000e+00> : vector<192x16xf32>
    %55 = tpu.matmul %52, %54, %cst_50 {dimension_numbers = #tpu.dot_dimension_numbers<[1], [0], [0], [1], [0, 0, 1, 1], [], []>} : vector<192x24xf32>, vector<24x16xf32>, vector<192x16xf32> -> vector<192x16xf32>
    %56 = arith.addf %50, %55 : vector<192x16xf32>
    %c0_51 = arith.constant 0 : index
    %c25 = arith.constant 25 : index
    %c0_52 = arith.constant 0 : index
    %57 = vector.load %arg11[%c0_51, %c25, %c0_52] : memref<2x240x24xf32, #tpu.memory_space<vmem>>, vector<1x192x24xf32>
    %58 = vector.shape_cast %57 : vector<1x192x24xf32> to vector<192x24xf32>
    %c0_53 = arith.constant 0 : index
    %c5 = arith.constant 5 : index
    %c0_54 = arith.constant 0 : index
    %c0_55 = arith.constant 0 : index
    %59 = vector.load %arg6[%c0_53, %c5, %c0_54, %c0_55] : memref<2x9x24x16xf32, #tpu.memory_space<vmem>>, vector<1x1x24x16xf32>
    %60 = vector.shape_cast %59 : vector<1x1x24x16xf32> to vector<24x16xf32>
    %cst_56 = arith.constant dense<0.000000e+00> : vector<192x16xf32>
    %61 = tpu.matmul %58, %60, %cst_56 {dimension_numbers = #tpu.dot_dimension_numbers<[1], [0], [0], [1], [0, 0, 1, 1], [], []>} : vector<192x24xf32>, vector<24x16xf32>, vector<192x16xf32> -> vector<192x16xf32>
    %62 = arith.addf %56, %61 : vector<192x16xf32>
    %c0_57 = arith.constant 0 : index
    %c39 = arith.constant 39 : index
    %c0_58 = arith.constant 0 : index
    %63 = vector.load %arg11[%c0_57, %c39, %c0_58] : memref<2x240x24xf32, #tpu.memory_space<vmem>>, vector<1x192x24xf32>
    %64 = vector.shape_cast %63 : vector<1x192x24xf32> to vector<192x24xf32>
    %c0_59 = arith.constant 0 : index
    %c6 = arith.constant 6 : index
    %c0_60 = arith.constant 0 : index
    %c0_61 = arith.constant 0 : index
    %65 = vector.load %arg6[%c0_59, %c6, %c0_60, %c0_61] : memref<2x9x24x16xf32, #tpu.memory_space<vmem>>, vector<1x1x24x16xf32>
    %66 = vector.shape_cast %65 : vector<1x1x24x16xf32> to vector<24x16xf32>
    %cst_62 = arith.constant dense<0.000000e+00> : vector<192x16xf32>
    %67 = tpu.matmul %64, %66, %cst_62 {dimension_numbers = #tpu.dot_dimension_numbers<[1], [0], [0], [1], [0, 0, 1, 1], [], []>} : vector<192x24xf32>, vector<24x16xf32>, vector<192x16xf32> -> vector<192x16xf32>
    %68 = arith.addf %62, %67 : vector<192x16xf32>
    %c0_63 = arith.constant 0 : index
    %c40 = arith.constant 40 : index
    %c0_64 = arith.constant 0 : index
    %69 = vector.load %arg11[%c0_63, %c40, %c0_64] : memref<2x240x24xf32, #tpu.memory_space<vmem>>, vector<1x192x24xf32>
    %70 = vector.shape_cast %69 : vector<1x192x24xf32> to vector<192x24xf32>
    %c0_65 = arith.constant 0 : index
    %c7_66 = arith.constant 7 : index
    %c0_67 = arith.constant 0 : index
    %c0_68 = arith.constant 0 : index
    %71 = vector.load %arg6[%c0_65, %c7_66, %c0_67, %c0_68] : memref<2x9x24x16xf32, #tpu.memory_space<vmem>>, vector<1x1x24x16xf32>
    %72 = vector.shape_cast %71 : vector<1x1x24x16xf32> to vector<24x16xf32>
    %cst_69 = arith.constant dense<0.000000e+00> : vector<192x16xf32>
    %73 = tpu.matmul %70, %72, %cst_69 {dimension_numbers = #tpu.dot_dimension_numbers<[1], [0], [0], [1], [0, 0, 1, 1], [], []>} : vector<192x24xf32>, vector<24x16xf32>, vector<192x16xf32> -> vector<192x16xf32>
    %74 = arith.addf %68, %73 : vector<192x16xf32>
    %c0_70 = arith.constant 0 : index
    %c41 = arith.constant 41 : index
    %c0_71 = arith.constant 0 : index
    %75 = vector.load %arg11[%c0_70, %c41, %c0_71] : memref<2x240x24xf32, #tpu.memory_space<vmem>>, vector<1x192x24xf32>
    %76 = vector.shape_cast %75 : vector<1x192x24xf32> to vector<192x24xf32>
    %c0_72 = arith.constant 0 : index
    %c8_73 = arith.constant 8 : index
    %c0_74 = arith.constant 0 : index
    %c0_75 = arith.constant 0 : index
    %77 = vector.load %arg6[%c0_72, %c8_73, %c0_74, %c0_75] : memref<2x9x24x16xf32, #tpu.memory_space<vmem>>, vector<1x1x24x16xf32>
    %78 = vector.shape_cast %77 : vector<1x1x24x16xf32> to vector<24x16xf32>
    %cst_76 = arith.constant dense<0.000000e+00> : vector<192x16xf32>
    %79 = tpu.matmul %76, %78, %cst_76 {dimension_numbers = #tpu.dot_dimension_numbers<[1], [0], [0], [1], [0, 0, 1, 1], [], []>} : vector<192x24xf32>, vector<24x16xf32>, vector<192x16xf32> -> vector<192x16xf32>
    %80 = arith.addf %74, %79 : vector<192x16xf32>
    %c0_77 = arith.constant 0 : index
    %c0_78 = arith.constant 0 : index
    %c0_79 = arith.constant 0 : index
    %81 = vector.load %arg7[%c0_77, %c0_78, %c0_79] : memref<2x1x16xf32, #tpu.memory_space<vmem>>, vector<1x1x16xf32>
    %82 = vector.shape_cast %81 : vector<1x1x16xf32> to vector<1x16xf32>
    %83 = vector.broadcast %82 : vector<1x16xf32> to vector<192x16xf32>
    %84 = arith.addf %80, %83 : vector<192x16xf32>
    %cst_80 = arith.constant 0.000000e+00 : f32
    %85 = vector.broadcast %cst_80 : f32 to vector<192x16xf32>
    %86 = arith.maximumf %84, %85 : vector<192x16xf32>
    %87 = tpu.concatenate %86, %25 in 1 : vector<192x16xf32>, vector<192x8xf32> -> vector<192x24xf32>
    %c0_81 = arith.constant 0 : index
    %c0_82 = arith.constant 0 : index
    %c0_83 = arith.constant 0 : index
    %88 = vector.load %arg8[%c0_81, %c0_82, %c0_83] : memref<2x24x16xf32, #tpu.memory_space<vmem>>, vector<1x24x16xf32>
    %89 = vector.shape_cast %88 : vector<1x24x16xf32> to vector<24x16xf32>
    %cst_84 = arith.constant dense<0.000000e+00> : vector<192x16xf32>
    %90 = tpu.matmul %87, %89, %cst_84 {dimension_numbers = #tpu.dot_dimension_numbers<[1], [0], [0], [1], [0, 0, 1, 1], [], []>} : vector<192x24xf32>, vector<24x16xf32>, vector<192x16xf32> -> vector<192x16xf32>
    %c0_85 = arith.constant 0 : index
    %c0_86 = arith.constant 0 : index
    %c0_87 = arith.constant 0 : index
    %91 = vector.load %arg9[%c0_85, %c0_86, %c0_87] : memref<2x1x16xf32, #tpu.memory_space<vmem>>, vector<1x1x16xf32>
    %92 = vector.shape_cast %91 : vector<1x1x16xf32> to vector<1x16xf32>
    %93 = vector.broadcast %92 : vector<1x16xf32> to vector<192x16xf32>
    %94 = arith.addf %90, %93 : vector<192x16xf32>
    %cst_88 = arith.constant 0.000000e+00 : f32
    %95 = vector.broadcast %cst_88 : f32 to vector<192x16xf32>
    %96 = arith.maximumf %94, %95 : vector<192x16xf32>
    %97 = arith.addf %96, %5 : vector<192x16xf32>
    %c1_89 = arith.constant 1 : index
    %c0_90 = arith.constant 0 : index
    %c0_91 = arith.constant 0 : index
    %98 = vector.load %arg4[%c1_89, %c0_90, %c0_91] : memref<2x16x24xf32, #tpu.memory_space<vmem>>, vector<1x16x24xf32>
    %99 = vector.shape_cast %98 : vector<1x16x24xf32> to vector<16x24xf32>
    %cst_92 = arith.constant dense<0.000000e+00> : vector<192x24xf32>
    %100 = tpu.matmul %97, %99, %cst_92 {dimension_numbers = #tpu.dot_dimension_numbers<[1], [0], [0], [1], [0, 0, 1, 1], [], []>} : vector<192x16xf32>, vector<16x24xf32>, vector<192x24xf32> -> vector<192x24xf32>
    %c1_93 = arith.constant 1 : index
    %c0_94 = arith.constant 0 : index
    %c0_95 = arith.constant 0 : index
    %101 = vector.load %arg5[%c1_93, %c0_94, %c0_95] : memref<2x1x24xf32, #tpu.memory_space<vmem>>, vector<1x1x24xf32>
    %102 = vector.shape_cast %101 : vector<1x1x24xf32> to vector<1x24xf32>
    %103 = vector.broadcast %102 : vector<1x24xf32> to vector<192x24xf32>
    %104 = arith.addf %100, %103 : vector<192x24xf32>
    %cst_96 = arith.constant 0.000000e+00 : f32
    %105 = vector.broadcast %cst_96 : f32 to vector<192x24xf32>
    %106 = arith.maximumf %104, %105 : vector<192x24xf32>
    %107 = vector.broadcast %3 : vector<192x1xf32> to vector<192x24xf32>
    %108 = arith.mulf %106, %107 : vector<192x24xf32>
    %c1_97 = arith.constant 1 : index
    %c24_98 = arith.constant 24 : index
    %c0_99 = arith.constant 0 : index
    %109 = vector.load %arg11[%c1_97, %c24_98, %c0_99] : memref<2x240x24xf32, #tpu.memory_space<vmem>>, vector<1x192x24xf32>
    %110 = vector.shape_cast %109 : vector<1x192x24xf32> to vector<192x24xf32>
    %111 = vector.extract_strided_slice %108 {offsets = [0, 0], sizes = [192, 16], strides = [1, 1]} : vector<192x24xf32> to vector<192x16xf32>
    %112 = vector.extract_strided_slice %110 {offsets = [0, 0], sizes = [192, 8], strides = [1, 1]} : vector<192x24xf32> to vector<192x8xf32>
    %113 = tpu.concatenate %111, %112 in 1 : vector<192x16xf32>, vector<192x8xf32> -> vector<192x24xf32>
    %c1_100 = arith.constant 1 : index
    %c24_101 = arith.constant 24 : index
    %c0_102 = arith.constant 0 : index
    %114 = vector.load %arg11[%c1_100, %c24_101, %c0_102] : memref<2x240x24xf32, #tpu.memory_space<vmem>>, vector<1x192x24xf32>
    %115 = vector.shape_cast %114 : vector<1x192x24xf32> to vector<192x24xf32>
    %116 = vector.shape_cast %113 : vector<192x24xf32> to vector<1x192x24xf32>
    tpu.vector_store %arg11[%c1_100, %c24_101, %c0_102], %116 {strides = array<i32>} : memref<2x240x24xf32, #tpu.memory_space<vmem>>, vector<1x192x24xf32>,
    %117 = vector.extract_strided_slice %108 {offsets = [0, 16], sizes = [192, 8], strides = [1, 1]} : vector<192x24xf32> to vector<192x8xf32>
    %c3_i32 = arith.constant 3 : i32
    %118 = arith.cmpi eq, %arg1, %c3_i32 : i32
    %119 = arith.extui %118 : i1 to i32
    %c0_i32_103 = arith.constant 0 : i32
    %120 = arith.cmpi ne, %119, %c0_i32_103 : i32
    scf.if %120 {
      %cst_104 = arith.constant 0.000000e+00 : f32
      %121 = vector.broadcast %cst_104 : f32 to vector<192x16xf32>
      %c1_105 = arith.constant 1 : index
      %c7_106 = arith.constant 7 : index
      %c0_107 = arith.constant 0 : index
      %122 = vector.load %arg11[%c1_105, %c7_106, %c0_107] : memref<2x240x24xf32, #tpu.memory_space<vmem>>, vector<1x192x24xf32>
      %123 = vector.shape_cast %122 : vector<1x192x24xf32> to vector<192x24xf32>
      %c1_108 = arith.constant 1 : index
      %c0_109 = arith.constant 0 : index
      %c0_110 = arith.constant 0 : index
      %c0_111 = arith.constant 0 : index
      %124 = vector.load %arg6[%c1_108, %c0_109, %c0_110, %c0_111] : memref<2x9x24x16xf32, #tpu.memory_space<vmem>>, vector<1x1x24x16xf32>
      %125 = vector.shape_cast %124 : vector<1x1x24x16xf32> to vector<24x16xf32>
      %cst_112 = arith.constant dense<0.000000e+00> : vector<192x16xf32>
      %126 = tpu.matmul %123, %125, %cst_112 {dimension_numbers = #tpu.dot_dimension_numbers<[1], [0], [0], [1], [0, 0, 1, 1], [], []>} : vector<192x24xf32>, vector<24x16xf32>, vector<192x16xf32> -> vector<192x16xf32>
      %127 = arith.addf %121, %126 : vector<192x16xf32>
      %c1_113 = arith.constant 1 : index
      %c8_114 = arith.constant 8 : index
      %c0_115 = arith.constant 0 : index
      %128 = vector.load %arg11[%c1_113, %c8_114, %c0_115] : memref<2x240x24xf32, #tpu.memory_space<vmem>>, vector<1x192x24xf32>
      %129 = vector.shape_cast %128 : vector<1x192x24xf32> to vector<192x24xf32>
      %c1_116 = arith.constant 1 : index
      %c1_117 = arith.constant 1 : index
      %c0_118 = arith.constant 0 : index
      %c0_119 = arith.constant 0 : index
      %130 = vector.load %arg6[%c1_116, %c1_117, %c0_118, %c0_119] : memref<2x9x24x16xf32, #tpu.memory_space<vmem>>, vector<1x1x24x16xf32>
      %131 = vector.shape_cast %130 : vector<1x1x24x16xf32> to vector<24x16xf32>
      %cst_120 = arith.constant dense<0.000000e+00> : vector<192x16xf32>
      %132 = tpu.matmul %129, %131, %cst_120 {dimension_numbers = #tpu.dot_dimension_numbers<[1], [0], [0], [1], [0, 0, 1, 1], [], []>} : vector<192x24xf32>, vector<24x16xf32>, vector<192x16xf32> -> vector<192x16xf32>
      %133 = arith.addf %127, %132 : vector<192x16xf32>
      %c1_121 = arith.constant 1 : index
      %c9_122 = arith.constant 9 : index
      %c0_123 = arith.constant 0 : index
      %134 = vector.load %arg11[%c1_121, %c9_122, %c0_123] : memref<2x240x24xf32, #tpu.memory_space<vmem>>, vector<1x192x24xf32>
      %135 = vector.shape_cast %134 : vector<1x192x24xf32> to vector<192x24xf32>
      %c1_124 = arith.constant 1 : index
      %c2_125 = arith.constant 2 : index
      %c0_126 = arith.constant 0 : index
      %c0_127 = arith.constant 0 : index
      %136 = vector.load %arg6[%c1_124, %c2_125, %c0_126, %c0_127] : memref<2x9x24x16xf32, #tpu.memory_space<vmem>>, vector<1x1x24x16xf32>
      %137 = vector.shape_cast %136 : vector<1x1x24x16xf32> to vector<24x16xf32>
      %cst_128 = arith.constant dense<0.000000e+00> : vector<192x16xf32>
      %138 = tpu.matmul %135, %137, %cst_128 {dimension_numbers = #tpu.dot_dimension_numbers<[1], [0], [0], [1], [0, 0, 1, 1], [], []>} : vector<192x24xf32>, vector<24x16xf32>, vector<192x16xf32> -> vector<192x16xf32>
      %139 = arith.addf %133, %138 : vector<192x16xf32>
      %c1_129 = arith.constant 1 : index
      %c23_130 = arith.constant 23 : index
      %c0_131 = arith.constant 0 : index
      %140 = vector.load %arg11[%c1_129, %c23_130, %c0_131] : memref<2x240x24xf32, #tpu.memory_space<vmem>>, vector<1x192x24xf32>
      %141 = vector.shape_cast %140 : vector<1x192x24xf32> to vector<192x24xf32>
      %c1_132 = arith.constant 1 : index
      %c3_133 = arith.constant 3 : index
      %c0_134 = arith.constant 0 : index
      %c0_135 = arith.constant 0 : index
      %142 = vector.load %arg6[%c1_132, %c3_133, %c0_134, %c0_135] : memref<2x9x24x16xf32, #tpu.memory_space<vmem>>, vector<1x1x24x16xf32>
      %143 = vector.shape_cast %142 : vector<1x1x24x16xf32> to vector<24x16xf32>
      %cst_136 = arith.constant dense<0.000000e+00> : vector<192x16xf32>
      %144 = tpu.matmul %141, %143, %cst_136 {dimension_numbers = #tpu.dot_dimension_numbers<[1], [0], [0], [1], [0, 0, 1, 1], [], []>} : vector<192x24xf32>, vector<24x16xf32>, vector<192x16xf32> -> vector<192x16xf32>
      %145 = arith.addf %139, %144 : vector<192x16xf32>
      %c1_137 = arith.constant 1 : index
      %c24_138 = arith.constant 24 : index
      %c0_139 = arith.constant 0 : index
      %146 = vector.load %arg11[%c1_137, %c24_138, %c0_139] : memref<2x240x24xf32, #tpu.memory_space<vmem>>, vector<1x192x24xf32>
      %147 = vector.shape_cast %146 : vector<1x192x24xf32> to vector<192x24xf32>
      %c1_140 = arith.constant 1 : index
      %c4_141 = arith.constant 4 : index
      %c0_142 = arith.constant 0 : index
      %c0_143 = arith.constant 0 : index
      %148 = vector.load %arg6[%c1_140, %c4_141, %c0_142, %c0_143] : memref<2x9x24x16xf32, #tpu.memory_space<vmem>>, vector<1x1x24x16xf32>
      %149 = vector.shape_cast %148 : vector<1x1x24x16xf32> to vector<24x16xf32>
      %cst_144 = arith.constant dense<0.000000e+00> : vector<192x16xf32>
      %150 = tpu.matmul %147, %149, %cst_144 {dimension_numbers = #tpu.dot_dimension_numbers<[1], [0], [0], [1], [0, 0, 1, 1], [], []>} : vector<192x24xf32>, vector<24x16xf32>, vector<192x16xf32> -> vector<192x16xf32>
      %151 = arith.addf %145, %150 : vector<192x16xf32>
      %c1_145 = arith.constant 1 : index
      %c25_146 = arith.constant 25 : index
      %c0_147 = arith.constant 0 : index
      %152 = vector.load %arg11[%c1_145, %c25_146, %c0_147] : memref<2x240x24xf32, #tpu.memory_space<vmem>>, vector<1x192x24xf32>
      %153 = vector.shape_cast %152 : vector<1x192x24xf32> to vector<192x24xf32>
      %c1_148 = arith.constant 1 : index
      %c5_149 = arith.constant 5 : index
      %c0_150 = arith.constant 0 : index
      %c0_151 = arith.constant 0 : index
      %154 = vector.load %arg6[%c1_148, %c5_149, %c0_150, %c0_151] : memref<2x9x24x16xf32, #tpu.memory_space<vmem>>, vector<1x1x24x16xf32>
      %155 = vector.shape_cast %154 : vector<1x1x24x16xf32> to vector<24x16xf32>
      %cst_152 = arith.constant dense<0.000000e+00> : vector<192x16xf32>
      %156 = tpu.matmul %153, %155, %cst_152 {dimension_numbers = #tpu.dot_dimension_numbers<[1], [0], [0], [1], [0, 0, 1, 1], [], []>} : vector<192x24xf32>, vector<24x16xf32>, vector<192x16xf32> -> vector<192x16xf32>
      %157 = arith.addf %151, %156 : vector<192x16xf32>
      %c1_153 = arith.constant 1 : index
      %c39_154 = arith.constant 39 : index
      %c0_155 = arith.constant 0 : index
      %158 = vector.load %arg11[%c1_153, %c39_154, %c0_155] : memref<2x240x24xf32, #tpu.memory_space<vmem>>, vector<1x192x24xf32>
      %159 = vector.shape_cast %158 : vector<1x192x24xf32> to vector<192x24xf32>
      %c1_156 = arith.constant 1 : index
      %c6_157 = arith.constant 6 : index
      %c0_158 = arith.constant 0 : index
      %c0_159 = arith.constant 0 : index
      %160 = vector.load %arg6[%c1_156, %c6_157, %c0_158, %c0_159] : memref<2x9x24x16xf32, #tpu.memory_space<vmem>>, vector<1x1x24x16xf32>
      %161 = vector.shape_cast %160 : vector<1x1x24x16xf32> to vector<24x16xf32>
      %cst_160 = arith.constant dense<0.000000e+00> : vector<192x16xf32>
      %162 = tpu.matmul %159, %161, %cst_160 {dimension_numbers = #tpu.dot_dimension_numbers<[1], [0], [0], [1], [0, 0, 1, 1], [], []>} : vector<192x24xf32>, vector<24x16xf32>, vector<192x16xf32> -> vector<192x16xf32>
      %163 = arith.addf %157, %162 : vector<192x16xf32>
      %c1_161 = arith.constant 1 : index
      %c40_162 = arith.constant 40 : index
      %c0_163 = arith.constant 0 : index
      %164 = vector.load %arg11[%c1_161, %c40_162, %c0_163] : memref<2x240x24xf32, #tpu.memory_space<vmem>>, vector<1x192x24xf32>
      %165 = vector.shape_cast %164 : vector<1x192x24xf32> to vector<192x24xf32>
      %c1_164 = arith.constant 1 : index
      %c7_165 = arith.constant 7 : index
      %c0_166 = arith.constant 0 : index
      %c0_167 = arith.constant 0 : index
      %166 = vector.load %arg6[%c1_164, %c7_165, %c0_166, %c0_167] : memref<2x9x24x16xf32, #tpu.memory_space<vmem>>, vector<1x1x24x16xf32>
      %167 = vector.shape_cast %166 : vector<1x1x24x16xf32> to vector<24x16xf32>
      %cst_168 = arith.constant dense<0.000000e+00> : vector<192x16xf32>
      %168 = tpu.matmul %165, %167, %cst_168 {dimension_numbers = #tpu.dot_dimension_numbers<[1], [0], [0], [1], [0, 0, 1, 1], [], []>} : vector<192x24xf32>, vector<24x16xf32>, vector<192x16xf32> -> vector<192x16xf32>
      %169 = arith.addf %163, %168 : vector<192x16xf32>
      %c1_169 = arith.constant 1 : index
      %c41_170 = arith.constant 41 : index
      %c0_171 = arith.constant 0 : index
      %170 = vector.load %arg11[%c1_169, %c41_170, %c0_171] : memref<2x240x24xf32, #tpu.memory_space<vmem>>, vector<1x192x24xf32>
      %171 = vector.shape_cast %170 : vector<1x192x24xf32> to vector<192x24xf32>
      %c1_172 = arith.constant 1 : index
      %c8_173 = arith.constant 8 : index
      %c0_174 = arith.constant 0 : index
      %c0_175 = arith.constant 0 : index
      %172 = vector.load %arg6[%c1_172, %c8_173, %c0_174, %c0_175] : memref<2x9x24x16xf32, #tpu.memory_space<vmem>>, vector<1x1x24x16xf32>
      %173 = vector.shape_cast %172 : vector<1x1x24x16xf32> to vector<24x16xf32>
      %cst_176 = arith.constant dense<0.000000e+00> : vector<192x16xf32>
      %174 = tpu.matmul %171, %173, %cst_176 {dimension_numbers = #tpu.dot_dimension_numbers<[1], [0], [0], [1], [0, 0, 1, 1], [], []>} : vector<192x24xf32>, vector<24x16xf32>, vector<192x16xf32> -> vector<192x16xf32>
      %175 = arith.addf %169, %174 : vector<192x16xf32>
      %c1_177 = arith.constant 1 : index
      %c0_178 = arith.constant 0 : index
      %c0_179 = arith.constant 0 : index
      %176 = vector.load %arg7[%c1_177, %c0_178, %c0_179] : memref<2x1x16xf32, #tpu.memory_space<vmem>>, vector<1x1x16xf32>
      %177 = vector.shape_cast %176 : vector<1x1x16xf32> to vector<1x16xf32>
      %178 = vector.broadcast %177 : vector<1x16xf32> to vector<192x16xf32>
      %179 = arith.addf %175, %178 : vector<192x16xf32>
      %cst_180 = arith.constant 0.000000e+00 : f32
      %180 = vector.broadcast %cst_180 : f32 to vector<192x16xf32>
      %181 = arith.maximumf %179, %180 : vector<192x16xf32>
      %182 = tpu.concatenate %181, %117 in 1 : vector<192x16xf32>, vector<192x8xf32> -> vector<192x24xf32>
      %c1_181 = arith.constant 1 : index
      %c0_182 = arith.constant 0 : index
      %c0_183 = arith.constant 0 : index
      %183 = vector.load %arg8[%c1_181, %c0_182, %c0_183] : memref<2x24x16xf32, #tpu.memory_space<vmem>>, vector<1x24x16xf32>
      %184 = vector.shape_cast %183 : vector<1x24x16xf32> to vector<24x16xf32>
      %cst_184 = arith.constant dense<0.000000e+00> : vector<192x16xf32>
      %185 = tpu.matmul %182, %184, %cst_184 {dimension_numbers = #tpu.dot_dimension_numbers<[1], [0], [0], [1], [0, 0, 1, 1], [], []>} : vector<192x24xf32>, vector<24x16xf32>, vector<192x16xf32> -> vector<192x16xf32>
      %c1_185 = arith.constant 1 : index
      %c0_186 = arith.constant 0 : index
      %c0_187 = arith.constant 0 : index
      %186 = vector.load %arg9[%c1_185, %c0_186, %c0_187] : memref<2x1x16xf32, #tpu.memory_space<vmem>>, vector<1x1x16xf32>
      %187 = vector.shape_cast %186 : vector<1x1x16xf32> to vector<1x16xf32>
      %188 = vector.broadcast %187 : vector<1x16xf32> to vector<192x16xf32>
      %189 = arith.addf %185, %188 : vector<192x16xf32>
      %cst_188 = arith.constant 0.000000e+00 : f32
      %190 = vector.broadcast %cst_188 : f32 to vector<192x16xf32>
      %191 = arith.maximumf %189, %190 : vector<192x16xf32>
      %192 = arith.addf %191, %97 : vector<192x16xf32>
      %c0_189 = arith.constant 0 : index
      %c0_190 = arith.constant 0 : index
      %c0_191 = arith.constant 0 : index
      %193 = vector.load %arg10[%c0_189, %c0_190, %c0_191] : memref<1x192x16xf32, #tpu.memory_space<vmem>>, vector<1x192x16xf32>
      %194 = vector.shape_cast %193 : vector<1x192x16xf32> to vector<192x16xf32>
      %195 = vector.shape_cast %192 : vector<192x16xf32> to vector<1x192x16xf32>
      tpu.vector_store %arg10[%c0_189, %c0_190, %c0_191], %195 {strides = array<i32>} : memref<1x192x16xf32, #tpu.memory_space<vmem>>, vector<1x192x16xf32>,
    } else {
    }
    return
  }
  func.func @transform_0(%arg0: i32, %arg1: i32) -> (i32, i32, i32, i32) {
    %c0_i32 = arith.constant 0 : i32
    %c0_i32_0 = arith.constant 0 : i32
    %c0_i32_1 = arith.constant 0 : i32
    return %arg0, %arg1, %c0_i32, %c0_i32_0 : i32, i32, i32, i32
  }
  func.func @transform_1(%arg0: i32, %arg1: i32) -> (i32, i32) {
    %c0_i32 = arith.constant 0 : i32
    %c0_i32_0 = arith.constant 0 : i32
    %c0_i32_1 = arith.constant 0 : i32
    return %c0_i32, %c0_i32_0 : i32, i32
  }
  func.func @transform_2(%arg0: i32, %arg1: i32) -> (i32, i32, i32) {
    %c0_i32 = arith.constant 0 : i32
    %c0_i32_0 = arith.constant 0 : i32
    %c0_i32_1 = arith.constant 0 : i32
    %c0_i32_2 = arith.constant 0 : i32
    return %c0_i32, %c0_i32_0, %c0_i32_1 : i32, i32, i32
  }
  func.func @transform_3(%arg0: i32, %arg1: i32) -> (i32, i32, i32) {
    %c0_i32 = arith.constant 0 : i32
    %c0_i32_0 = arith.constant 0 : i32
    %c0_i32_1 = arith.constant 0 : i32
    %c0_i32_2 = arith.constant 0 : i32
    return %c0_i32, %c0_i32_0, %c0_i32_1 : i32, i32, i32
  }
  func.func @transform_4(%arg0: i32, %arg1: i32) -> (i32, i32, i32, i32) {
    %c0_i32 = arith.constant 0 : i32
    %c0_i32_0 = arith.constant 0 : i32
    %c0_i32_1 = arith.constant 0 : i32
    %c0_i32_2 = arith.constant 0 : i32
    %c0_i32_3 = arith.constant 0 : i32
    return %c0_i32, %c0_i32_0, %c0_i32_1, %c0_i32_2 : i32, i32, i32, i32
  }
  func.func @transform_5(%arg0: i32, %arg1: i32) -> (i32, i32, i32) {
    %c0_i32 = arith.constant 0 : i32
    %c0_i32_0 = arith.constant 0 : i32
    %c0_i32_1 = arith.constant 0 : i32
    %c0_i32_2 = arith.constant 0 : i32
    return %c0_i32, %c0_i32_0, %c0_i32_1 : i32, i32, i32
  }
  func.func @transform_6(%arg0: i32, %arg1: i32) -> (i32, i32, i32) {
    %c0_i32 = arith.constant 0 : i32
    %c0_i32_0 = arith.constant 0 : i32
    %c0_i32_1 = arith.constant 0 : i32
    %c0_i32_2 = arith.constant 0 : i32
    return %c0_i32, %c0_i32_0, %c0_i32_1 : i32, i32, i32
  }
  func.func @transform_7(%arg0: i32, %arg1: i32) -> (i32, i32, i32) {
    %c0_i32 = arith.constant 0 : i32
    %c0_i32_0 = arith.constant 0 : i32
    %c0_i32_1 = arith.constant 0 : i32
    %c0_i32_2 = arith.constant 0 : i32
    return %c0_i32, %c0_i32_0, %c0_i32_1 : i32, i32, i32
  }
  func.func @transform_8(%arg0: i32, %arg1: i32) -> (i32, i32, i32) {
    %c0_i32 = arith.constant 0 : i32
    %c0_i32_0 = arith.constant 0 : i32
    %c0_i32_1 = arith.constant 0 : i32
    return %arg0, %c0_i32, %c0_i32_0 : i32, i32, i32
  }
}

</mosaic_0001>

<bundles_post_ra>
// kernel: tpu_custom_call.1
= control target key start
LH: loop header
LB: loop body
LE: loop exit
PB: predicated region body
PF: predicated region fallthrough
CT: control target
= control target key end

     0   :  { %s10641_s27 = smov 0   ;;  %s10643_s28 = smov 0   ;;  %s13236_s0 = inlined_call_operand.vmem [shape: f32[2,4,192,16], index: 0, kind: input, shape index: {}]   ;;  %s13237_s1 = inlined_call_operand.vmem [shape: f32[192,1], index: 1, kind: input, shape index: {}]   ;;  %s13238_s2 = inlined_call_operand.vmem [shape: f32[2,16,24], index: 2, kind: input, shape index: {}]   ;;  %s13239_s3 = inlined_call_operand.vmem [shape: f32[2,1,24], index: 3, kind: input, shape index: {}]   ;;  %s13240_s4 = inlined_call_operand.vmem [shape: f32[2,9,24,16], index: 4, kind: input, shape index: {}]   ;;  %s13241_s5 = inlined_call_operand.vmem [shape: f32[2,1,16], index: 5, kind: input, shape index: {}]   ;;  %s13242_s6 = inlined_call_operand.vmem [shape: f32[2,24,16], index: 6, kind: input, shape index: {}]   ;;  %s13243_s7 = inlined_call_operand.vmem [shape: f32[2,1,16], index: 7, kind: input, shape index: {}]   ;;  %s13244_s8 = inlined_call_operand.vmem [shape: f32[2,192,16], index: 8, kind: output, shape index: {}]  }
   0x1   :  { %s10645_s29 = smov 0   ;;  %s10647_s30 = smov 0  }
   0x2   :  { %s10649_s9 = smov 0  }
   0x3 LB: > { %s27_s10 = sadd.s32 1, %s10583_s29  ;;  %s30_s11 = sadd.s32 1, %s10587_s30  ;;  %s10591_s9 = sphi %s10649_s9, %s18_s9   ;;  %s10587_s30 = sphi %s10647_s30, %s13587_s30   ;;  %s10583_s29 = sphi %s10645_s29, %s13586_s29   ;;  %s10579_s28 = sphi %s10643_s28, %s13585_s28   ;;  %s10575_s27 = sphi %s10641_s27, %s13584_s27  }
   0x4   : > { %p28_p0 = scmp.ge.s32.totalorder %s27_s10, 4  ;;  %p7897_p1 = scmp.ge.s32.totalorder %s10591_s9, 1 }
   0x5   : > { %p280_p2 = scmp.lt.s32.totalorder %s10591_s9, 9 }
   0x6   : > { %s13589_s10 = smov (%p28_p0, %s27_s10), 0  ;;  %s13591_s11 = smov (!%p28_p0, %s30_s11), %s10587_s30 }
   0x7   : > { %p281_p3 = pnand %p7897_p1, %p280_p2  ;;  %p32_p4 = scmp.ge.s32.totalorder %s13591_s11, 2 }
   0x9   : > { %s13593_s11 = smov (%p32_p4, %s13591_s11), 0  ;;  %284 = sbr.rel (%p281_p3) target bundleno = 1921 (0x781), region = 52 }
  0x10   : > { %p318_p5 = scmp.lt.s32.totalorder %s10579_s28, 1  ;;  %p320_p6 = scmp.lt.s32.totalorder %s10575_s27, 3 }
  0x11   : > { %p7900_p7 = scmp.ne.s32.totalorder %s10575_s27, 0 }
  0x12   : > { %s13595_s28 = smov (!%p318_p5, %s10579_s28), 1  ;;  %vm336_vm0 = vcmask (!%p7900_p7), 195584   ;;  %v10593_v0 = vmov (!%p7900_p7), 0.0  }
  0x13   : > { %s321_s12 = scalar_select %p320_p6, %s10575_s27, 3 }
  0x14   : > { %s10482_s13 = smul.u32 96, %s13595_s28  ;;  %337 = vst.msk [vmem:[#allocation2] sm:$0xff] (!%p7900_p7), %vm336_vm0, %v10593_v0  ;;  %338 = vst.msk [vmem:[#allocation2 + $0x8] sm:$0xff] (!%p7900_p7), %vm336_vm0, %v10593_v0 }
  0x15   : > { %s10481_s14 = smul.u32 24, %s321_s12  ;;  %339 = vst.msk [vmem:[#allocation2 + $0x10] sm:$0xff] (!%p7900_p7), %vm336_vm0, %v10593_v0  ;;  %340 = vst.msk [vmem:[#allocation2 + $0x18] sm:$0xff] (!%p7900_p7), %vm336_vm0, %v10593_v0 }
  0x16   : > { %s10483_s15 = smul.u32 192, %s13595_s28  ;;  %341 = vst.msk [vmem:[#allocation2 + $0x20] sm:$0xff] (!%p7900_p7), %vm336_vm0, %v10593_v0  ;;  %342 = vst.msk [vmem:[#allocation2 + $0x28] sm:$0xff] (!%p7900_p7), %vm336_vm0, %v10593_v0 }
  0x17   : > { %s324_s16 = sadd.s32 %s10482_s13, %s10481_s14  ;;  %335 = sbr.rel (%p7900_p7) target bundleno = 50 (0x32), region = 56  ;;  %343 = vst.msk [vmem:[#allocation2 + $0x30] sm:$0xff] (!%p7900_p7), %vm336_vm0, %v10593_v0  ;;  %344 = vst.msk [vmem:[#allocation2 + $0x38] sm:$0xff] (!%p7900_p7), %vm336_vm0, %v10593_v0 }
  0x18   : > { %s7898_s17 = sshll.u32 %s324_s16, 3  ;;  %s10678_s20 = scalar_lea.vmem %s13244_s8, %s10483_s15  ;;  %345 = vst.msk [vmem:[#allocation2 + $0x40] sm:$0xff] (!%p7900_p7), %vm336_vm0, %v10593_v0  ;;  %346 = vst.msk [vmem:[#allocation2 + $0x48] sm:$0xff] (!%p7900_p7), %vm336_vm0, %v10593_v0 }
  0x19   : > { %s10683_s23 = scalar_lea.vmem %s13236_s0, %s7898_s17  ;;  %347 = vst.msk [vmem:[#allocation2 + $0x50] sm:$0xff] (!%p7900_p7), %vm336_vm0, %v10593_v0  ;;  %348 = vst.msk [vmem:[#allocation2 + $0x58] sm:$0xff] (!%p7900_p7), %vm336_vm0, %v10593_v0 }
  0x1a   : > { %349 = vst.msk [vmem:[#allocation2 + $0x60] sm:$0xff] (!%p7900_p7), %vm336_vm0, %v10593_v0  ;;  %350 = vst.msk [vmem:[#allocation2 + $0x68] sm:$0xff] (!%p7900_p7), %vm336_vm0, %v10593_v0 }
  0x1b   : > { %351 = vst.msk [vmem:[#allocation2 + $0x70] sm:$0xff] (!%p7900_p7), %vm336_vm0, %v10593_v0  ;;  %352 = vst.msk [vmem:[#allocation2 + $0x78] sm:$0xff] (!%p7900_p7), %vm336_vm0, %v10593_v0 }
  0x1c   : > { %353 = vst.msk [vmem:[#allocation2 + $0x80] sm:$0xff] (!%p7900_p7), %vm336_vm0, %v10593_v0  ;;  %354 = vst.msk [vmem:[#allocation2 + $0x88] sm:$0xff] (!%p7900_p7), %vm336_vm0, %v10593_v0 }
  0x1d   : > { %355 = vst.msk [vmem:[#allocation2 + $0x90] sm:$0xff] (!%p7900_p7), %vm336_vm0, %v10593_v0  ;;  %356 = vst.msk [vmem:[#allocation2 + $0x98] sm:$0xff] (!%p7900_p7), %vm336_vm0, %v10593_v0 }
  0x1e   : > { %357 = vst.msk [vmem:[#allocation2 + $0xa0] sm:$0xff] %vm336_vm0, %v10593_v0  ;;  %358 = vst.msk [vmem:[#allocation2 + $0xa8] sm:$0xff] %vm336_vm0, %v10593_v0 }
  0x1f   : > { %359 = vst.msk [vmem:[#allocation2 + $0xb0] sm:$0xff] %vm336_vm0, %v10593_v0  ;;  %360 = vst.msk [vmem:[#allocation2 + $0xb8] sm:$0xff] %vm336_vm0, %v10593_v0 }
  0x20   : > { %361 = vst.msk [vmem:[#allocation2 + $0xc0] sm:$0xff] %vm336_vm0, %v10593_v0  ;;  %362 = vst.msk [vmem:[#allocation2 + $0xc8] sm:$0xff] %vm336_vm0, %v10593_v0 }
  0x21   : > { %363 = vst.msk [vmem:[#allocation2 + $0xd0] sm:$0xff] %vm336_vm0, %v10593_v0  ;;  %364 = vst.msk [vmem:[#allocation2 + $0xd8] sm:$0xff] %vm336_vm0, %v10593_v0 }
  0x22   : > { %365 = vst.msk [vmem:[#allocation2 + $0xe0] sm:$0xff] %vm336_vm0, %v10593_v0  ;;  %366 = vst.msk [vmem:[#allocation2 + $0xe8] sm:$0xff] %vm336_vm0, %v10593_v0 }
  0x23   : > { %367 = vst.msk [vmem:[#allocation2 + $0xf0] sm:$0xff] %vm336_vm0, %v10593_v0  ;;  %368 = vst.msk [vmem:[#allocation2 + $0xf8] sm:$0xff] %vm336_vm0, %v10593_v0 }
  0x24   : > { %369 = vst.msk [vmem:[#allocation2 + $0x100] sm:$0xff] %vm336_vm0, %v10593_v0  ;;  %370 = vst.msk [vmem:[#allocation2 + $0x108] sm:$0xff] %vm336_vm0, %v10593_v0 }
  0x25   : > { %371 = vst.msk [vmem:[#allocation2 + $0x110] sm:$0xff] %vm336_vm0, %v10593_v0  ;;  %372 = vst.msk [vmem:[#allocation2 + $0x118] sm:$0xff] %vm336_vm0, %v10593_v0 }
  0x26   : > { %373 = vst.msk [vmem:[#allocation2 + $0x120] sm:$0xff] %vm336_vm0, %v10593_v0  ;;  %374 = vst.msk [vmem:[#allocation2 + $0x128] sm:$0xff] %vm336_vm0, %v10593_v0 }
  0x27   : > { %375 = vst.msk [vmem:[#allocation2 + $0x130] sm:$0xff] %vm336_vm0, %v10593_v0  ;;  %376 = vst.msk [vmem:[#allocation2 + $0x138] sm:$0xff] %vm336_vm0, %v10593_v0 }
  0x28   : > { %377 = vst.msk [vmem:[#allocation2 + $0x140] sm:$0xff] %vm336_vm0, %v10593_v0  ;;  %378 = vst.msk [vmem:[#allocation2 + $0x148] sm:$0xff] %vm336_vm0, %v10593_v0 }
  0x29   : > { %379 = vst.msk [vmem:[#allocation2 + $0x150] sm:$0xff] %vm336_vm0, %v10593_v0  ;;  %380 = vst.msk [vmem:[#allocation2 + $0x158] sm:$0xff] %vm336_vm0, %v10593_v0 }
  0x2a   : > { %381 = vst.msk [vmem:[#allocation2 + $0x160] sm:$0xff] %vm336_vm0, %v10593_v0  ;;  %382 = vst.msk [vmem:[#allocation2 + $0x168] sm:$0xff] %vm336_vm0, %v10593_v0 }
  0x2b   : > { %383 = vst.msk [vmem:[#allocation2 + $0x170] sm:$0xff] %vm336_vm0, %v10593_v0  ;;  %384 = vst.msk [vmem:[#allocation2 + $0x178] sm:$0xff] %vm336_vm0, %v10593_v0 }
  0x2c   : > { %385 = vst.msk [vmem:[#allocation2 + $0x180] sm:$0xff] %vm336_vm0, %v10593_v0  ;;  %386 = vst.msk [vmem:[#allocation2 + $0x188] sm:$0xff] %vm336_vm0, %v10593_v0 }
  0x2d   : > { %387 = vst.msk [vmem:[#allocation2 + $0x190] sm:$0xff] %vm336_vm0, %v10593_v0  ;;  %388 = vst.msk [vmem:[#allocation2 + $0x198] sm:$0xff] %vm336_vm0, %v10593_v0 }
  0x2e   : > { %389 = vst.msk [vmem:[#allocation2 + $0x1a0] sm:$0xff] %vm336_vm0, %v10593_v0  ;;  %390 = vst.msk [vmem:[#allocation2 + $0x1a8] sm:$0xff] %vm336_vm0, %v10593_v0 }
  0x2f   : > { %391 = vst.msk [vmem:[#allocation2 + $0x1b0] sm:$0xff] %vm336_vm0, %v10593_v0  ;;  %392 = vst.msk [vmem:[#allocation2 + $0x1b8] sm:$0xff] %vm336_vm0, %v10593_v0 }
  0x30   : > { %393 = vst.msk [vmem:[#allocation2 + $0x1c0] sm:$0xff] %vm336_vm0, %v10593_v0  ;;  %394 = vst.msk [vmem:[#allocation2 + $0x1c8] sm:$0xff] %vm336_vm0, %v10593_v0 }
  0x31   : > { %395 = vst.msk [vmem:[#allocation2 + $0x1d0] sm:$0xff] %vm336_vm0, %v10593_v0  ;;  %396 = vst.msk [vmem:[#allocation2 + $0x1d8] sm:$0xff] %vm336_vm0, %v10593_v0 }
  0x32 PF: > { %v399_v1 = vld [vmem:[%s13237_s1 + $0x10] sm:$0xff]  ;;  %v397_v2 = vld [vmem:[%s13237_s1] sm:$0xff]  ;;  %vm454_vm1 = vcmask 130048   ;;  %v10594_v4 = vmov 0   ;;  %v446_v5 = vld [vmem:[%s13238_s2 + $0x8] sm:$0xff]  ;;  %s10595_s26 = smov 16  }
  0x33   : > { %v445_v3 = vld [vmem:[%s13238_s2] sm:$0xff]  ;;  %10528 = vset.pattern.permute.xlu1 %v10594_v4  ;;  %10527 = vset.pattern.permute.xlu0 %v10594_v4  ;;  %v400_v8 = vld [vmem:[%s13237_s1 + $0x18] sm:$0xff]  ;;  %v398_v9 = vld [vmem:[%s13237_s1 + $0x8] sm:$0xff]  ;;  %vm1024_vm2 = vcmask 195584   ;;  %p8220_p8 = scmp.ne.s32.totalorder %s10575_s27, 3 }
  0x34   : > { %v421_v6 = vld [vmem:[%s10683_s23] sm:$0xff]  ;;  %748 = vperm.xlu1 %10528, %v399_v1   ;;  %738 = vperm.xlu0 %10527, %v397_v2   ;;  %v10009_v7 = vpack.c.bf16 %v446_v5, %v445_v3  ;;  %v422_v10 = vld [vmem:[%s10683_s23 + $0x8] sm:$0xff]  ;;  %v423_v11 = vld [vmem:[%s10683_s23 + $0x10] sm:$0xff] }
  0x35   : > { %9093 = vmatprep.mubr.msk.f32.mxu0 %vm454_vm1, %v421_v6  ;;  %v402_v12 = vld [vmem:[%s13237_s1 + $0x28] sm:$0xff]  ;;  %v401_v13 = vld [vmem:[%s13237_s1 + $0x20] sm:$0xff]  ;;  %v424_v14 = vld [vmem:[%s10683_s23 + $0x18] sm:$0xff] }
  0x36   : > { %10010 = vmatprep.subr.bf16.mxu0 %v10009_v7  ;;  %v425_v15 = vld [vmem:[%s10683_s23 + $0x20] sm:$0xff]  ;;  %v880_v17 = vld [vmem:[#allocation2 + $0x18] sm:$0xff]  ;;  %v426_v18 = vld [vmem:[%s10683_s23 + $0x28] sm:$0xff] }
  0x37   : > { %10012 = vmatpush3.bf16.msra.mxu0 %v10009_v7  ;;  %v881_v16 = vld [vmem:[#allocation2 + $0x20] sm:$0xff]  ;;  %v427_v19 = vld [vmem:[%s10683_s23 + $0x30] sm:$0xff]  ;;  %v404_v20 = vld [vmem:[%s13237_s1 + $0x38] sm:$0xff] }
  0x38   : > { %753 = vperm.xlu1 %10528, %v400_v8   ;;  %743 = vperm.xlu0 %10527, %v398_v9   ;;  %v403_v21 = vld [vmem:[%s13237_s1 + $0x30] sm:$0xff]  ;;  %v428_v22 = vld [vmem:[%s10683_s23 + $0x38] sm:$0xff]  ;;  %v429_v23 = vld [vmem:[%s10683_s23 + $0x40] sm:$0xff] }
  0x39   : > { %v883_v24 = vld [vmem:[#allocation2 + $0x30] sm:$0xff]  ;;  %v882_v25 = vld [vmem:[#allocation2 + $0x28] sm:$0xff]  ;;  %v405_v29 = vld [vmem:[%s13237_s1 + $0x40] sm:$0xff] }
  0x3a   : > { %9094 = vmatmul.mubr.msk.f32.vlgmr.msra.gmra.mrb[0].mxu0 %vm454_vm1, %v422_v10  ;;  %v430_v26 = vld [vmem:[%s10683_s23 + $0x48] sm:$0xff]  ;;  %v431_v27 = vld [vmem:[%s10683_s23 + $0x50] sm:$0xff]  ;;  %v432_v30 = vld [vmem:[%s10683_s23 + $0x58] sm:$0xff] }
  0x3b   : > { %9096 = vmatprep.mubr.msk.f32.mxu0 %vm454_vm1, %v423_v11  ;;  %v406_v28 = vld [vmem:[%s13237_s1 + $0x48] sm:$0xff]  ;;  %v433_v31 = vld [vmem:[%s10683_s23 + $0x60] sm:$0xff]  ;;  %v884_v33 = vld [vmem:[#allocation2 + $0x38] sm:$0xff] }
  0x3c   : > { %763 = vperm.xlu1 %10528, %v402_v12   ;;  %758 = vperm.xlu0 %10527, %v401_v13   ;;  %v885_v32 = vld [vmem:[#allocation2 + $0x40] sm:$0xff]  ;;  %v434_v34 = vld [vmem:[%s10683_s23 + $0x68] sm:$0xff]  ;;  %v435_v35 = vld [vmem:[%s10683_s23 + $0x70] sm:$0xff] }
  0x3d   : > { %v408_v36 = vld [vmem:[%s13237_s1 + $0x58] sm:$0xff]  ;;  %v407_v37 = vld [vmem:[%s13237_s1 + $0x50] sm:$0xff]  ;;  %v437_v39 = vld [vmem:[%s10683_s23 + $0x80] sm:$0xff] }
  0x3e   : > { %9097 = vmatmul.mubr.msk.f32.gmra.mrb[2].mxu0 %vm454_vm1, %v424_v14  ;;  %v436_v38 = vld [vmem:[%s10683_s23 + $0x78] sm:$0xff]  ;;  %v887_v40 = vld [vmem:[#allocation2 + $0x50] sm:$0xff]  ;;  %v886_v41 = vld [vmem:[#allocation2 + $0x48] sm:$0xff] }
  0x3f   : > { %9099 = vmatprep.mubr.msk.f32.mxu0 %vm454_vm1, %v425_v15  ;;  %v438_v42 = vld [vmem:[%s10683_s23 + $0x88] sm:$0xff]  ;;  %v439_v43 = vld [vmem:[%s10683_s23 + $0x90] sm:$0xff]  ;;  %v409_v45 = vld [vmem:[%s13237_s1 + $0x60] sm:$0xff] }
  0x40   : > { %930 = vrot.lane.b32.xlu1 %v881_v16, %s10595_s26  ;;  %928 = vrot.lane.b32.xlu0 %v880_v17, %s10595_s26  ;;  %v410_v44 = vld [vmem:[%s13237_s1 + $0x68] sm:$0xff]  ;;  %v440_v46 = vld [vmem:[%s10683_s23 + $0x98] sm:$0xff]  ;;  %v889_v48 = vld [vmem:[#allocation2 + $0x60] sm:$0xff] }
  0x41   : > { %v441_v47 = vld [vmem:[%s10683_s23 + $0xa0] sm:$0xff]  ;;  %v888_v49 = vld [vmem:[#allocation2 + $0x58] sm:$0xff]  ;;  %v442_v50 = vld [vmem:[%s10683_s23 + $0xa8] sm:$0xff] }
  0x42   : > { %9100 = vmatmul.mubr.msk.f32.gmra.mrb[4].mxu0 %vm454_vm1, %v426_v18  ;;  %v443_v51 = vld [vmem:[%s10683_s23 + $0xb0] sm:$0xff]  ;;  %v412_v52 = vld [vmem:[%s13237_s1 + $0x78] sm:$0xff]  ;;  %v890_v56 = vld [vmem:[#allocation2 + $0x68] sm:$0xff] }
  0x43   : > { %9102 = vmatprep.mubr.msk.f32.mxu0 %vm454_vm1, %v427_v19  ;;  %v411_v53 = vld [vmem:[%s13237_s1 + $0x70] sm:$0xff]  ;;  %v444_v54 = vld [vmem:[%s10683_s23 + $0xb8] sm:$0xff]  ;;  %v414_v57 = vld [vmem:[%s13237_s1 + $0x88] sm:$0xff] }
  0x44   : > { %773 = vperm.xlu1 %10528, %v404_v20   ;;  %768 = vperm.xlu0 %10527, %v403_v21   ;;  %v891_v55 = vld [vmem:[#allocation2 + $0x70] sm:$0xff]  ;;  %v413_v58 = vld [vmem:[%s13237_s1 + $0x80] sm:$0xff]  ;;  %v892_v60 = vld [vmem:[#allocation2 + $0x78] sm:$0xff] }
  0x45   : > { %v893_v59 = vld [vmem:[#allocation2 + $0x80] sm:$0xff]  ;;  %v416_v61 = vld [vmem:[%s13237_s1 + $0x98] sm:$0xff]  ;;  %v415_v62 = vld [vmem:[%s13237_s1 + $0x90] sm:$0xff] }
  0x46   : > { %9103 = vmatmul.mubr.msk.f32.gmra.mrb[6].mxu0 %vm454_vm1, %v428_v22  ;;  %v895_v63 = vld [vmem:[#allocation2 + $0x90] sm:$0xff]  ;;  %v894_v0 = vld [vmem:[#allocation2 + $0x88] sm:$0xff]  ;;  %v417_v2 = vld [vmem:[%s13237_s1 + $0xa0] sm:$0xff] }
  0x47   : > { %9105 = vmatprep.mubr.msk.f32.mxu0 %vm454_vm1, %v429_v23  ;;  %v418_v1 = vld [vmem:[%s13237_s1 + $0xa8] sm:$0xff]  ;;  %v897_v3 = vld [vmem:[#allocation2 + $0xa0] sm:$0xff]  ;;  %v896_v4 = vld [vmem:[#allocation2 + $0x98] sm:$0xff] }
  0x48   : > { %934 = vrot.lane.b32.xlu1 %v883_v24, %s10595_s26  ;;  %932 = vrot.lane.b32.xlu0 %v882_v25, %s10595_s26  ;;  %v420_v5 = vld [vmem:[%s13237_s1 + $0xb8] sm:$0xff]  ;;  %v419_v6 = vld [vmem:[%s13237_s1 + $0xb0] sm:$0xff]  ;;  %v898_v8 = vld [vmem:[#allocation2 + $0xa8] sm:$0xff] }
  0x49   : > { %v899_v7 = vld [vmem:[#allocation2 + $0xb0] sm:$0xff]  ;;  %v901_v9 = vld [vmem:[#allocation2 + $0xc0] sm:$0xff]  ;;  %v900_v10 = vld [vmem:[#allocation2 + $0xb8] sm:$0xff] }
  0x4a   : > { %9106 = vmatmul.mubr.msk.f32.gmra.mrb[8].mxu0 %vm454_vm1, %v430_v26  ;;  %v903_v11 = vld [vmem:[#allocation2 + $0xd0] sm:$0xff]  ;;  %v902_v12 = vld [vmem:[#allocation2 + $0xc8] sm:$0xff]  ;;  %v7926_v13 = vld [vmem:[%s13240_s4 + $0x18] sm:$0xff] }
  0x4b   : > { %9108 = vmatprep.mubr.msk.f32.mxu0 %vm454_vm1, %v431_v27  ;;  %v7927_v14 = vld [vmem:[%s13240_s4 + $0x20] sm:$0xff]  ;;  %v8004_v16 = vld [vmem:[%s13240_s4 + $0x48] sm:$0xff]  ;;  %v8005_v17 = vld [vmem:[%s13240_s4 + $0x50] sm:$0xff] }
  0x4c   : > { %783 = vperm.xlu1 %10528, %v406_v28   ;;  %778 = vperm.xlu0 %10527, %v405_v29   ;;  %v10013_v15 = vpack.c.bf16 %v7927_v14, %v7926_v13  ;;  %v10025_v18 = vpack.c.bf16 %v8005_v17, %v8004_v16  ;;  %v7928_v19 = vld [vmem:[%s13240_s4 + $0x28] sm:$0xff]  ;;  %v1077_v21 = vld [vmem:[#allocation2 + $0x10] sm:$0xff]  ;;  %v8006_v22 = vld [vmem:[%s13240_s4 + $0x58] sm:$0xff] }
  0x4d   : > { %v1076_v20 = vld [vmem:[#allocation2 + $0x8] sm:$0xff]  ;;  %v8031_v23 = vld [vmem:[%s13240_s4 + $0x60] sm:$0xff] }
  0x4e   : > { %9109 = vmatmul.mubr.msk.f32.gmra.mrb[10].mxu0 %vm454_vm1, %v432_v30  ;;  %10014 = vmatprep.subr.bf16.mxu0 %v10013_v15  ;;  %v8032_v24 = vld [vmem:[%s13240_s4 + $0x68] sm:$0xff] }
  0x4f   : > { %9111 = vmatprep.mubr.msk.f32.mxu0 %vm454_vm1, %v433_v31  ;;  %10016 = vmatpush3.bf16.msra.mxu0 %v10013_v15  ;;  %v10922_v25 = vpack.c.bf16 %v8032_v24, %v8031_v23 }
  0x50   : > { %938 = vrot.lane.b32.xlu1 %v885_v32, %s10595_s26  ;;  %936 = vrot.lane.b32.xlu0 %v884_v33, %s10595_s26  ;;  %v1073_v32 = vld [vmem:[%s13240_s4] sm:$0xff]  ;;  %v1074_v33 = vld [vmem:[%s13240_s4 + $0x8] sm:$0xff] }
  0x51   : > { %10026 = vmatprep.subr.bf16.mxu1 %v10025_v18  ;;  %9133 = vmatprep.subr.mxu0 %v7928_v19 }
  0x52   : > { %9112 = vmatmul.mubr.msk.f32.gmra.mrb[12].mxu0 %vm454_vm1, %v434_v34  ;;  %10028 = vmatpush3.bf16.msra.mxu1 %v10025_v18  ;;  %v10017_v34 = vpack.c.bf16 %v1074_v33, %v1073_v32 }
  0x53   : > { %9114 = vmatprep.mubr.msk.f32.mxu0 %vm454_vm1, %v435_v35  ;;  %9134 = vmatpush3.msra.mxu0 %v7928_v19 }
  0x54   : > { %793 = vperm.xlu1 %10528, %v408_v36   ;;  %788 = vperm.xlu0 %10527, %v407_v37   ;;  %v1075_v36 = vld [vmem:[%s13240_s4 + $0x10] sm:$0xff] }
  0x55   : > { %9259 = vmatprep.subr.mxu1 %v8006_v22  ;;  %10018 = vmatprep.subr.bf16.mxu0 %v10017_v34 }
  0x56   : > { %9115 = vmatmul.mubr.msk.f32.gmra.mrb[14].mxu0 %vm454_vm1, %v436_v38  ;;  %9260 = vmatpush3.msra.mxu1 %v8006_v22 }
  0x57   : > { %9117 = vmatprep.mubr.msk.f32.mxu0 %vm454_vm1, %v437_v39  ;;  %10030 = vmatprep.subr.bf16.mxu1 %v10922_v25 }
  0x58   : > { %942 = vrot.lane.b32.xlu1 %v887_v40, %s10595_s26  ;;  %940 = vrot.lane.b32.xlu0 %v886_v41, %s10595_s26 }
  0x5a   : > { %9118 = vmatmul.mubr.msk.f32.gmra.mrb[16].mxu0 %vm454_vm1, %v438_v42 }
  0x5b   : > { %9120 = vmatprep.mubr.msk.f32.mxu0 %vm454_vm1, %v439_v43 }
  0x5c   : > { %803 = vperm.xlu1 %10528, %v410_v44   ;;  %798 = vperm.xlu0 %10527, %v409_v45  }
  0x5e   : > { %9121 = vmatmul.mubr.msk.f32.gmra.mrb[18].mxu0 %vm454_vm1, %v440_v46 }
  0x5f   : > { %9123 = vmatprep.mubr.msk.f32.mxu0 %vm454_vm1, %v441_v47 }
  0x60   : > { %946 = vrot.lane.b32.xlu1 %v889_v48, %s10595_s26  ;;  %944 = vrot.lane.b32.xlu0 %v888_v49, %s10595_s26 }
  0x62   : > { %9124 = vmatmul.mubr.msk.f32.gmra.mrb[20].mxu0 %vm454_vm1, %v442_v50 }
  0x63   : > { %9126 = vmatprep.mubr.msk.f32.mxu0 %vm454_vm1, %v443_v51 }
  0x64   : > { %813 = vperm.xlu1 %10528, %v412_v52   ;;  %808 = vperm.xlu0 %10527, %v411_v53   ;;  %v7977_v52 = vld [vmem:[%s13240_s4 + $0x30] sm:$0xff]  ;;  %v7978_v53 = vld [vmem:[%s13240_s4 + $0x38] sm:$0xff] }
  0x66   : > { %9127 = vmatmul.mubr.msk.f32.gmra.mrb[22].mxu0 %vm454_vm1, %v444_v54  ;;  %v10976_v54 = vpack.c.bf16 %v7978_v53, %v7977_v52 }
  0x67   : > { %9135 = vmatprep.mubr.msk.f32.mxu0 %vm1024_vm2, %v1076_v20 }
  0x68   : > { %950 = vrot.lane.b32.xlu1 %v891_v55, %s10595_s26  ;;  %948 = vrot.lane.b32.xlu0 %v890_v56, %s10595_s26 }
  0x6a   : > { %9136 = vmatmul.mubr.msk.f32.vlgmr.msra.gmra.mrb[24].mxu0 %vm1024_vm2, %v1077_v21 }
  0x6b   : > { %10020 = vmatpush3.bf16.msra.mxu0 %v10017_v34 }
  0x6c   : > { %823 = vperm.xlu1 %10528, %v414_v57   ;;  %818 = vperm.xlu0 %10527, %v413_v58  }
  0x6d   : > { %9175 = vmatprep.subr.mxu0 %v1075_v36 }
  0x6f   : > { %9176 = vmatpush3.msra.mxu0 %v1075_v36 }
  0x70   : > { %954 = vrot.lane.b32.xlu1 %v893_v59, %s10595_s26  ;;  %952 = vrot.lane.b32.xlu0 %v892_v60, %s10595_s26 }
  0x71   : > { %10022 = vmatprep.subr.bf16.mxu0 %v10976_v54 }
  0x74   : > { %833 = vperm.xlu1 %10528, %v416_v61   ;;  %828 = vperm.xlu0 %10527, %v415_v62  }
  0x78   : > { %958 = vrot.lane.b32.xlu1 %v895_v63, %s10595_s26  ;;  %956 = vrot.lane.b32.xlu0 %v894_v0, %s10595_s26  ;;  %v10998_v63 = vld [vmem:[%s13239_s3] ss:$0 sm:$0xff] }
  0x7c   : > { %843 = vperm.xlu1 %10528, %v418_v1   ;;  %838 = vperm.xlu0 %10527, %v417_v2  }
  0x80   : > { %962 = vrot.lane.b32.xlu1 %v897_v3, %s10595_s26  ;;  %960 = vrot.lane.b32.xlu0 %v896_v4, %s10595_s26 }
  0x84   : > { %853 = vperm.xlu1 %10528, %v420_v5   ;;  %848 = vperm.xlu0 %10527, %v419_v6  }
  0x88   : > { %966 = vrot.lane.b32.xlu1 %v899_v7, %s10595_s26  ;;  %964 = vrot.lane.b32.xlu0 %v898_v8, %s10595_s26 }
  0x8c   : > { %970 = vrot.lane.b32.xlu1 %v901_v9, %s10595_s26  ;;  %968 = vrot.lane.b32.xlu0 %v900_v10, %s10595_s26 }
  0x90   : > { %974 = vrot.lane.b32.xlu1 %v903_v11, %s10595_s26  ;;  %972 = vrot.lane.b32.xlu0 %v902_v12, %s10595_s26 }
  0xb3   : > { %v10925_v26 = vpop.permute.xlu1 %748  ;;  %v10927_v27 = vpop.permute.xlu0 %738 }
  0xb4   : > { %13358 = vst [vmem:[#allocation3_spill] sm:$0xff] %v10925_v26  ;;  %13359 = vst [vmem:[#allocation4_spill] sm:$0xff] %v10927_v27 }
  0xb7   : > { %v10929_v28 = vpop.permute.xlu1 %753  ;;  %v10931_v29 = vpop.permute.xlu0 %743 }
  0xb8   : > { %13360 = vst [vmem:[#allocation5_spill] sm:$0xff] %v10929_v28  ;;  %13361 = vst [vmem:[#allocation6_spill] sm:$0xff] %v10931_v29 }
  0xbb   : > { %v10933_v30 = vpop.permute.xlu1 %763  ;;  %v10935_v31 = vpop.permute.xlu0 %758 }
  0xbc   : > { %13362 = vst [vmem:[#allocation7_spill] sm:$0xff] %v10933_v30  ;;  %13363 = vst [vmem:[#allocation8_spill] sm:$0xff] %v10935_v31 }
  0xbf   : > { %v931_v35 = vpop.permute.xlu1 %930  ;;  %v929_v37 = vpop.permute.xlu0 %928 }
  0xc3   : > { %v10946_v38 = vpop.permute.xlu1 %773  ;;  %v10948_v39 = vpop.permute.xlu0 %768 }
  0xc4   : > { %13364 = vst [vmem:[#allocation9_spill] sm:$0xff] %v10946_v38  ;;  %13365 = vst [vmem:[#allocation10_spill] sm:$0xff] %v10948_v39 }
  0xc7   : > { %v935_v40 = vpop.permute.xlu1 %934  ;;  %v933_v41 = vpop.permute.xlu0 %932 }
  0xcb   : > { %v10950_v42 = vpop.permute.xlu1 %783  ;;  %v10952_v43 = vpop.permute.xlu0 %778 }
  0xcc   : > { %13366 = vst [vmem:[#allocation11_spill] sm:$0xff] %v10950_v42  ;;  %13367 = vst [vmem:[#allocation12_spill] sm:$0xff] %v10952_v43 }
  0xcf   : > { %v10954_v44 = vpop.permute.xlu1 %938  ;;  %v10956_v45 = vpop.permute.xlu0 %936 }
  0xd3   : > { %v10958_v46 = vpop.permute.xlu1 %793  ;;  %v10960_v47 = vpop.permute.xlu0 %788 }
  0xd4   : > { %13368 = vst [vmem:[#allocation13_spill] sm:$0xff] %v10958_v46  ;;  %13369 = vst [vmem:[#allocation14_spill] sm:$0xff] %v10960_v47 }
  0xd7   : > { %v10962_v48 = vpop.permute.xlu1 %942  ;;  %v10964_v49 = vpop.permute.xlu0 %940 }
  0xdb   : > { %v10966_v50 = vpop.permute.xlu1 %803  ;;  %v10968_v51 = vpop.permute.xlu0 %798 }
  0xdc   : > { %13370 = vst [vmem:[#allocation15_spill] sm:$0xff] %v10966_v50  ;;  %13371 = vst [vmem:[#allocation16_spill] sm:$0xff] %v10968_v51 }
  0xdf   : > { %v10979_v55 = vpop.permute.xlu1 %946  ;;  %v10981_v56 = vpop.permute.xlu0 %944 }
  0xe3   : > { %v10983_v57 = vpop.permute.xlu1 %813  ;;  %v10985_v58 = vpop.permute.xlu0 %808 }
  0xe4   : > { %13372 = vst [vmem:[#allocation17_spill] sm:$0xff] %v10983_v57  ;;  %13373 = vst [vmem:[#allocation18_spill] sm:$0xff] %v10985_v58 }
  0xe7   : > { %v10987_v59 = vpop.permute.xlu1 %950  ;;  %v10989_v60 = vpop.permute.xlu0 %948 }
  0xeb   : > { %v10991_v61 = vpop.permute.xlu1 %823  ;;  %v10993_v62 = vpop.permute.xlu0 %818 }
  0xec   : > { %13374 = vst [vmem:[#allocation19_spill] sm:$0xff] %v10991_v61  ;;  %13375 = vst [vmem:[#allocation20_spill] sm:$0xff] %v10993_v62 }
  0xef   : > { %v11001_v3 = vpop.permute.xlu1 %954  ;;  %v11004_v5 = vpop.permute.xlu0 %952 }
  0xf3   : > { %v11016_v16 = vpop.permute.xlu1 %833  ;;  %v11021_v20 = vpop.permute.xlu0 %828 }
  0xf4   : > { %13378 = vst [vmem:[#allocation23_spill] sm:$0xff] %v11016_v16  ;;  %13379 = vst [vmem:[#allocation24_spill] sm:$0xff] %v11021_v20 }
 0x10d   : > { %v9095_v0 = vpop.f32.mrb[0].mxu0 }
 0x10e   : > { %v599_v1 = vadd.f32 %v9095_v0, %v10998_v63  ;;  %v593_v2 = vpop.f32.mrb[1].mxu0 }
 0x10f   : > { %v594_v4 = vadd.f32 %v10998_v63, %v593_v2 }
 0x110   : > { %v713_v6 = vmax.f32 %v599_v1, 0.0  ;;  %v11042_v1 = vpop.permute.xlu1 %958 }
 0x111   : > { %v712_v7 = vmax.f32 %v594_v4, 0.0  ;;  %v9098_v8 = vpop.f32.mrb[2].mxu0  ;;  %v11048_v4 = vpop.permute.xlu0 %956 }
 0x112   : > { %v11007_v9 = vmul.f32 %v10931_v29, %v713_v6  ;;  %v609_v10 = vadd.f32 %v9098_v8, %v10998_v63  ;;  %v603_v11 = vpop.f32.mrb[3].mxu0 }
 0x113   : > { %v11011_v12 = vmul.f32 %v10927_v27, %v712_v7  ;;  %v604_v13 = vadd.f32 %v10998_v63, %v603_v11  ;;  %v8033_v7 = vld [vmem:[%s13240_s4 + $0x70] sm:$0xff] }
 0x114   : > { %13376 = vst [vmem:[#allocation21_spill] sm:$0xff] %v11007_v9  ;;  %v1001_v14 = vsel %vm454_vm1, %v11007_v9, %v931_v35  ;;  %v715_v15 = vmax.f32 %v609_v10, 0.0 }
 0x115   : > { %13377 = vst [vmem:[#allocation22_spill] sm:$0xff] %v11011_v12  ;;  %1026 = vst.msk [vmem:[#allocation2 + $0x20] sm:$0xff] %vm1024_vm2, %v1001_v14  ;;  %v1000_v17 = vsel %vm454_vm1, %v11011_v12, %v929_v37  ;;  %v714_v18 = vmax.f32 %v604_v13, 0.0  ;;  %v9101_v19 = vpop.f32.mrb[4].mxu0 }
 0x116   : > { %1025 = vst.msk [vmem:[#allocation2 + $0x18] sm:$0xff] %vm1024_vm2, %v1000_v17  ;;  %v11025_v21 = vmul.f32 %v10929_v28, %v715_v15  ;;  %v619_v22 = vadd.f32 %v9101_v19, %v10998_v63  ;;  %v613_v23 = vpop.f32.mrb[5].mxu0  ;;  %v8058_v19 = vld [vmem:[%s13240_s4 + $0x78] sm:$0xff] }
 0x117   : > { %v11029_v24 = vmul.f32 %v10925_v26, %v714_v18  ;;  %v614_v32 = vadd.f32 %v10998_v63, %v613_v23 }
 0x118   : > { %13380 = vst [vmem:[#allocation25_spill] sm:$0xff] %v11025_v21  ;;  %v1003_v33 = vsel %vm454_vm1, %v11025_v21, %v935_v40  ;;  %v717_v34 = vmax.f32 %v619_v22, 0.0  ;;  %v8059_v22 = vld [vmem:[%s13240_s4 + $0x80] sm:$0xff] }
 0x119   : > { %13381 = vst [vmem:[#allocation26_spill] sm:$0xff] %v11029_v24  ;;  %1028 = vst.msk [vmem:[#allocation2 + $0x30] sm:$0xff] %vm1024_vm2, %v1003_v33  ;;  %v1002_v35 = vsel %vm454_vm1, %v11029_v24, %v933_v41  ;;  %v716_v36 = vmax.f32 %v614_v32, 0.0  ;;  %v9104_v37 = vpop.f32.mrb[6].mxu0 }
 0x11a   : > { %1027 = vst.msk [vmem:[#allocation2 + $0x28] sm:$0xff] %vm1024_vm2, %v1002_v35  ;;  %v11039_v52 = vmul.f32 %v10933_v30, %v717_v34  ;;  %v629_v53 = vadd.f32 %v9104_v37, %v10998_v63  ;;  %v623_v0 = vpop.f32.mrb[7].mxu0  ;;  %v11095_v35 = vpop.permute.xlu1 %843 }
 0x11b   : > { %v11045_v40 = vmul.f32 %v10935_v31, %v716_v36  ;;  %v624_v2 = vadd.f32 %v10998_v63, %v623_v0  ;;  %13386 = vst [vmem:[#allocation31_spill] sm:$0xff] %v11095_v35 }
 0x11c   : > { %13382 = vst [vmem:[#allocation27_spill] sm:$0xff] %v11039_v52  ;;  %v1005_v41 = vsel %vm454_vm1, %v11039_v52, %v10954_v44  ;;  %v719_v6 = vmax.f32 %v629_v53, 0.0 }
 0x11d   : > { %13383 = vst [vmem:[#allocation28_spill] sm:$0xff] %v11045_v40  ;;  %1030 = vst.msk [vmem:[#allocation2 + $0x40] sm:$0xff] %vm1024_vm2, %v1005_v41  ;;  %v1004_v8 = vsel %vm454_vm1, %v11045_v40, %v10956_v45  ;;  %v718_v10 = vmax.f32 %v624_v2, 0.0  ;;  %v9107_v11 = vpop.f32.mrb[8].mxu0  ;;  %v11060_v13 = vld [vmem:[#allocation2 + $0x18] sm:$0xff]  ;;  %v11075_v45 = vld [vmem:[#allocation2 + $0x20] sm:$0xff] }
 0x11e   : > { %v11062_v14 = vld [vmem:[#allocation2 + $0x17] sm:$0xff]  ;;  %v11064_v15 = vld [vmem:[#allocation2 + $0x1f] sm:$0xff]  ;;  %1029 = vst.msk [vmem:[#allocation2 + $0x38] sm:$0xff] %vm1024_vm2, %v1004_v8  ;;  %v11068_v44 = vmul.f32 %v10946_v38, %v719_v6  ;;  %v639_v17 = vadd.f32 %v9107_v11, %v10998_v63  ;;  %v633_v18 = vpop.f32.mrb[9].mxu0  ;;  %9138 = vmatprep.mubr.msk.f32.mxu0 %vm1024_vm2, %v11060_v13 }
 0x11f   : > { %9261 = vmatprep.mubr.msk.f32.mxu1 %vm1024_vm2, %v11062_v14  ;;  %v11084_v23 = vmul.f32 %v10948_v39, %v718_v10  ;;  %v634_v32 = vadd.f32 %v10998_v63, %v633_v18  ;;  %9139 = vmatmul.mubr.msk.f32.gmra.mrb[26].mxu0 %vm1024_vm2, %v11075_v45 }
 0x120   : > { %13384 = vst [vmem:[#allocation29_spill] sm:$0xff] %v11068_v44  ;;  %9262 = vmatmul.mubr.msk.f32.vlgmr.msra.gmra.mrb[0].mxu1 %vm1024_vm2, %v11064_v15  ;;  %v1007_v33 = vsel %vm454_vm1, %v11068_v44, %v10962_v48  ;;  %v721_v34 = vmax.f32 %v639_v17, 0.0  ;;  %v11107_v48 = vpack.c.bf16 %v8059_v22, %v8058_v19  ;;  %v11120_v10 = vld [vmem:[#allocation2 + $0x30] sm:$0xff] }
 0x121   : > { %13385 = vst [vmem:[#allocation30_spill] sm:$0xff] %v11084_v23  ;;  %10032 = vmatpush3.bf16.msra.mxu1 %v10922_v25  ;;  %1032 = vst.msk [vmem:[#allocation2 + $0x50] sm:$0xff] %vm1024_vm2, %v1007_v33  ;;  %v1006_v36 = vsel %vm454_vm1, %v11084_v23, %v10964_v49  ;;  %v720_v37 = vmax.f32 %v634_v32, 0.0  ;;  %v9110_v53 = vpop.f32.mrb[10].mxu0  ;;  %v11101_v0 = vld [vmem:[#allocation2 + $0x28] sm:$0xff]  ;;  %v11109_v25 = vpop.permute.xlu0 %838 }
 0x122   : > { %v11103_v2 = vld [vmem:[#allocation2 + $0x27] sm:$0xff]  ;;  %v11105_v41 = vld [vmem:[#allocation2 + $0x2f] sm:$0xff]  ;;  %9301 = vmatprep.subr.mxu1 %v8033_v7  ;;  %13387 = vst [vmem:[#allocation32_spill] sm:$0xff] %v11109_v25  ;;  %1031 = vst.msk [vmem:[#allocation2 + $0x48] sm:$0xff] %vm1024_vm2, %v1006_v36  ;;  %v11113_v6 = vmul.f32 %v10950_v42, %v721_v34  ;;  %v649_v49 = vadd.f32 %v9110_v53, %v10998_v63  ;;  %v643_v8 = vpop.f32.mrb[11].mxu0  ;;  %9141 = vmatprep.mubr.msk.f32.mxu0 %vm1024_vm2, %v11101_v0 }
 0x123   : > { %9264 = vmatprep.mubr.msk.f32.mxu1 %vm1024_vm2, %v11103_v2  ;;  %v11123_v11 = vmul.f32 %v10952_v43, %v720_v37  ;;  %v644_v17 = vadd.f32 %v10998_v63, %v643_v8  ;;  %9142 = vmatmul.mubr.msk.f32.gmra.mrb[28].mxu0 %vm1024_vm2, %v11120_v10 }
 0x124   : > { %13388 = vst [vmem:[#allocation33_spill] sm:$0xff] %v11113_v6  ;;  %9265 = vmatmul.mubr.msk.f32.gmra.mrb[2].mxu1 %vm1024_vm2, %v11105_v41  ;;  %v1009_v18 = vsel %vm454_vm1, %v11113_v6, %v10979_v55  ;;  %v723_v19 = vmax.f32 %v649_v49, 0.0  ;;  %v11155_v49 = vpop.permute.xlu1 %962 }
 0x125   : > { %13389 = vst [vmem:[#allocation34_spill] sm:$0xff] %v11123_v11  ;;  %9302 = vmatpush3.msra.mxu1 %v8033_v7  ;;  %1034 = vst.msk [vmem:[#allocation2 + $0x60] sm:$0xff] %vm1024_vm2, %v1009_v18  ;;  %v1008_v22 = vsel %vm454_vm1, %v11123_v11, %v10981_v56  ;;  %v722_v32 = vmax.f32 %v644_v17, 0.0  ;;  %v9113_v33 = vpop.f32.mrb[12].mxu0  ;;  %v11137_v34 = vld [vmem:[#allocation2 + $0x38] sm:$0xff]  ;;  %v11153_v56 = vld [vmem:[#allocation2 + $0x40] sm:$0xff]  ;;  %v11165_v18 = vpop.permute.xlu0 %960 }
 0x126   : > { %v11139_v36 = vld [vmem:[#allocation2 + $0x37] sm:$0xff]  ;;  %v11141_v37 = vld [vmem:[#allocation2 + $0x3f] sm:$0xff]  ;;  %10034 = vmatprep.subr.bf16.mxu1 %v11107_v48  ;;  %1033 = vst.msk [vmem:[#allocation2 + $0x58] sm:$0xff] %vm1024_vm2, %v1008_v22  ;;  %v11146_v55 = vmul.f32 %v10958_v46, %v723_v19  ;;  %v659_v7 = vadd.f32 %v9113_v33, %v10998_v63  ;;  %v653_v53 = vpop.f32.mrb[13].mxu0  ;;  %9144 = vmatprep.mubr.msk.f32.mxu0 %vm1024_vm2, %v11137_v34 }
 0x127   : > { %9267 = vmatprep.mubr.msk.f32.mxu1 %vm1024_vm2, %v11139_v36  ;;  %v11158_v8 = vmul.f32 %v10960_v47, %v722_v32  ;;  %v654_v17 = vadd.f32 %v10998_v63, %v653_v53  ;;  %9145 = vmatmul.mubr.msk.f32.gmra.mrb[30].mxu0 %vm1024_vm2, %v11153_v56 }
 0x128   : > { %13390 = vst [vmem:[#allocation35_spill] sm:$0xff] %v11146_v55  ;;  %9268 = vmatmul.mubr.msk.f32.gmra.mrb[4].mxu1 %vm1024_vm2, %v11141_v37  ;;  %v1011_v19 = vsel %vm454_vm1, %v11146_v55, %v10987_v59  ;;  %v725_v22 = vmax.f32 %v659_v7, 0.0 }
 0x129   : > { %13391 = vst [vmem:[#allocation36_spill] sm:$0xff] %v11158_v8  ;;  %1036 = vst.msk [vmem:[#allocation2 + $0x70] sm:$0xff] %vm1024_vm2, %v1011_v19  ;;  %v1010_v32 = vsel %vm454_vm1, %v11158_v8, %v10989_v60  ;;  %v724_v33 = vmax.f32 %v654_v17, 0.0  ;;  %v9116_v53 = vpop.f32.mrb[14].mxu0  ;;  %v11174_v47 = vld [vmem:[#allocation2 + $0x48] sm:$0xff]  ;;  %v11189_v60 = vld [vmem:[#allocation2 + $0x50] sm:$0xff]  ;;  %v11214_v31 = vpop.permute.xlu0 %848 }
 0x12a   : > { %v11176_v46 = vld [vmem:[#allocation2 + $0x47] sm:$0xff]  ;;  %v11178_v43 = vld [vmem:[#allocation2 + $0x4f] sm:$0xff]  ;;  %1035 = vst.msk [vmem:[#allocation2 + $0x68] sm:$0xff] %vm1024_vm2, %v1010_v32  ;;  %v11182_v42 = vmul.f32 %v10966_v50, %v725_v22  ;;  %v669_v59 = vadd.f32 %v9116_v53, %v10998_v63  ;;  %v663_v7 = vpop.f32.mrb[15].mxu0  ;;  %9147 = vmatprep.mubr.msk.f32.mxu0 %vm1024_vm2, %v11174_v47  ;;  %v11202_v53 = vpop.permute.xlu1 %853  ;;  %13395 = vst [vmem:[#allocation40_spill] sm:$0xff] %v11214_v31 }
 0x12b   : > { %9270 = vmatprep.mubr.msk.f32.mxu1 %vm1024_vm2, %v11176_v46  ;;  %v11192_v17 = vmul.f32 %v10968_v51, %v724_v33  ;;  %v664_v19 = vadd.f32 %v10998_v63, %v663_v7  ;;  %9148 = vmatmul.mubr.msk.f32.gmra.mrb[32].mxu0 %vm1024_vm2, %v11189_v60  ;;  %13394 = vst [vmem:[#allocation39_spill] sm:$0xff] %v11202_v53 }
 0x12c   : > { %13392 = vst [vmem:[#allocation37_spill] sm:$0xff] %v11182_v42  ;;  %9271 = vmatmul.mubr.msk.f32.gmra.mrb[6].mxu1 %vm1024_vm2, %v11178_v43  ;;  %v1013_v22 = vsel %vm454_vm1, %v11182_v42, %v11001_v3  ;;  %v727_v32 = vmax.f32 %v669_v59, 0.0 }
 0x12d   : > { %13393 = vst [vmem:[#allocation38_spill] sm:$0xff] %v11192_v17  ;;  %1038 = vst.msk [vmem:[#allocation2 + $0x80] sm:$0xff] %vm1024_vm2, %v1013_v22  ;;  %v1012_v33 = vsel %vm454_vm1, %v11192_v17, %v11004_v5  ;;  %v726_v7 = vmax.f32 %v664_v19, 0.0  ;;  %v9119_v51 = vpop.f32.mrb[16].mxu0  ;;  %v11208_v50 = vld [vmem:[#allocation2 + $0x58] sm:$0xff]  ;;  %v11225_v5 = vld [vmem:[#allocation2 + $0x60] sm:$0xff] }
 0x12e   : > { %v11210_v39 = vld [vmem:[#allocation2 + $0x57] sm:$0xff]  ;;  %v11212_v38 = vld [vmem:[#allocation2 + $0x5f] sm:$0xff]  ;;  %1037 = vst.msk [vmem:[#allocation2 + $0x78] sm:$0xff] %vm1024_vm2, %v1012_v33  ;;  %v11218_v3 = vmul.f32 %v10983_v57, %v727_v32  ;;  %v679_v59 = vadd.f32 %v9119_v51, %v10998_v63  ;;  %v673_v22 = vpop.f32.mrb[17].mxu0  ;;  %9150 = vmatprep.mubr.msk.f32.mxu0 %vm1024_vm2, %v11208_v50  ;;  %v967_v28 = vpop.permute.xlu1 %966 }
 0x12f   : > { %9273 = vmatprep.mubr.msk.f32.mxu1 %vm1024_vm2, %v11210_v39  ;;  %v11228_v19 = vmul.f32 %v10985_v58, %v726_v7  ;;  %v674_v30 = vadd.f32 %v10998_v63, %v673_v22  ;;  %9151 = vmatmul.mubr.msk.f32.gmra.mrb[34].mxu0 %vm1024_vm2, %v11225_v5 }
 0x130   : > { %13396 = vst [vmem:[#allocation41_spill] sm:$0xff] %v11218_v3  ;;  %9274 = vmatmul.mubr.msk.f32.gmra.mrb[8].mxu1 %vm1024_vm2, %v11212_v38  ;;  %v1015_v51 = vsel %vm454_vm1, %v11218_v3, %v11042_v1  ;;  %v729_v32 = vmax.f32 %v679_v59, 0.0 }
 0x131   : > { %13397 = vst [vmem:[#allocation42_spill] sm:$0xff] %v11228_v19  ;;  %1040 = vst.msk [vmem:[#allocation2 + $0x90] sm:$0xff] %vm1024_vm2, %v1015_v51  ;;  %v1014_v33 = vsel %vm454_vm1, %v11228_v19, %v11048_v4  ;;  %v728_v7 = vmax.f32 %v674_v30, 0.0  ;;  %v9122_v58 = vpop.f32.mrb[18].mxu0  ;;  %v11242_v22 = vld [vmem:[#allocation2 + $0x68] sm:$0xff]  ;;  %v11257_v30 = vld [vmem:[#allocation2 + $0x70] sm:$0xff]  ;;  %v965_v4 = vpop.permute.xlu0 %964 }
 0x132   : > { %v11244_v57 = vld [vmem:[#allocation2 + $0x67] sm:$0xff]  ;;  %v11246_v26 = vld [vmem:[#allocation2 + $0x6f] sm:$0xff]  ;;  %1039 = vst.msk [vmem:[#allocation2 + $0x88] sm:$0xff] %vm1024_vm2, %v1014_v33  ;;  %v11250_v1 = vmul.f32 %v10991_v61, %v729_v32  ;;  %v689_v59 = vadd.f32 %v9122_v58, %v10998_v63  ;;  %v683_v51 = vpop.f32.mrb[19].mxu0  ;;  %9153 = vmatprep.mubr.msk.f32.mxu0 %vm1024_vm2, %v11242_v22 }
 0x133   : > { %9276 = vmatprep.mubr.msk.f32.mxu1 %vm1024_vm2, %v11244_v57  ;;  %v11260_v27 = vmul.f32 %v10993_v62, %v728_v7  ;;  %v684_v33 = vadd.f32 %v10998_v63, %v683_v51  ;;  %9154 = vmatmul.mubr.msk.f32.gmra.mrb[36].mxu0 %vm1024_vm2, %v11257_v30  ;;  %v11575_v55 = vld [vmem:[#allocation2 + $0x61] sm:$0xff]  ;;  %v11581_v8 = vld [vmem:[#allocation2 + $0x69] sm:$0xff] }
 0x134   : > { %13398 = vst [vmem:[#allocation43_spill] sm:$0xff] %v11250_v1  ;;  %9277 = vmatmul.mubr.msk.f32.gmra.mrb[10].mxu1 %vm1024_vm2, %v11246_v26  ;;  %v1017_v58 = vsel %vm454_vm1, %v11250_v1, %v11155_v49  ;;  %v731_v32 = vmax.f32 %v689_v59, 0.0 }
 0x135   : > { %13399 = vst [vmem:[#allocation44_spill] sm:$0xff] %v11260_v27  ;;  %1042 = vst.msk [vmem:[#allocation2 + $0xa0] sm:$0xff] %vm1024_vm2, %v1017_v58  ;;  %v1016_v7 = vsel %vm454_vm1, %v11260_v27, %v11165_v18  ;;  %v730_v62 = vmax.f32 %v684_v33, 0.0  ;;  %v9125_v61 = vpop.f32.mrb[20].mxu0  ;;  %v11274_v51 = vld [vmem:[#allocation2 + $0x78] sm:$0xff]  ;;  %v11289_v18 = vld [vmem:[#allocation2 + $0x80] sm:$0xff] }
 0x136   : > { %v11276_v29 = vld [vmem:[#allocation2 + $0x77] sm:$0xff]  ;;  %v11278_v3 = vld [vmem:[#allocation2 + $0x7f] sm:$0xff]  ;;  %1041 = vst.msk [vmem:[#allocation2 + $0x98] sm:$0xff] %vm1024_vm2, %v1016_v7  ;;  %v11282_v19 = vmul.f32 %v11016_v16, %v731_v32  ;;  %v699_v49 = vadd.f32 %v9125_v61, %v10998_v63  ;;  %v693_v59 = vpop.f32.mrb[21].mxu0  ;;  %9156 = vmatprep.mubr.msk.f32.mxu0 %vm1024_vm2, %v11274_v51  ;;  %v971_v61 = vpop.permute.xlu1 %970 }
 0x137   : > { %9279 = vmatprep.mubr.msk.f32.mxu1 %vm1024_vm2, %v11276_v29  ;;  %v11292_v33 = vmul.f32 %v11021_v20, %v730_v62  ;;  %v694_v58 = vadd.f32 %v10998_v63, %v693_v59  ;;  %9157 = vmatmul.mubr.msk.f32.gmra.mrb[38].mxu0 %vm1024_vm2, %v11289_v18  ;;  %v969_v16 = vpop.permute.xlu0 %968  ;;  %v11587_v6 = vld [vmem:[#allocation2 + $0x71] sm:$0xff]  ;;  %v11593_v11 = vld [vmem:[#allocation2 + $0x79] sm:$0xff] }
 0x138   : > { %13400 = vst [vmem:[#allocation45_spill] sm:$0xff] %v11282_v19  ;;  %9280 = vmatmul.mubr.msk.f32.gmra.mrb[12].mxu1 %vm1024_vm2, %v11278_v3  ;;  %v733_v32 = vmax.f32 %v699_v49, 0.0  ;;  %v1019_v7 = vsel %vm454_vm1, %v11282_v19, %v967_v28 }
 0x139   : > { %13401 = vst [vmem:[#allocation46_spill] sm:$0xff] %v11292_v33  ;;  %v732_v1 = vmax.f32 %v694_v58, 0.0  ;;  %1044 = vst.msk [vmem:[#allocation2 + $0xb0] sm:$0xff] %vm1024_vm2, %v1019_v7  ;;  %v1018_v62 = vsel %vm454_vm1, %v11292_v33, %v965_v4  ;;  %v9128_v20 = vpop.f32.mrb[22].mxu0  ;;  %v11304_v59 = vld [vmem:[#allocation2 + $0x88] sm:$0xff]  ;;  %v11319_v4 = vld [vmem:[#allocation2 + $0x90] sm:$0xff] }
 0x13a   : > { %v11306_v27 = vld [vmem:[#allocation2 + $0x87] sm:$0xff]  ;;  %v11308_v42 = vld [vmem:[#allocation2 + $0x8f] sm:$0xff]  ;;  %v11311_v17 = vmul.f32 %v11095_v35, %v733_v32  ;;  %1043 = vst.msk [vmem:[#allocation2 + $0xa8] sm:$0xff] %vm1024_vm2, %v1018_v62  ;;  %v709_v28 = vadd.f32 %v9128_v20, %v10998_v63  ;;  %v703_v49 = vpop.f32.mrb[23].mxu0  ;;  %9159 = vmatprep.mubr.msk.f32.mxu0 %vm1024_vm2, %v11304_v59  ;;  %v11544_v33 = vld [vmem:[#allocation2 + $0x39] sm:$0xff] }
 0x13b   : > { %9282 = vmatprep.mubr.msk.f32.mxu1 %vm1024_vm2, %v11306_v27  ;;  %v11322_v58 = vmul.f32 %v11109_v25, %v732_v1  ;;  %v704_v7 = vadd.f32 %v10998_v63, %v703_v49  ;;  %9160 = vmatmul.mubr.msk.f32.gmra.mrb[40].mxu0 %vm1024_vm2, %v11319_v4  ;;  %v975_v63 = vpop.permute.xlu1 %974  ;;  %v11599_v44 = vld [vmem:[#allocation2 + $0x81] sm:$0xff]  ;;  %v11605_v23 = vld [vmem:[#allocation2 + $0x89] sm:$0xff] }
 0x13c   : > { %13402 = vst [vmem:[#allocation47_spill] sm:$0xff] %v11311_v17  ;;  %9283 = vmatmul.mubr.msk.f32.gmra.mrb[14].mxu1 %vm1024_vm2, %v11308_v42  ;;  %v735_v20 = vmax.f32 %v709_v28, 0.0  ;;  %v1021_v32 = vsel %vm454_vm1, %v11311_v17, %v971_v61  ;;  %v11348_v61 = vld [vmem:[#allocation2 + $0xa0] sm:$0xff] }
 0x13d   : > { %13403 = vst [vmem:[#allocation48_spill] sm:$0xff] %v11322_v58  ;;  %v734_v62 = vmax.f32 %v704_v7, 0.0  ;;  %1046 = vst.msk [vmem:[#allocation2 + $0xc0] sm:$0xff] %vm1024_vm2, %v1021_v32  ;;  %v1020_v35 = vsel %vm454_vm1, %v11322_v58, %v969_v16  ;;  %v11334_v1 = vld [vmem:[#allocation2 + $0x98] sm:$0xff]  ;;  %v973_v16 = vpop.permute.xlu0 %972  ;;  %v7979_v58 = vld [vmem:[%s13240_s4 + $0x40] sm:$0xff] }
 0x13e   : > { %v11336_v25 = vld [vmem:[#allocation2 + $0x97] sm:$0xff]  ;;  %v11338_v49 = vld [vmem:[#allocation2 + $0x9f] sm:$0xff]  ;;  %v11341_v19 = vmul.f32 %v11202_v53, %v735_v20  ;;  %1045 = vst.msk [vmem:[#allocation2 + $0xb8] sm:$0xff] %vm1024_vm2, %v1020_v35  ;;  %9162 = vmatprep.mubr.msk.f32.mxu0 %vm1024_vm2, %v11334_v1 }
 0x13f   : > { %9285 = vmatprep.mubr.msk.f32.mxu1 %vm1024_vm2, %v11336_v25  ;;  %v11351_v28 = vmul.f32 %v11214_v31, %v734_v62  ;;  %9163 = vmatmul.mubr.msk.f32.gmra.mrb[42].mxu0 %vm1024_vm2, %v11348_v61  ;;  %v11611_v52 = vld [vmem:[#allocation2 + $0x91] sm:$0xff]  ;;  %v11617_v40 = vld [vmem:[#allocation2 + $0x99] sm:$0xff] }
 0x140   : > { %13404 = vst [vmem:[#allocation49_spill] sm:$0xff] %v11341_v19  ;;  %9286 = vmatmul.mubr.msk.f32.gmra.mrb[16].mxu1 %vm1024_vm2, %v11338_v49  ;;  %v1023_v35 = vsel %vm454_vm1, %v11341_v19, %v975_v63  ;;  %v11373_v63 = vld [vmem:[#allocation2 + $0xb0] sm:$0xff] }
 0x141   : > { %13405 = vst [vmem:[#allocation50_spill] sm:$0xff] %v11351_v28  ;;  %1048 = vst.msk [vmem:[#allocation2 + $0xd0] sm:$0xff] %vm1024_vm2, %v1023_v35  ;;  %v1022_v7 = vsel %vm454_vm1, %v11351_v28, %v973_v16  ;;  %v11362_v20 = vld [vmem:[#allocation2 + $0xa8] sm:$0xff] }
 0x142   : > { %v11364_v32 = vld [vmem:[#allocation2 + $0xa7] sm:$0xff]  ;;  %v11366_v62 = vld [vmem:[#allocation2 + $0xaf] sm:$0xff]  ;;  %1047 = vst.msk [vmem:[#allocation2 + $0xc8] sm:$0xff] %vm1024_vm2, %v1022_v7  ;;  %9165 = vmatprep.mubr.msk.f32.mxu0 %vm1024_vm2, %v11362_v20 }
 0x143   : > { %9288 = vmatprep.mubr.msk.f32.mxu1 %vm1024_vm2, %v11364_v32  ;;  %9166 = vmatmul.mubr.msk.f32.gmra.mrb[44].mxu0 %vm1024_vm2, %v11373_v63  ;;  %v1049_v16 = vld [vmem:[#allocation2 + $0x7] sm:$0xff]  ;;  %v1050_v19 = vld [vmem:[#allocation2 + $0xf] sm:$0xff] }
 0x144   : > { %9289 = vmatmul.mubr.msk.f32.gmra.mrb[18].mxu1 %vm1024_vm2, %v11366_v62  ;;  %v11389_v53 = vld [vmem:[#allocation2 + $0xc0] sm:$0xff]  ;;  %v11629_v24 = vld [vmem:[#allocation2 + $0xa9] sm:$0xff] }
 0x145   : > { %v11379_v35 = vld [vmem:[#allocation2 + $0xb8] sm:$0xff]  ;;  %v11623_v21 = vld [vmem:[#allocation2 + $0xa1] sm:$0xff]  ;;  %13407 = vst [vmem:[#allocation52_spill] sm:$0xff] %v11629_v24 }
 0x146   : > { %v11381_v31 = vld [vmem:[#allocation2 + $0xb7] sm:$0xff]  ;;  %v11383_v7 = vld [vmem:[#allocation2 + $0xbf] sm:$0xff]  ;;  %9168 = vmatprep.mubr.msk.f32.mxu0 %vm1024_vm2, %v11379_v35  ;;  %13406 = vst [vmem:[#allocation51_spill] sm:$0xff] %v11623_v21 }
 0x147   : > { %9291 = vmatprep.mubr.msk.f32.mxu1 %vm1024_vm2, %v11381_v31  ;;  %9169 = vmatmul.mubr.msk.f32.gmra.mrb[46].mxu0 %vm1024_vm2, %v11389_v53  ;;  %v11635_v9 = vld [vmem:[#allocation2 + $0xb1] sm:$0xff]  ;;  %v11641_v12 = vld [vmem:[#allocation2 + $0xb9] sm:$0xff] }
 0x148   : > { %9292 = vmatmul.mubr.msk.f32.gmra.mrb[20].mxu1 %vm1024_vm2, %v11383_v7  ;;  %9177 = vmatprep.mubr.msk.f32.mxu0 %vm1024_vm2, %v1049_v16  ;;  %v8060_v16 = vld [vmem:[%s13240_s4 + $0x88] sm:$0xff]  ;;  %13408 = vst [vmem:[#allocation53_spill] sm:$0xff] %v11635_v9  ;;  %13409 = vst [vmem:[#allocation54_spill] sm:$0xff] %v11641_v12 }
 0x149   : > { %v11396_v28 = vld [vmem:[#allocation2 + $0xc7] sm:$0xff]  ;;  %v11398_v17 = vld [vmem:[#allocation2 + $0xcf] sm:$0xff] }
 0x14a   : > { %9294 = vmatprep.mubr.msk.f32.mxu1 %vm1024_vm2, %v11396_v28 }
 0x14b   : > { %9178 = vmatmul.mubr.msk.f32.vlgmr.msra.gmra.mrb[24].mxu0 %vm1024_vm2, %v1050_v19  ;;  %v11512_v19 = vld [vmem:[#allocation2 + $0xd0] sm:$0xff] }
 0x14c   : > { %9295 = vmatmul.mubr.msk.f32.gmra.mrb[22].mxu1 %vm1024_vm2, %v11398_v17  ;;  %9180 = vmatprep.mubr.msk.f32.mxu0 %vm1024_vm2, %v11062_v14  ;;  %v8085_v14 = vld [vmem:[%s13240_s4 + $0x90] sm:$0xff] }
 0x14d   : > { %9303 = vmatprep.mubr.msk.f32.mxu1 %vm1024_vm2, %v11060_v13  ;;  %10024 = vmatpush3.bf16.msra.mxu0 %v10976_v54  ;;  %v8086_v13 = vld [vmem:[%s13240_s4 + $0x98] sm:$0xff] }
 0x14e   : > { %9217 = vmatprep.subr.mxu0 %v7979_v58  ;;  %v10037_v54 = vpack.c.bf16 %v8086_v13, %v8085_v14  ;;  %v8087_v14 = vld [vmem:[%s13240_s4 + $0xa0] sm:$0xff]  ;;  %v11524_v13 = vld [vmem:[#allocation2 + $0x29] sm:$0xff] }
 0x14f   : > { %9181 = vmatmul.mubr.msk.f32.gmra.mrb[26].mxu0 %vm1024_vm2, %v11064_v15  ;;  %v1618_v15 = vld [vmem:[#allocation2 + $0x9] sm:$0xff] }
 0x150   : > { %9304 = vmatmul.mubr.msk.f32.vlgmr.msra.gmra.mrb[0].mxu1 %vm1024_vm2, %v11075_v45  ;;  %9183 = vmatprep.mubr.msk.f32.mxu0 %vm1024_vm2, %v11103_v2  ;;  %v11507_v45 = vld [vmem:[#allocation2 + $0xc8] sm:$0xff] }
 0x151   : > { %10036 = vmatpush3.bf16.msra.mxu1 %v11107_v48  ;;  %9306 = vmatprep.mubr.msk.f32.mxu1 %vm1024_vm2, %v11101_v0  ;;  %v1619_v48 = vld [vmem:[#allocation2 + $0x11] sm:$0xff] }
 0x152   : > { %9343 = vmatprep.subr.mxu1 %v8060_v16  ;;  %9218 = vmatpush3.msra.mxu0 %v7979_v58  ;;  %v1620_v58 = vld [vmem:[#allocation2 + $0x19] sm:$0xff] }
 0x153   : > { %9184 = vmatmul.mubr.msk.f32.gmra.mrb[28].mxu0 %vm1024_vm2, %v11105_v41 }
 0x154   : > { %9307 = vmatmul.mubr.msk.f32.gmra.mrb[2].mxu1 %vm1024_vm2, %v11120_v10  ;;  %9186 = vmatprep.mubr.msk.f32.mxu0 %vm1024_vm2, %v11139_v36 }
 0x155   : > { %9309 = vmatprep.mubr.msk.f32.mxu1 %vm1024_vm2, %v11137_v34  ;;  %9344 = vmatpush3.msra.mxu1 %v8060_v16  ;;  %v1621_v16 = vld [vmem:[#allocation2 + $0x21] sm:$0xff] }
 0x156   : > { %10038 = vmatprep.subr.bf16.mxu1 %v10037_v54 }
 0x157   : > { %9187 = vmatmul.mubr.msk.f32.gmra.mrb[30].mxu0 %vm1024_vm2, %v11141_v37 }
 0x158   : > { %9310 = vmatmul.mubr.msk.f32.gmra.mrb[4].mxu1 %vm1024_vm2, %v11153_v56  ;;  %9189 = vmatprep.mubr.msk.f32.mxu0 %vm1024_vm2, %v11176_v46 }
 0x159   : > { %9312 = vmatprep.mubr.msk.f32.mxu1 %vm1024_vm2, %v11174_v47 }
 0x15b   : > { %9190 = vmatmul.mubr.msk.f32.gmra.mrb[32].mxu0 %vm1024_vm2, %v11178_v43 }
 0x15c   : > { %9313 = vmatmul.mubr.msk.f32.gmra.mrb[6].mxu1 %vm1024_vm2, %v11189_v60  ;;  %9192 = vmatprep.mubr.msk.f32.mxu0 %vm1024_vm2, %v11210_v39 }
 0x15d   : > { %9315 = vmatprep.mubr.msk.f32.mxu1 %vm1024_vm2, %v11208_v50 }
 0x15f   : > { %9193 = vmatmul.mubr.msk.f32.gmra.mrb[34].mxu0 %vm1024_vm2, %v11212_v38 }
 0x160   : > { %9316 = vmatmul.mubr.msk.f32.gmra.mrb[8].mxu1 %vm1024_vm2, %v11225_v5  ;;  %9195 = vmatprep.mubr.msk.f32.mxu0 %vm1024_vm2, %v11244_v57 }
 0x161   : > { %9318 = vmatprep.mubr.msk.f32.mxu1 %vm1024_vm2, %v11242_v22 }
 0x163   : > { %9196 = vmatmul.mubr.msk.f32.gmra.mrb[36].mxu0 %vm1024_vm2, %v11246_v26 }
 0x164   : > { %9319 = vmatmul.mubr.msk.f32.gmra.mrb[10].mxu1 %vm1024_vm2, %v11257_v30  ;;  %9198 = vmatprep.mubr.msk.f32.mxu0 %vm1024_vm2, %v11276_v29 }
 0x165   : > { %9321 = vmatprep.mubr.msk.f32.mxu1 %vm1024_vm2, %v11274_v51 }
 0x167   : > { %9199 = vmatmul.mubr.msk.f32.gmra.mrb[38].mxu0 %vm1024_vm2, %v11278_v3 }
 0x168   : > { %9322 = vmatmul.mubr.msk.f32.gmra.mrb[12].mxu1 %vm1024_vm2, %v11289_v18  ;;  %9201 = vmatprep.mubr.msk.f32.mxu0 %vm1024_vm2, %v11306_v27 }
 0x169   : > { %9324 = vmatprep.mubr.msk.f32.mxu1 %vm1024_vm2, %v11304_v59 }
 0x16b   : > { %9202 = vmatmul.mubr.msk.f32.gmra.mrb[40].mxu0 %vm1024_vm2, %v11308_v42 }
 0x16c   : > { %9325 = vmatmul.mubr.msk.f32.gmra.mrb[14].mxu1 %vm1024_vm2, %v11319_v4  ;;  %9204 = vmatprep.mubr.msk.f32.mxu0 %vm1024_vm2, %v11336_v25 }
 0x16d   : > { %9327 = vmatprep.mubr.msk.f32.mxu1 %vm1024_vm2, %v11334_v1 }
 0x16f   : > { %9205 = vmatmul.mubr.msk.f32.gmra.mrb[42].mxu0 %vm1024_vm2, %v11338_v49 }
 0x170   : > { %9328 = vmatmul.mubr.msk.f32.gmra.mrb[16].mxu1 %vm1024_vm2, %v11348_v61  ;;  %9207 = vmatprep.mubr.msk.f32.mxu0 %vm1024_vm2, %v11364_v32 }
 0x171   : > { %9330 = vmatprep.mubr.msk.f32.mxu1 %vm1024_vm2, %v11362_v20 }
 0x173   : > { %9208 = vmatmul.mubr.msk.f32.gmra.mrb[44].mxu0 %vm1024_vm2, %v11366_v62 }
 0x174   : > { %9331 = vmatmul.mubr.msk.f32.gmra.mrb[18].mxu1 %vm1024_vm2, %v11373_v63  ;;  %9210 = vmatprep.mubr.msk.f32.mxu0 %vm1024_vm2, %v11381_v31 }
 0x175   : > { %9333 = vmatprep.mubr.msk.f32.mxu1 %vm1024_vm2, %v11379_v35 }
 0x177   : > { %9211 = vmatmul.mubr.msk.f32.gmra.mrb[46].mxu0 %vm1024_vm2, %v11383_v7 }
 0x178   : > { %9334 = vmatmul.mubr.msk.f32.gmra.mrb[20].mxu1 %vm1024_vm2, %v11389_v53  ;;  %9219 = vmatprep.mubr.msk.f32.mxu0 %vm1024_vm2, %v1618_v15  ;;  %v8112_v15 = vld [vmem:[%s13240_s4 + $0xa8] sm:$0xff] }
 0x179   : > { %9336 = vmatprep.mubr.msk.f32.mxu1 %vm1024_vm2, %v11507_v45 }
 0x17b   : > { %9220 = vmatmul.mubr.msk.f32.vlgmr.msra.gmra.mrb[24].mxu0 %vm1024_vm2, %v1619_v48  ;;  %v8113_v48 = vld [vmem:[%s13240_s4 + $0xb0] sm:$0xff] }
 0x17c   : > { %9337 = vmatmul.mubr.msk.f32.gmra.mrb[22].mxu1 %vm1024_vm2, %v11512_v19  ;;  %9222 = vmatprep.mubr.msk.f32.mxu0 %vm1024_vm2, %v1620_v58 }
 0x17d   : > { %9345 = vmatprep.mubr.msk.f32.mxu1 %vm1024_vm2, %v1620_v58  ;;  %v11536_v58 = vld [vmem:[#allocation2 + $0x31] sm:$0xff] }
 0x17f   : > { %9223 = vmatmul.mubr.msk.f32.gmra.mrb[26].mxu0 %vm1024_vm2, %v1621_v16 }
 0x180   : > { %9346 = vmatmul.mubr.msk.f32.vlgmr.msra.gmra.mrb[0].mxu1 %vm1024_vm2, %v1621_v16  ;;  %9225 = vmatprep.mubr.msk.f32.mxu0 %vm1024_vm2, %v11524_v13  ;;  %v11538_v16 = vpack.c.bf16 %v8113_v48, %v8112_v15  ;;  %v11557_v15 = vld [vmem:[#allocation2 + $0x49] sm:$0xff]  ;;  %v11563_v48 = vld [vmem:[#allocation2 + $0x51] sm:$0xff] }
 0x181   : > { %10040 = vmatpush3.bf16.msra.mxu1 %v10037_v54  ;;  %9348 = vmatprep.mubr.msk.f32.mxu1 %vm1024_vm2, %v11524_v13  ;;  %v11550_v54 = vld [vmem:[#allocation2 + $0x41] sm:$0xff] }
 0x182   : > { %9385 = vmatprep.subr.mxu1 %v8087_v14 }
 0x183   : > { %9226 = vmatmul.mubr.msk.f32.gmra.mrb[28].mxu0 %vm1024_vm2, %v11536_v58 }
 0x184   : > { %9349 = vmatmul.mubr.msk.f32.gmra.mrb[2].mxu1 %vm1024_vm2, %v11536_v58  ;;  %9228 = vmatprep.mubr.msk.f32.mxu0 %vm1024_vm2, %v11544_v33 }
 0x185   : > { %9351 = vmatprep.mubr.msk.f32.mxu1 %vm1024_vm2, %v11544_v33  ;;  %9386 = vmatpush3.msra.mxu1 %v8087_v14  ;;  %v11569_v14 = vld [vmem:[#allocation2 + $0x59] sm:$0xff] }
 0x186   : > { %10042 = vmatprep.subr.bf16.mxu1 %v11538_v16 }
 0x187   : > { %9229 = vmatmul.mubr.msk.f32.gmra.mrb[30].mxu0 %vm1024_vm2, %v11550_v54 }
 0x188   : > { %9352 = vmatmul.mubr.msk.f32.gmra.mrb[4].mxu1 %vm1024_vm2, %v11550_v54  ;;  %9231 = vmatprep.mubr.msk.f32.mxu0 %vm1024_vm2, %v11557_v15 }
 0x189   : > { %9354 = vmatprep.mubr.msk.f32.mxu1 %vm1024_vm2, %v11557_v15 }
 0x18b   : > { %9232 = vmatmul.mubr.msk.f32.gmra.mrb[32].mxu0 %vm1024_vm2, %v11563_v48 }
 0x18c   : > { %9355 = vmatmul.mubr.msk.f32.gmra.mrb[6].mxu1 %vm1024_vm2, %v11563_v48  ;;  %9234 = vmatprep.mubr.msk.f32.mxu0 %vm1024_vm2, %v11569_v14 }
 0x18d   : > { %9357 = vmatprep.mubr.msk.f32.mxu1 %vm1024_vm2, %v11569_v14 }
 0x18f   : > { %9235 = vmatmul.mubr.msk.f32.gmra.mrb[34].mxu0 %vm1024_vm2, %v11575_v55 }
 0x190   : > { %9358 = vmatmul.mubr.msk.f32.gmra.mrb[8].mxu1 %vm1024_vm2, %v11575_v55  ;;  %9237 = vmatprep.mubr.msk.f32.mxu0 %vm1024_vm2, %v11581_v8 }
 0x191   : > { %9360 = vmatprep.mubr.msk.f32.mxu1 %vm1024_vm2, %v11581_v8 }
 0x193   : > { %9238 = vmatmul.mubr.msk.f32.gmra.mrb[36].mxu0 %vm1024_vm2, %v11587_v6 }
 0x194   : > { %9361 = vmatmul.mubr.msk.f32.gmra.mrb[10].mxu1 %vm1024_vm2, %v11587_v6  ;;  %9240 = vmatprep.mubr.msk.f32.mxu0 %vm1024_vm2, %v11593_v11 }
 0x195   : > { %9363 = vmatprep.mubr.msk.f32.mxu1 %vm1024_vm2, %v11593_v11 }
 0x197   : > { %9241 = vmatmul.mubr.msk.f32.gmra.mrb[38].mxu0 %vm1024_vm2, %v11599_v44 }
 0x198   : > { %9364 = vmatmul.mubr.msk.f32.gmra.mrb[12].mxu1 %vm1024_vm2, %v11599_v44  ;;  %9243 = vmatprep.mubr.msk.f32.mxu0 %vm1024_vm2, %v11605_v23 }
 0x199   : > { %9366 = vmatprep.mubr.msk.f32.mxu1 %vm1024_vm2, %v11605_v23 }
 0x19b   : > { %9244 = vmatmul.mubr.msk.f32.gmra.mrb[40].mxu0 %vm1024_vm2, %v11611_v52 }
 0x19c   : > { %9367 = vmatmul.mubr.msk.f32.gmra.mrb[14].mxu1 %vm1024_vm2, %v11611_v52  ;;  %9246 = vmatprep.mubr.msk.f32.mxu0 %vm1024_vm2, %v11617_v40 }
 0x19d   : > { %9369 = vmatprep.mubr.msk.f32.mxu1 %vm1024_vm2, %v11617_v40 }
 0x19f   : > { %9247 = vmatmul.mubr.msk.f32.gmra.mrb[42].mxu0 %vm1024_vm2, %v11623_v21 }
 0x1a0   : > { %9370 = vmatmul.mubr.msk.f32.gmra.mrb[16].mxu1 %vm1024_vm2, %v11623_v21  ;;  %9249 = vmatprep.mubr.msk.f32.mxu0 %vm1024_vm2, %v11629_v24  ;;  %v11647_v21 = vld [vmem:[#allocation2 + $0xc1] sm:$0xff] }
 0x1a1   : > { %9372 = vmatprep.mubr.msk.f32.mxu1 %vm1024_vm2, %v11629_v24  ;;  %13410 = vst [vmem:[#allocation55_spill] sm:$0xff] %v11647_v21  ;;  %v11653_v24 = vld [vmem:[#allocation2 + $0xc9] sm:$0xff] }
 0x1a2   : > { %13411 = vst [vmem:[#allocation56_spill] sm:$0xff] %v11653_v24 }
 0x1a3   : > { %9250 = vmatmul.mubr.msk.f32.gmra.mrb[44].mxu0 %vm1024_vm2, %v11635_v9 }
 0x1a4   : > { %9373 = vmatmul.mubr.msk.f32.gmra.mrb[18].mxu1 %vm1024_vm2, %v11635_v9  ;;  %9252 = vmatprep.mubr.msk.f32.mxu0 %vm1024_vm2, %v11641_v12  ;;  %v11657_v9 = vld [vmem:[#allocation2 + $0xd1] sm:$0xff] }
 0x1a5   : > { %9375 = vmatprep.mubr.msk.f32.mxu1 %vm1024_vm2, %v11641_v12  ;;  %v8114_v12 = vld [vmem:[%s13240_s4 + $0xb8] sm:$0xff] }
 0x1a7   : > { %9253 = vmatmul.mubr.msk.f32.gmra.mrb[46].mxu0 %vm1024_vm2, %v11647_v21 }
 0x1a8   : > { %9376 = vmatmul.mubr.msk.f32.gmra.mrb[20].mxu1 %vm1024_vm2, %v11647_v21  ;;  %v8139_v21 = vld [vmem:[%s13240_s4 + $0xc0] sm:$0xff] }
 0x1a9   : > { %9378 = vmatprep.mubr.msk.f32.mxu1 %vm1024_vm2, %v11653_v24  ;;  %v8140_v24 = vld [vmem:[%s13240_s4 + $0xc8] sm:$0xff] }
 0x1ac   : > { %9379 = vmatmul.mubr.msk.f32.gmra.mrb[22].mxu1 %vm1024_vm2, %v11657_v9 }
 0x1ad   : > { %9387 = vmatprep.mubr.msk.f32.mxu1 %vm1024_vm2, %v11103_v2  ;;  %v10045_v2 = vpack.c.bf16 %v8140_v24, %v8139_v21  ;;  %v13416_v21 = vld [vmem:[#allocation55_spill] sm:$0xff]  ;;  %v13417_v24 = vld [vmem:[#allocation56_spill] sm:$0xff] }
 0x1b0   : > { %9388 = vmatmul.mubr.msk.f32.vlgmr.msra.gmra.mrb[0].mxu1 %vm1024_vm2, %v11105_v41 }
 0x1b1   : > { %10044 = vmatpush3.bf16.msra.mxu1 %v11538_v16  ;;  %9390 = vmatprep.mubr.msk.f32.mxu1 %vm1024_vm2, %v11139_v36 }
 0x1b2   : > { %9427 = vmatprep.subr.mxu1 %v8114_v12 }
 0x1b4   : > { %9391 = vmatmul.mubr.msk.f32.gmra.mrb[2].mxu1 %vm1024_vm2, %v11141_v37 }
 0x1b5   : > { %9393 = vmatprep.mubr.msk.f32.mxu1 %vm1024_vm2, %v11176_v46  ;;  %9428 = vmatpush3.msra.mxu1 %v8114_v12  ;;  %v3186_v46 = vld [vmem:[#allocation2 + $0xe0] sm:$0xff]  ;;  %v13415_v12 = vld [vmem:[#allocation54_spill] sm:$0xff] }
 0x1b6   : > { %10046 = vmatprep.subr.bf16.mxu1 %v10045_v2 }
 0x1b8   : > { %9394 = vmatmul.mubr.msk.f32.gmra.mrb[4].mxu1 %vm1024_vm2, %v11178_v43  ;;  %v3185_v43 = vld [vmem:[#allocation2 + $0xd8] sm:$0xff] }
 0x1b9   : > { %9396 = vmatprep.mubr.msk.f32.mxu1 %vm1024_vm2, %v11210_v39 }
 0x1bc   : > { %9397 = vmatmul.mubr.msk.f32.gmra.mrb[6].mxu1 %vm1024_vm2, %v11212_v38  ;;  %v3861_v38 = vld [vmem:[%s13242_s6 + $0x8] sm:$0xff] }
 0x1bd   : > { %9399 = vmatprep.mubr.msk.f32.mxu1 %vm1024_vm2, %v11244_v57  ;;  %v13414_v57 = vld [vmem:[#allocation53_spill] sm:$0xff] }
 0x1c0   : > { %9400 = vmatmul.mubr.msk.f32.gmra.mrb[8].mxu1 %vm1024_vm2, %v11246_v26  ;;  %v2876_v26 = vld [vmem:[#allocation2 + $0xd7] sm:$0xff] }
 0x1c1   : > { %9402 = vmatprep.mubr.msk.f32.mxu1 %vm1024_vm2, %v11276_v29  ;;  %v8141_v29 = vld [vmem:[%s13240_s4 + $0xd0] sm:$0xff] }
 0x1c4   : > { %9403 = vmatmul.mubr.msk.f32.gmra.mrb[10].mxu1 %vm1024_vm2, %v11278_v3 }
 0x1c5   : > { %9405 = vmatprep.mubr.msk.f32.mxu1 %vm1024_vm2, %v11306_v27  ;;  %v2877_v27 = vld [vmem:[#allocation2 + $0xdf] sm:$0xff] }
 0x1c8   : > { %9406 = vmatmul.mubr.msk.f32.gmra.mrb[12].mxu1 %vm1024_vm2, %v11308_v42  ;;  %v3862_v42 = vld [vmem:[%s13242_s6 + $0x10] sm:$0xff] }
 0x1c9   : > { %9408 = vmatprep.mubr.msk.f32.mxu1 %vm1024_vm2, %v11336_v25 }
 0x1cc   : > { %9409 = vmatmul.mubr.msk.f32.gmra.mrb[14].mxu1 %vm1024_vm2, %v11338_v49  ;;  %v11862_v49 = vld [vmem:[%s13241_s5] ss:$0 sm:$0xff] }
 0x1cd   : > { %9411 = vmatprep.mubr.msk.f32.mxu1 %vm1024_vm2, %v11364_v32 }
 0x1d0   : > { %9412 = vmatmul.mubr.msk.f32.gmra.mrb[16].mxu1 %vm1024_vm2, %v11366_v62 }
 0x1d1   : > { %9414 = vmatprep.mubr.msk.f32.mxu1 %vm1024_vm2, %v11381_v31  ;;  %v3860_v31 = vld [vmem:[%s13242_s6] sm:$0xff] }
 0x1d2   : > { %v10049_v39 = vpack.c.bf16 %v3861_v38, %v3860_v31 }
 0x1d4   : > { %9415 = vmatmul.mubr.msk.f32.gmra.mrb[18].mxu1 %vm1024_vm2, %v11383_v7  ;;  %10050 = vmatprep.subr.bf16.mxu0 %v10049_v39 }
 0x1d5   : > { %9417 = vmatprep.mubr.msk.f32.mxu1 %vm1024_vm2, %v11396_v28  ;;  %10052 = vmatpush3.bf16.msra.mxu0 %v10049_v39 }
 0x1d6   : > { %9511 = vmatprep.subr.mxu0 %v3862_v42 }
 0x1d8   : > { %9418 = vmatmul.mubr.msk.f32.gmra.mrb[20].mxu1 %vm1024_vm2, %v11398_v17 }
 0x1d9   : > { %9420 = vmatprep.mubr.msk.f32.mxu1 %vm1024_vm2, %v2876_v26  ;;  %9512 = vmatpush3.msra.mxu0 %v3862_v42 }
 0x1dc   : > { %9421 = vmatmul.mubr.msk.f32.gmra.mrb[22].mxu1 %vm1024_vm2, %v2877_v27 }
 0x1dd   : > { %9429 = vmatprep.mubr.msk.f32.mxu1 %vm1024_vm2, %v11101_v0 }
 0x1e0   : > { %9430 = vmatmul.mubr.msk.f32.vlgmr.msra.gmra.mrb[0].mxu1 %vm1024_vm2, %v11120_v10 }
 0x1e1   : > { %10048 = vmatpush3.bf16.msra.mxu1 %v10045_v2  ;;  %9432 = vmatprep.mubr.msk.f32.mxu1 %vm1024_vm2, %v11137_v34 }
 0x1e2   : > { %9469 = vmatprep.subr.mxu1 %v8141_v29 }
 0x1e4   : > { %9433 = vmatmul.mubr.msk.f32.gmra.mrb[2].mxu1 %vm1024_vm2, %v11153_v56 }
 0x1e5   : > { %9435 = vmatprep.mubr.msk.f32.mxu1 %vm1024_vm2, %v11174_v47  ;;  %9470 = vmatpush3.msra.mxu1 %v8141_v29  ;;  %v13412_v47 = vld [vmem:[#allocation51_spill] sm:$0xff] }
 0x1e8   : > { %9436 = vmatmul.mubr.msk.f32.gmra.mrb[4].mxu1 %vm1024_vm2, %v11189_v60 }
 0x1e9   : > { %9438 = vmatprep.mubr.msk.f32.mxu1 %vm1024_vm2, %v11208_v50  ;;  %v13413_v50 = vld [vmem:[#allocation52_spill] sm:$0xff] }
 0x1ec   : > { %9439 = vmatmul.mubr.msk.f32.gmra.mrb[6].mxu1 %vm1024_vm2, %v11225_v5 }
 0x1ed   : > { %9441 = vmatprep.mubr.msk.f32.mxu1 %vm1024_vm2, %v11242_v22 }
 0x1f0   : > { %9442 = vmatmul.mubr.msk.f32.gmra.mrb[8].mxu1 %vm1024_vm2, %v11257_v30 }
 0x1f1   : > { %9444 = vmatprep.mubr.msk.f32.mxu1 %vm1024_vm2, %v11274_v51 }
 0x1f4   : > { %9445 = vmatmul.mubr.msk.f32.gmra.mrb[10].mxu1 %vm1024_vm2, %v11289_v18 }
 0x1f5   : > { %9447 = vmatprep.mubr.msk.f32.mxu1 %vm1024_vm2, %v11304_v59  ;;  %v8193_v59 = vld [vmem:[%s13238_s2 + $0x18] sm:$0xff] }
 0x1f8   : > { %9448 = vmatmul.mubr.msk.f32.gmra.mrb[12].mxu1 %vm1024_vm2, %v11319_v4 }
 0x1f9   : > { %9450 = vmatprep.mubr.msk.f32.mxu1 %vm1024_vm2, %v11334_v1 }
 0x1fc   : > { %9451 = vmatmul.mubr.msk.f32.gmra.mrb[14].mxu1 %vm1024_vm2, %v11348_v61 }
 0x1fd   : > { %9453 = vmatprep.mubr.msk.f32.mxu1 %vm1024_vm2, %v11362_v20 }
 0x200   : > { %9454 = vmatmul.mubr.msk.f32.gmra.mrb[16].mxu1 %vm1024_vm2, %v11373_v63 }
 0x201   : > { %9456 = vmatprep.mubr.msk.f32.mxu1 %vm1024_vm2, %v11379_v35 }
 0x204   : > { %9457 = vmatmul.mubr.msk.f32.gmra.mrb[18].mxu1 %vm1024_vm2, %v11389_v53 }
 0x205   : > { %9459 = vmatprep.mubr.msk.f32.mxu1 %vm1024_vm2, %v11507_v45 }
 0x208   : > { %9460 = vmatmul.mubr.msk.f32.gmra.mrb[20].mxu1 %vm1024_vm2, %v11512_v19 }
 0x209   : > { %9462 = vmatprep.mubr.msk.f32.mxu1 %vm1024_vm2, %v3185_v43 }
 0x20c   : > { %9463 = vmatmul.mubr.msk.f32.gmra.mrb[22].mxu1 %vm1024_vm2, %v3186_v46  ;;  %v13420_v46 = vld [vmem:[#allocation26_spill] sm:$0xff] }
 0x20d   : > { %9471 = vmatprep.mubr.msk.f32.mxu1 %vm1024_vm2, %v11524_v13 }
 0x210   : > { %9472 = vmatmul.mubr.msk.f32.vlgmr.msra.gmra.mrb[0].mxu1 %vm1024_vm2, %v11536_v58 }
 0x211   : > { %9474 = vmatprep.mubr.msk.f32.mxu1 %vm1024_vm2, %v11544_v33  ;;  %v8192_v33 = vld [vmem:[%s13238_s2 + $0x10] sm:$0xff] }
 0x212   : > { %v10053_v4 = vpack.c.bf16 %v8193_v59, %v8192_v33  ;;  %v13423_v59 = vld [vmem:[#allocation27_spill] sm:$0xff] }
 0x214   : > { %9475 = vmatmul.mubr.msk.f32.gmra.mrb[2].mxu1 %vm1024_vm2, %v11550_v54  ;;  %10054 = vmatprep.subr.bf16.mxu0 %v10053_v4 }
 0x215   : > { %9477 = vmatprep.mubr.msk.f32.mxu1 %vm1024_vm2, %v11557_v15  ;;  %v13418_v15 = vld [vmem:[#allocation22_spill] sm:$0xff] }
 0x218   : > { %9478 = vmatmul.mubr.msk.f32.gmra.mrb[4].mxu1 %vm1024_vm2, %v11563_v48 }
 0x219   : > { %9480 = vmatprep.mubr.msk.f32.mxu1 %vm1024_vm2, %v11569_v14  ;;  %v13419_v14 = vld [vmem:[#allocation21_spill] sm:$0xff] }
 0x21c   : > { %9481 = vmatmul.mubr.msk.f32.gmra.mrb[6].mxu1 %vm1024_vm2, %v11575_v55 }
 0x21d   : > { %9483 = vmatprep.mubr.msk.f32.mxu1 %vm1024_vm2, %v11581_v8 }
 0x220   : > { %9484 = vmatmul.mubr.msk.f32.gmra.mrb[8].mxu1 %vm1024_vm2, %v11587_v6 }
 0x221   : > { %9486 = vmatprep.mubr.msk.f32.mxu1 %vm1024_vm2, %v11593_v11 }
 0x224   : > { %9487 = vmatmul.mubr.msk.f32.gmra.mrb[10].mxu1 %vm1024_vm2, %v11599_v44 }
 0x225   : > { %9489 = vmatprep.mubr.msk.f32.mxu1 %vm1024_vm2, %v11605_v23 }
 0x228   : > { %9490 = vmatmul.mubr.msk.f32.gmra.mrb[12].mxu1 %vm1024_vm2, %v11611_v52  ;;  %v3494_v52 = vld [vmem:[#allocation2 + $0xd9] sm:$0xff] }
 0x229   : > { %9492 = vmatprep.mubr.msk.f32.mxu1 %vm1024_vm2, %v11617_v40  ;;  %v3495_v40 = vld [vmem:[#allocation2 + $0xe1] sm:$0xff] }
 0x22c   : > { %9493 = vmatmul.mubr.msk.f32.gmra.mrb[14].mxu1 %vm1024_vm2, %v13412_v47 }
 0x22d   : > { %9495 = vmatprep.mubr.msk.f32.mxu1 %vm1024_vm2, %v13413_v50 }
 0x230   : > { %9496 = vmatmul.mubr.msk.f32.gmra.mrb[16].mxu1 %vm1024_vm2, %v13414_v57 }
 0x231   : > { %9498 = vmatprep.mubr.msk.f32.mxu1 %vm1024_vm2, %v13415_v12 }
 0x234   : > { %9499 = vmatmul.mubr.msk.f32.gmra.mrb[18].mxu1 %vm1024_vm2, %v13416_v21  ;;  %v13421_v21 = vld [vmem:[#allocation25_spill] sm:$0xff] }
 0x235   : > { %9501 = vmatprep.mubr.msk.f32.mxu1 %vm1024_vm2, %v13417_v24 }
 0x238   : > { %9502 = vmatmul.mubr.msk.f32.gmra.mrb[20].mxu1 %vm1024_vm2, %v11657_v9 }
 0x239   : > { %9504 = vmatprep.mubr.msk.f32.mxu1 %vm1024_vm2, %v3494_v52 }
 0x23c   : > { %9505 = vmatmul.mubr.msk.f32.gmra.mrb[22].mxu1 %vm1024_vm2, %v3495_v40 }
 0x24e   : > { %v9221_v44 = vpop.f32.mrb[24].mxu0 }
 0x24f   : > { %v1784_v23 = vpop.f32.mrb[25].mxu0 }
 0x252   : > { %v9224_v0 = vpop.f32.mrb[26].mxu0 }
 0x253   : > { %v1794_v41 = vpop.f32.mrb[27].mxu0 }
 0x256   : > { %v9227_v25 = vpop.f32.mrb[28].mxu0 }
 0x257   : > { %v1804_v6 = vpop.f32.mrb[29].mxu0 }
 0x25a   : > { %v9230_v10 = vpop.f32.mrb[30].mxu0 }
 0x25b   : > { %v1814_v11 = vpop.f32.mrb[31].mxu0 }
 0x25e   : > { %v11821_v34 = vpop.f32.mrb[32].mxu0 }
 0x25f   : > { %v11823_v36 = vpop.f32.mrb[33].mxu0 }
 0x262   : > { %v11825_v37 = vpop.f32.mrb[34].mxu0 }
 0x263   : > { %v11827_v9 = vpop.f32.mrb[35].mxu0 }
 0x266   : > { %v11829_v55 = vpop.f32.mrb[36].mxu0 }
 0x267   : > { %v11831_v56 = vpop.f32.mrb[37].mxu0 }
 0x26a   : > { %v11833_v8 = vpop.f32.mrb[38].mxu0 }
 0x26b   : > { %v11835_v60 = vpop.f32.mrb[39].mxu0 }
 0x26e   : > { %v11837_v17 = vpop.f32.mrb[40].mxu0 }
 0x26f   : > { %v11839_v53 = vpop.f32.mrb[41].mxu0 }
 0x272   : > { %v11841_v3 = vpop.f32.mrb[42].mxu0 }
 0x273   : > { %v11843_v5 = vpop.f32.mrb[43].mxu0 }
 0x276   : > { %v11845_v22 = vpop.f32.mrb[44].mxu0 }
 0x277   : > { %v11847_v30 = vpop.f32.mrb[45].mxu0 }
 0x27a   : > { %v11849_v51 = vpop.f32.mrb[46].mxu0 }
 0x27b   : > { %v11851_v18 = vpop.f32.mrb[47].mxu0 }
 0x2e3   : > { %v9473_v1 = vpop.f32.mrb[0].mxu1 }
 0x2e4   : > { %v10097_v61 = vadd.f32 %v9473_v1, %v9221_v44  ;;  %v3638_v28 = vpop.f32.mrb[1].mxu1 }
 0x2e5   : > { %v10098_v20 = vadd.f32 %v3638_v28, %v1784_v23 }
 0x2e6   : > { %v3789_v32 = vadd.f32 %v10097_v61, %v11862_v49 }
 0x2e7   : > { %v3788_v62 = vadd.f32 %v10098_v20, %v11862_v49  ;;  %v9476_v63 = vpop.f32.mrb[2].mxu1 }
 0x2e8   : > { %v3813_v35 = vmax.f32 %v3789_v32, 0.0  ;;  %v10099_v7 = vadd.f32 %v9476_v63, %v9224_v0  ;;  %v3648_v45 = vpop.f32.mrb[3].mxu1  ;;  %v13424_v32 = vld [vmem:[#allocation30_spill] sm:$0xff] }
 0x2e9   : > { %v3812_v19 = vmax.f32 %v3788_v62, 0.0  ;;  %v10100_v13 = vadd.f32 %v3648_v45, %v1794_v41  ;;  %v13422_v41 = vld [vmem:[#allocation28_spill] sm:$0xff] }
 0x2ea   : > { %v3791_v58 = vadd.f32 %v10099_v7, %v11862_v49  ;;  %v3837_v2 = vsel %vm454_vm1, %v3813_v35, %v13419_v14  ;;  %v13425_v7 = vld [vmem:[#allocation29_spill] sm:$0xff] }
 0x2eb   : > { %v3790_v16 = vadd.f32 %v10100_v13, %v11862_v49  ;;  %v9479_v54 = vpop.f32.mrb[4].mxu1  ;;  %v3836_v48 = vsel %vm454_vm1, %v3812_v19, %v13418_v15 }
 0x2ec   : > { %v3815_v26 = vmax.f32 %v3791_v58, 0.0  ;;  %v10101_v27 = vadd.f32 %v9479_v54, %v9227_v25  ;;  %v3658_v29 = vpop.f32.mrb[5].mxu1  ;;  %9513 = vmatprep.mubr.msk.f32.mxu0 %vm1024_vm2, %v3836_v48  ;;  %v13426_v54 = vld [vmem:[#allocation34_spill] sm:$0xff] }
 0x2ed   : > { %v3814_v31 = vmax.f32 %v3790_v16, 0.0  ;;  %v10102_v38 = vadd.f32 %v3658_v29, %v1804_v6  ;;  %9514 = vmatmul.mubr.msk.f32.vlgmr.msra.gmra.mrb[48].mxu0 %vm1024_vm2, %v3837_v2  ;;  %v13427_v2 = vld [vmem:[#allocation33_spill] sm:$0xff] }
 0x2ee   : > { %v3793_v39 = vadd.f32 %v10101_v27, %v11862_v49  ;;  %10056 = vmatpush3.bf16.msra.mxu0 %v10053_v4  ;;  %v3839_v24 = vsel %vm454_vm1, %v3815_v26, %v13421_v21 }
 0x2ef   : > { %v3792_v42 = vadd.f32 %v10102_v38, %v11862_v49  ;;  %v9482_v43 = vpop.f32.mrb[6].mxu1  ;;  %v3838_v47 = vsel %vm454_vm1, %v3814_v31, %v13420_v46 }
 0x2f0   : > { %v3817_v50 = vmax.f32 %v3793_v39, 0.0  ;;  %v10103_v57 = vadd.f32 %v9482_v43, %v9230_v10  ;;  %v3668_v12 = vpop.f32.mrb[7].mxu1  ;;  %9516 = vmatprep.mubr.msk.f32.mxu0 %vm1024_vm2, %v3838_v47  ;;  %v13428_v39 = vld [vmem:[#allocation36_spill] sm:$0xff]  ;;  %v13429_v47 = vld [vmem:[#allocation35_spill] sm:$0xff] }
 0x2f1   : > { %v3816_v52 = vmax.f32 %v3792_v42, 0.0  ;;  %v10104_v40 = vadd.f32 %v3668_v12, %v1814_v11  ;;  %9517 = vmatmul.mubr.msk.f32.gmra.mrb[50].mxu0 %vm1024_vm2, %v3839_v24 }
 0x2f2   : > { %v3795_v44 = vadd.f32 %v10103_v57, %v11862_v49  ;;  %v3841_v4 = vsel %vm454_vm1, %v3817_v50, %v13423_v59  ;;  %v13432_v59 = vld [vmem:[#allocation42_spill] sm:$0xff] }
 0x2f3   : > { %v3794_v23 = vadd.f32 %v10104_v40, %v11862_v49  ;;  %v9485_v0 = vpop.f32.mrb[8].mxu1  ;;  %v3840_v25 = vsel %vm454_vm1, %v3816_v52, %v13422_v41  ;;  %v13430_v52 = vld [vmem:[#allocation38_spill] sm:$0xff] }
 0x2f4   : > { %v3819_v6 = vmax.f32 %v3795_v44, 0.0  ;;  %v10105_v10 = vadd.f32 %v9485_v0, %v11821_v34  ;;  %v3678_v33 = vpop.f32.mrb[9].mxu1  ;;  %9519 = vmatprep.mubr.msk.f32.mxu0 %vm1024_vm2, %v3840_v25  ;;  %v13431_v0 = vld [vmem:[#allocation37_spill] sm:$0xff] }
 0x2f5   : > { %v3818_v11 = vmax.f32 %v3794_v23, 0.0  ;;  %v10106_v1 = vadd.f32 %v3678_v33, %v11823_v36  ;;  %9520 = vmatmul.mubr.msk.f32.gmra.mrb[52].mxu0 %vm1024_vm2, %v3841_v4 }
 0x2f6   : > { %v3797_v61 = vadd.f32 %v10105_v10, %v11862_v49  ;;  %v3843_v45 = vsel %vm454_vm1, %v3819_v6, %v13425_v7 }
 0x2f7   : > { %v3796_v28 = vadd.f32 %v10106_v1, %v11862_v49  ;;  %v9488_v20 = vpop.f32.mrb[10].mxu1  ;;  %v3842_v62 = vsel %vm454_vm1, %v3818_v11, %v13424_v32 }
 0x2f8   : > { %v3821_v34 = vmax.f32 %v3797_v61, 0.0  ;;  %v10107_v63 = vadd.f32 %v9488_v20, %v11825_v37  ;;  %v3688_v35 = vpop.f32.mrb[11].mxu1  ;;  %9522 = vmatprep.mubr.msk.f32.mxu0 %vm1024_vm2, %v3842_v62  ;;  %v13433_v61 = vld [vmem:[#allocation41_spill] sm:$0xff] }
 0x2f9   : > { %v3820_v36 = vmax.f32 %v3796_v28, 0.0  ;;  %v10108_v19 = vadd.f32 %v3688_v35, %v11827_v9  ;;  %9523 = vmatmul.mubr.msk.f32.gmra.mrb[54].mxu0 %vm1024_vm2, %v3843_v45 }
 0x2fa   : > { %v3799_v13 = vadd.f32 %v10107_v63, %v11862_v49  ;;  %v3845_v26 = vsel %vm454_vm1, %v3821_v34, %v13427_v2  ;;  %v13434_v63 = vld [vmem:[#allocation44_spill] sm:$0xff]  ;;  %v13437_v2 = vld [vmem:[#allocation45_spill] sm:$0xff] }
 0x2fb   : > { %v3798_v58 = vadd.f32 %v10108_v19, %v11862_v49  ;;  %v9491_v16 = vpop.f32.mrb[12].mxu1  ;;  %v3844_v15 = vsel %vm454_vm1, %v3820_v36, %v13426_v54  ;;  %v13435_v36 = vld [vmem:[#allocation43_spill] sm:$0xff] }
 0x2fc   : > { %v3823_v37 = vmax.f32 %v3799_v13, 0.0  ;;  %v10109_v48 = vadd.f32 %v9491_v16, %v11829_v55  ;;  %v3698_v14 = vpop.f32.mrb[13].mxu1  ;;  %9525 = vmatprep.mubr.msk.f32.mxu0 %vm1024_vm2, %v3844_v15  ;;  %v13436_v15 = vld [vmem:[#allocation46_spill] sm:$0xff] }
 0x2fd   : > { %v3822_v9 = vmax.f32 %v3798_v58, 0.0  ;;  %v10110_v27 = vadd.f32 %v3698_v14, %v11831_v56  ;;  %9526 = vmatmul.mubr.msk.f32.gmra.mrb[56].mxu0 %vm1024_vm2, %v3845_v26 }
 0x2fe   : > { %v3801_v29 = vadd.f32 %v10109_v48, %v11862_v49  ;;  %v3847_v50 = vsel %vm454_vm1, %v3823_v37, %v13429_v47  ;;  %v4493_v47 = vld [vmem:[#allocation2 + $0x110] sm:$0xff] }
 0x2ff   : > { %v3800_v31 = vadd.f32 %v10110_v27, %v11862_v49  ;;  %v9494_v38 = vpop.f32.mrb[14].mxu1  ;;  %v3846_v42 = vsel %vm454_vm1, %v3822_v9, %v13428_v39  ;;  %4542 = vrot.lane.b32.xlu1 %v4493_v47, %s10595_s26  ;;  %v10535_v47 = vld [vmem:[%s10683_s23 + $0x30] sm:$0xff] }
 0x300   : > { %v3825_v55 = vmax.f32 %v3801_v29, 0.0  ;;  %v10111_v43 = vadd.f32 %v9494_v38, %v11833_v8  ;;  %v3708_v46 = vpop.f32.mrb[15].mxu1  ;;  %9528 = vmatprep.mubr.msk.f32.mxu0 %vm1024_vm2, %v3846_v42 }
 0x301   : > { %v3824_v56 = vmax.f32 %v3800_v31, 0.0  ;;  %v10112_v57 = vadd.f32 %v3708_v46, %v11835_v60  ;;  %9529 = vmatmul.mubr.msk.f32.gmra.mrb[58].mxu0 %vm1024_vm2, %v3847_v50  ;;  %v13438_v31 = vld [vmem:[#allocation48_spill] sm:$0xff]  ;;  %v13441_v46 = vld [vmem:[#allocation49_spill] sm:$0xff] }
 0x302   : > { %v3803_v12 = vadd.f32 %v10111_v43, %v11862_v49  ;;  %v3849_v41 = vsel %vm454_vm1, %v3825_v55, %v13431_v0  ;;  %v13440_v43 = vld [vmem:[#allocation50_spill] sm:$0xff]  ;;  %v4492_v50 = vld [vmem:[#allocation2 + $0x108] sm:$0xff]  ;;  %v4505_v0 = vld [vmem:[#allocation2 + $0x170] sm:$0xff] }
 0x303   : > { %v3802_v21 = vadd.f32 %v10112_v57, %v11862_v49  ;;  %v9497_v24 = vpop.f32.mrb[16].mxu1  ;;  %v3848_v40 = vsel %vm454_vm1, %v3824_v56, %v13430_v52  ;;  %4540 = vrot.lane.b32.xlu0 %v4492_v50, %s10595_s26  ;;  %v4495_v56 = vld [vmem:[#allocation2 + $0x120] sm:$0xff]  ;;  %v4494_v57 = vld [vmem:[#allocation2 + $0x118] sm:$0xff] }
 0x304   : > { %v3827_v8 = vmax.f32 %v3803_v12, 0.0  ;;  %v10113_v44 = vadd.f32 %v9497_v24, %v11837_v17  ;;  %v3718_v23 = vpop.f32.mrb[17].mxu1  ;;  %9531 = vmatprep.mubr.msk.f32.mxu0 %vm1024_vm2, %v3848_v40  ;;  %4546 = vrot.lane.b32.xlu1 %v4495_v56, %s10595_s26  ;;  %v4497_v12 = vld [vmem:[#allocation2 + $0x130] sm:$0xff]  ;;  %v4499_v24 = vld [vmem:[#allocation2 + $0x140] sm:$0xff]  ;;  %v4498_v52 = vld [vmem:[#allocation2 + $0x138] sm:$0xff] }
 0x305   : > { %v3826_v60 = vmax.f32 %v3802_v21, 0.0  ;;  %v10114_v25 = vadd.f32 %v3718_v23, %v11839_v53  ;;  %9532 = vmatmul.mubr.msk.f32.gmra.mrb[60].mxu0 %vm1024_vm2, %v3849_v41  ;;  %v4496_v21 = vld [vmem:[#allocation2 + $0x128] sm:$0xff]  ;;  %v4501_v40 = vld [vmem:[#allocation2 + $0x150] sm:$0xff]  ;;  %v4502_v23 = vld [vmem:[#allocation2 + $0x158] sm:$0xff] }
 0x306   : > { %v3805_v6 = vadd.f32 %v10113_v44, %v11862_v49  ;;  %v3851_v28 = vsel %vm454_vm1, %v3827_v8, %v13433_v61  ;;  %v4500_v8 = vld [vmem:[#allocation2 + $0x148] sm:$0xff]  ;;  %v4503_v44 = vld [vmem:[#allocation2 + $0x160] sm:$0xff] }
 0x307   : > { %v3804_v10 = vadd.f32 %v10114_v25, %v11862_v49  ;;  %v9500_v33 = vpop.f32.mrb[18].mxu1  ;;  %v3850_v4 = vsel %vm454_vm1, %v3826_v60, %v13432_v59  ;;  %4544 = vrot.lane.b32.xlu0 %v4494_v57, %s10595_s26  ;;  %v4504_v41 = vld [vmem:[#allocation2 + $0x168] sm:$0xff]  ;;  %v4507_v60 = vld [vmem:[#allocation2 + $0x180] sm:$0xff]  ;;  %v4506_v25 = vld [vmem:[#allocation2 + $0x178] sm:$0xff] }
 0x308   : > { %v3829_v17 = vmax.f32 %v3805_v6, 0.0  ;;  %v10115_v11 = vadd.f32 %v9500_v33, %v11841_v3  ;;  %v3728_v1 = vpop.f32.mrb[19].mxu1  ;;  %9534 = vmatprep.mubr.msk.f32.mxu0 %vm1024_vm2, %v3850_v4  ;;  %4550 = vrot.lane.b32.xlu1 %v4497_v12, %s10595_s26  ;;  %v4509_v6 = vld [vmem:[#allocation2 + $0x190] sm:$0xff]  ;;  %v4511_v33 = vld [vmem:[#allocation2 + $0x1a0] sm:$0xff]  ;;  %v4510_v59 = vld [vmem:[#allocation2 + $0x198] sm:$0xff] }
 0x309   : > { %v3828_v53 = vmax.f32 %v3804_v10, 0.0  ;;  %v10116_v20 = vadd.f32 %v3728_v1, %v11843_v5  ;;  %9535 = vmatmul.mubr.msk.f32.gmra.mrb[62].mxu0 %vm1024_vm2, %v3851_v28  ;;  %v4508_v10 = vld [vmem:[#allocation2 + $0x188] sm:$0xff]  ;;  %v4513_v4 = vld [vmem:[#allocation2 + $0x1b0] sm:$0xff]  ;;  %v4514_v1 = vld [vmem:[#allocation2 + $0x1b8] sm:$0xff] }
 0x30a   : > { %v3807_v32 = vadd.f32 %v10115_v11, %v11862_v49  ;;  %v3853_v19 = vsel %vm454_vm1, %v3829_v17, %v13435_v36  ;;  %v4512_v17 = vld [vmem:[#allocation2 + $0x1a8] sm:$0xff]  ;;  %v4515_v11 = vld [vmem:[#allocation2 + $0x1c0] sm:$0xff]  ;;  %v10536_v57 = vld [vmem:[%s10683_s23 + $0x38] sm:$0xff] }
 0x30b   : > { %v3806_v62 = vadd.f32 %v10116_v20, %v11862_v49  ;;  %v9503_v34 = vpop.f32.mrb[20].mxu1  ;;  %v3852_v35 = vsel %vm454_vm1, %v3828_v53, %v13434_v63  ;;  %4548 = vrot.lane.b32.xlu0 %v4496_v21, %s10595_s26  ;;  %v12003_v61 = vld [vmem:[%s13243_s7] ss:$0 sm:$0xff] }
 0x30c   : > { %v3831_v3 = vmax.f32 %v3807_v32, 0.0  ;;  %v10117_v7 = vadd.f32 %v9503_v34, %v11845_v22  ;;  %v3738_v45 = vpop.f32.mrb[21].mxu1  ;;  %9537 = vmatprep.mubr.msk.f32.mxu0 %vm1024_vm2, %v3852_v35  ;;  %4554 = vrot.lane.b32.xlu1 %v4499_v24, %s10595_s26 }
 0x30d   : > { %v3830_v5 = vmax.f32 %v3806_v62, 0.0  ;;  %v10118_v13 = vadd.f32 %v3738_v45, %v11847_v30  ;;  %9538 = vmatmul.mubr.msk.f32.gmra.mrb[64].mxu0 %vm1024_vm2, %v3853_v19  ;;  %v10530_v19 = vld [vmem:[%s10683_s23 + $0x8] sm:$0xff] }
 0x30e   : > { %v3809_v58 = vadd.f32 %v10117_v7, %v11862_v49  ;;  %v3855_v26 = vsel %vm454_vm1, %v3831_v3, %v13437_v2  ;;  %v10529_v7 = vld [vmem:[%s10683_s23] sm:$0xff] }
 0x30f   : > { %v3808_v16 = vadd.f32 %v10118_v13, %v11862_v49  ;;  %v9506_v54 = vpop.f32.mrb[22].mxu1  ;;  %v3854_v37 = vsel %vm454_vm1, %v3830_v5, %v13436_v15  ;;  %4552 = vrot.lane.b32.xlu0 %v4498_v52, %s10595_s26 }
 0x310   : > { %v3833_v22 = vmax.f32 %v3809_v58, 0.0  ;;  %v10119_v48 = vadd.f32 %v9506_v54, %v11849_v51  ;;  %v3748_v14 = vpop.f32.mrb[23].mxu1  ;;  %9540 = vmatprep.mubr.msk.f32.mxu0 %vm1024_vm2, %v3854_v37  ;;  %v13439_v51 = vld [vmem:[#allocation47_spill] sm:$0xff]  ;;  %4558 = vrot.lane.b32.xlu1 %v4501_v40, %s10595_s26  ;;  %v10531_v37 = vld [vmem:[%s10683_s23 + $0x10] sm:$0xff] }
 0x311   : > { %v3832_v30 = vmax.f32 %v3808_v16, 0.0  ;;  %v10120_v9 = vadd.f32 %v3748_v14, %v11851_v18  ;;  %9541 = vmatmul.mubr.msk.f32.gmra.mrb[66].mxu0 %vm1024_vm2, %v3855_v26  ;;  %v10532_v14 = vld [vmem:[%s10683_s23 + $0x18] sm:$0xff] }
 0x312   : > { %v3811_v27 = vadd.f32 %v10119_v48, %v11862_v49  ;;  %v3857_v42 = vsel %vm454_vm1, %v3833_v22, %v13439_v51  ;;  %v10534_v51 = vld [vmem:[%s10683_s23 + $0x28] sm:$0xff] }
 0x313   : > { %v3810_v29 = vadd.f32 %v10120_v9, %v11862_v49  ;;  %v3856_v38 = vsel %vm454_vm1, %v3832_v30, %v13438_v31  ;;  %4556 = vrot.lane.b32.xlu0 %v4500_v8, %s10595_s26  ;;  %v10533_v31 = vld [vmem:[%s10683_s23 + $0x20] sm:$0xff] }
 0x314   : > { %v3835_v39 = vmax.f32 %v3811_v27, 0.0  ;;  %9543 = vmatprep.mubr.msk.f32.mxu0 %vm1024_vm2, %v3856_v38  ;;  %4562 = vrot.lane.b32.xlu1 %v4503_v44, %s10595_s26  ;;  %v10537_v44 = vld [vmem:[%s10683_s23 + $0x40] sm:$0xff] }
 0x315   : > { %v3834_v55 = vmax.f32 %v3810_v29, 0.0  ;;  %9544 = vmatmul.mubr.msk.f32.gmra.mrb[68].mxu0 %vm1024_vm2, %v3857_v42 }
 0x316   : > { %v3859_v49 = vsel %vm454_vm1, %v3835_v39, %v13441_v46 }
 0x317   : > { %v3858_v18 = vsel %vm454_vm1, %v3834_v55, %v13440_v43  ;;  %4560 = vrot.lane.b32.xlu0 %v4502_v23, %s10595_s26 }
 0x318   : > { %9546 = vmatprep.mubr.msk.f32.mxu0 %vm1024_vm2, %v3858_v18  ;;  %4566 = vrot.lane.b32.xlu1 %v4505_v0, %s10595_s26 }
 0x319   : > { %9547 = vmatmul.mubr.msk.f32.gmra.mrb[70].mxu0 %vm1024_vm2, %v3859_v49 }
 0x31b   : > { %4564 = vrot.lane.b32.xlu0 %v4504_v41, %s10595_s26  ;;  %v10538_v41 = vld [vmem:[%s10683_s23 + $0x48] sm:$0xff] }
 0x31c   : > { %4570 = vrot.lane.b32.xlu1 %v4507_v60, %s10595_s26 }
 0x31f   : > { %4568 = vrot.lane.b32.xlu0 %v4506_v25, %s10595_s26 }
 0x320   : > { %4574 = vrot.lane.b32.xlu1 %v4509_v6, %s10595_s26 }
 0x323   : > { %4572 = vrot.lane.b32.xlu0 %v4508_v10, %s10595_s26 }
 0x324   : > { %4578 = vrot.lane.b32.xlu1 %v4511_v33, %s10595_s26 }
 0x327   : > { %4576 = vrot.lane.b32.xlu0 %v4510_v59, %s10595_s26 }
 0x328   : > { %4582 = vrot.lane.b32.xlu1 %v4513_v4, %s10595_s26  ;;  %v10539_v4 = vld [vmem:[%s10683_s23 + $0x50] sm:$0xff] }
 0x32b   : > { %4580 = vrot.lane.b32.xlu0 %v4512_v17, %s10595_s26 }
 0x32c   : > { %4586 = vrot.lane.b32.xlu1 %v4515_v11, %s10595_s26 }
 0x32f   : > { %4584 = vrot.lane.b32.xlu0 %v4514_v1, %s10595_s26  ;;  %v10540_v1 = vld [vmem:[%s10683_s23 + $0x58] sm:$0xff] }
 0x3c0   : > { %v9515_v28 = vpop.f32.mrb[48].mxu0 }
 0x3c1   : > { %v4014_v53 = vadd.f32 %v9515_v28, %v12003_v61  ;;  %v4008_v20 = vpop.f32.mrb[49].mxu0 }
 0x3c2   : > { %v4009_v32 = vadd.f32 %v12003_v61, %v4008_v20 }
 0x3c3   : > { %v4128_v62 = vmax.f32 %v4014_v53, 0.0 }
 0x3c4   : > { %v4127_v34 = vmax.f32 %v4009_v32, 0.0  ;;  %v9518_v63 = vpop.f32.mrb[50].mxu0 }
 0x3c5   : > { %v4024_v35 = vadd.f32 %v9518_v63, %v12003_v61  ;;  %v4018_v3 = vpop.f32.mrb[51].mxu0  ;;  %v12013_v5 = vadd.f32 %v10530_v19, %v4128_v62  ;;  %v10541_v63 = vld [vmem:[%s10683_s23 + $0x60] sm:$0xff] }
 0x3c6   : > { %v12009_v45 = vadd.f32 %v10529_v7, %v4127_v34  ;;  %v4019_v36 = vadd.f32 %v12003_v61, %v4018_v3  ;;  %v10542_v7 = vld [vmem:[%s10683_s23 + $0x68] sm:$0xff] }
 0x3c7   : > { %13443 = vst [vmem:[#allocation52_spill] sm:$0xff] %v12013_v5  ;;  %v4130_v13 = vmax.f32 %v4024_v35, 0.0 }
 0x3c8   : > { %13442 = vst [vmem:[#allocation51_spill] sm:$0xff] %v12009_v45  ;;  %v4129_v58 = vmax.f32 %v4019_v36, 0.0  ;;  %v9521_v16 = vpop.f32.mrb[52].mxu0  ;;  %9553 = vmatprep.mubr.msk.f32.mxu0 %vm454_vm1, %v12009_v45 }
 0x3c9   : > { %v4034_v54 = vadd.f32 %v9521_v16, %v12003_v61  ;;  %v4028_v15 = vpop.f32.mrb[53].mxu0  ;;  %9554 = vmatmul.mubr.msk.f32.vlgmr.msra.gmra.mrb[72].mxu0 %vm454_vm1, %v12013_v5  ;;  %v12025_v2 = vadd.f32 %v10532_v14, %v4130_v13  ;;  %v10544_v14 = vld [vmem:[%s10683_s23 + $0x78] sm:$0xff] }
 0x3ca   : > { %v12021_v22 = vadd.f32 %v10531_v37, %v4129_v58  ;;  %v4029_v48 = vadd.f32 %v12003_v61, %v4028_v15  ;;  %v10543_v15 = vld [vmem:[%s10683_s23 + $0x70] sm:$0xff] }
 0x3cb   : > { %13445 = vst [vmem:[#allocation54_spill] sm:$0xff] %v12025_v2  ;;  %v4132_v26 = vmax.f32 %v4034_v54, 0.0 }
 0x3cc   : > { %13444 = vst [vmem:[#allocation53_spill] sm:$0xff] %v12021_v22  ;;  %v4131_v30 = vmax.f32 %v4029_v48, 0.0  ;;  %v9524_v9 = vpop.f32.mrb[54].mxu0  ;;  %9556 = vmatprep.mubr.msk.f32.mxu0 %vm454_vm1, %v12021_v22 }
 0x3cd   : > { %v4044_v27 = vadd.f32 %v9524_v9, %v12003_v61  ;;  %v4038_v29 = vpop.f32.mrb[55].mxu0  ;;  %9557 = vmatmul.mubr.msk.f32.gmra.mrb[74].mxu0 %vm454_vm1, %v12025_v2  ;;  %v12037_v42 = vadd.f32 %v10534_v51, %v4132_v26 }
 0x3ce   : > { %v12033_v38 = vadd.f32 %v10533_v31, %v4131_v30  ;;  %v4039_v39 = vadd.f32 %v12003_v61, %v4038_v29 }
 0x3cf   : > { %13447 = vst [vmem:[#allocation56_spill] sm:$0xff] %v12037_v42  ;;  %v4134_v55 = vmax.f32 %v4044_v27, 0.0 }
 0x3d0   : > { %13446 = vst [vmem:[#allocation55_spill] sm:$0xff] %v12033_v38  ;;  %v4133_v43 = vmax.f32 %v4039_v39, 0.0  ;;  %v9527_v18 = vpop.f32.mrb[56].mxu0  ;;  %9559 = vmatprep.mubr.msk.f32.mxu0 %vm454_vm1, %v12033_v38  ;;  %v10545_v39 = vld [vmem:[%s10683_s23 + $0x80] sm:$0xff] }
 0x3d1   : > { %v4054_v46 = vadd.f32 %v9527_v18, %v12003_v61  ;;  %v4048_v49 = vpop.f32.mrb[57].mxu0  ;;  %9560 = vmatmul.mubr.msk.f32.gmra.mrb[76].mxu0 %vm454_vm1, %v12037_v42  ;;  %v12049_v12 = vadd.f32 %v10536_v57, %v4134_v55 }
 0x3d2   : > { %v12045_v50 = vadd.f32 %v10535_v47, %v4133_v43  ;;  %v4049_v56 = vadd.f32 %v12003_v61, %v4048_v49  ;;  %v10546_v43 = vld [vmem:[%s10683_s23 + $0x88] sm:$0xff] }
 0x3d3   : > { %13449 = vst [vmem:[#allocation21_spill] sm:$0xff] %v12049_v12  ;;  %v4136_v21 = vmax.f32 %v4054_v46, 0.0 }
 0x3d4   : > { %13448 = vst [vmem:[#allocation22_spill] sm:$0xff] %v12045_v50  ;;  %v4135_v24 = vmax.f32 %v4049_v56, 0.0  ;;  %v9530_v52 = vpop.f32.mrb[58].mxu0  ;;  %9562 = vmatprep.mubr.msk.f32.mxu0 %vm454_vm1, %v12045_v50 }
 0x3d5   : > { %v4064_v40 = vadd.f32 %v9530_v52, %v12003_v61  ;;  %v4058_v8 = vpop.f32.mrb[59].mxu0  ;;  %9563 = vmatmul.mubr.msk.f32.gmra.mrb[78].mxu0 %vm454_vm1, %v12049_v12  ;;  %v12061_v60 = vadd.f32 %v10538_v41, %v4136_v21  ;;  %v10547_v21 = vld [vmem:[%s10683_s23 + $0x90] sm:$0xff] }
 0x3d6   : > { %v12057_v23 = vadd.f32 %v10537_v44, %v4135_v24  ;;  %v4059_v0 = vadd.f32 %v12003_v61, %v4058_v8 }
 0x3d7   : > { %13451 = vst [vmem:[#allocation25_spill] sm:$0xff] %v12061_v60  ;;  %v4138_v25 = vmax.f32 %v4064_v40, 0.0  ;;  %v10548_v40 = vld [vmem:[%s10683_s23 + $0x98] sm:$0xff] }
 0x3d8   : > { %13450 = vst [vmem:[#allocation26_spill] sm:$0xff] %v12057_v23  ;;  %v4137_v6 = vmax.f32 %v4059_v0, 0.0  ;;  %v9533_v10 = vpop.f32.mrb[60].mxu0  ;;  %9565 = vmatprep.mubr.msk.f32.mxu0 %vm454_vm1, %v12057_v23 }
 0x3d9   : > { %v4074_v33 = vadd.f32 %v9533_v10, %v12003_v61  ;;  %v4068_v59 = vpop.f32.mrb[61].mxu0  ;;  %9566 = vmatmul.mubr.msk.f32.gmra.mrb[80].mxu0 %vm454_vm1, %v12061_v60  ;;  %v12073_v28 = vadd.f32 %v10540_v1, %v4138_v25  ;;  %v10549_v10 = vld [vmem:[%s10683_s23 + $0xa0] sm:$0xff] }
 0x3da   : > { %v12069_v17 = vadd.f32 %v10539_v4, %v4137_v6  ;;  %v4069_v11 = vadd.f32 %v12003_v61, %v4068_v59  ;;  %v10550_v4 = vld [vmem:[%s10683_s23 + $0xa8] sm:$0xff] }
 0x3db   : > { %13453 = vst [vmem:[#allocation27_spill] sm:$0xff] %v12073_v28  ;;  %v4140_v53 = vmax.f32 %v4074_v33, 0.0 }
 0x3dc   : > { %13452 = vst [vmem:[#allocation28_spill] sm:$0xff] %v12069_v17  ;;  %v4139_v20 = vmax.f32 %v4069_v11, 0.0  ;;  %v9536_v32 = vpop.f32.mrb[62].mxu0  ;;  %9568 = vmatprep.mubr.msk.f32.mxu0 %vm454_vm1, %v12069_v17 }
 0x3dd   : > { %v4084_v62 = vadd.f32 %v9536_v32, %v12003_v61  ;;  %v4078_v34 = vpop.f32.mrb[63].mxu0  ;;  %9569 = vmatmul.mubr.msk.f32.gmra.mrb[82].mxu0 %vm454_vm1, %v12073_v28  ;;  %v12085_v36 = vadd.f32 %v10542_v7, %v4140_v53 }
 0x3de   : > { %v12081_v35 = vadd.f32 %v10541_v63, %v4139_v20  ;;  %v4079_v3 = vadd.f32 %v12003_v61, %v4078_v34  ;;  %v10551_v20 = vld [vmem:[%s10683_s23 + $0xb0] sm:$0xff]  ;;  %v4541_v63 = vpop.permute.xlu0 %4540 }
 0x3df   : > { %13455 = vst [vmem:[#allocation29_spill] sm:$0xff] %v12085_v36  ;;  %v4142_v19 = vmax.f32 %v4084_v62, 0.0  ;;  %v10552_v62 = vld [vmem:[%s10683_s23 + $0xb8] sm:$0xff] }
 0x3e0   : > { %13454 = vst [vmem:[#allocation30_spill] sm:$0xff] %v12081_v35  ;;  %v4141_v13 = vmax.f32 %v4079_v3, 0.0  ;;  %v9539_v58 = vpop.f32.mrb[64].mxu0  ;;  %9571 = vmatprep.mubr.msk.f32.mxu0 %vm454_vm1, %v12081_v35 }
 0x3e1   : > { %v4094_v16 = vadd.f32 %v9539_v58, %v12003_v61  ;;  %v4088_v54 = vpop.f32.mrb[65].mxu0  ;;  %9572 = vmatmul.mubr.msk.f32.gmra.mrb[84].mxu0 %vm454_vm1, %v12085_v36  ;;  %v12097_v26 = vadd.f32 %v10544_v14, %v4142_v19  ;;  %v12152_v58 = vld [vmem:[%s13239_s3 + $0x1] ss:$0 sm:$0xff] }
 0x3e2   : > { %v12093_v37 = vadd.f32 %v10543_v15, %v4141_v13  ;;  %v4089_v48 = vadd.f32 %v12003_v61, %v4088_v54  ;;  %v4545_v7 = vpop.permute.xlu0 %4544 }
 0x3e3   : > { %13457 = vst [vmem:[#allocation33_spill] sm:$0xff] %v12097_v26  ;;  %v4144_v30 = vmax.f32 %v4094_v16, 0.0 }
 0x3e4   : > { %13456 = vst [vmem:[#allocation34_spill] sm:$0xff] %v12093_v37  ;;  %v4143_v9 = vmax.f32 %v4089_v48, 0.0  ;;  %v9542_v27 = vpop.f32.mrb[66].mxu0  ;;  %9574 = vmatprep.mubr.msk.f32.mxu0 %vm454_vm1, %v12093_v37 }
 0x3e5   : > { %v4104_v29 = vadd.f32 %v9542_v27, %v12003_v61  ;;  %v4098_v31 = vpop.f32.mrb[67].mxu0  ;;  %9575 = vmatmul.mubr.msk.f32.gmra.mrb[86].mxu0 %vm454_vm1, %v12097_v26  ;;  %v12109_v18 = vadd.f32 %v10546_v43, %v4144_v30 }
 0x3e6   : > { %v12105_v51 = vadd.f32 %v10545_v39, %v4143_v9  ;;  %v4099_v55 = vadd.f32 %v12003_v61, %v4098_v31  ;;  %v4549_v13 = vpop.permute.xlu0 %4548  ;;  %v13466_v31 = vld [vmem:[#allocation6_spill] sm:$0xff] }
 0x3e7   : > { %13459 = vst [vmem:[#allocation35_spill] sm:$0xff] %v12109_v18  ;;  %v4146_v46 = vmax.f32 %v4104_v29, 0.0 }
 0x3e8   : > { %13458 = vst [vmem:[#allocation36_spill] sm:$0xff] %v12105_v51  ;;  %v4145_v49 = vmax.f32 %v4099_v55, 0.0  ;;  %v9545_v47 = vpop.f32.mrb[68].mxu0  ;;  %9577 = vmatprep.mubr.msk.f32.mxu0 %vm454_vm1, %v12105_v51 }
 0x3e9   : > { %v4114_v56 = vadd.f32 %v9545_v47, %v12003_v61  ;;  %v4108_v57 = vpop.f32.mrb[69].mxu0  ;;  %9578 = vmatmul.mubr.msk.f32.gmra.mrb[88].mxu0 %vm454_vm1, %v12109_v18  ;;  %v12121_v8 = vadd.f32 %v10548_v40, %v4146_v46  ;;  %v13468_v46 = vld [vmem:[#allocation4_spill] sm:$0xff] }
 0x3ea   : > { %v12117_v24 = vadd.f32 %v10547_v21, %v4145_v49  ;;  %v4109_v52 = vadd.f32 %v12003_v61, %v4108_v57  ;;  %v4553_v14 = vpop.permute.xlu0 %4552 }
 0x3eb   : > { %13461 = vst [vmem:[#allocation37_spill] sm:$0xff] %v12121_v8  ;;  %v4148_v44 = vmax.f32 %v4114_v56, 0.0 }
 0x3ec   : > { %13460 = vst [vmem:[#allocation38_spill] sm:$0xff] %v12117_v24  ;;  %v4147_v0 = vmax.f32 %v4109_v52, 0.0  ;;  %v9548_v41 = vpop.f32.mrb[70].mxu0  ;;  %9580 = vmatprep.mubr.msk.f32.mxu0 %vm454_vm1, %v12117_v24 }
 0x3ed   : > { %v4124_v25 = vadd.f32 %v9548_v41, %v12003_v61  ;;  %v4118_v6 = vpop.f32.mrb[71].mxu0  ;;  %9581 = vmatmul.mubr.msk.f32.gmra.mrb[90].mxu0 %vm454_vm1, %v12121_v8  ;;  %v12133_v11 = vadd.f32 %v10550_v4, %v4148_v44  ;;  %v13470_v41 = vld [vmem:[#allocation5_spill] sm:$0xff] }
 0x3ee   : > { %v12129_v33 = vadd.f32 %v10549_v10, %v4147_v0  ;;  %v4119_v59 = vadd.f32 %v12003_v61, %v4118_v6  ;;  %v4543_v61 = vpop.permute.xlu1 %4542  ;;  %v4557_v52 = vpop.permute.xlu0 %4556 }
 0x3ef   : > { %13463 = vst [vmem:[#allocation41_spill] sm:$0xff] %v12133_v11  ;;  %v4150_v1 = vmax.f32 %v4124_v25, 0.0 }
 0x3f0   : > { %13462 = vst [vmem:[#allocation42_spill] sm:$0xff] %v12129_v33  ;;  %v4149_v53 = vmax.f32 %v4119_v59, 0.0  ;;  %9583 = vmatprep.mubr.msk.f32.mxu0 %vm454_vm1, %v12129_v33  ;;  %v13472_v59 = vld [vmem:[#allocation3_spill] sm:$0xff] }
 0x3f1   : > { %9584 = vmatmul.mubr.msk.f32.gmra.mrb[92].mxu0 %vm454_vm1, %v12133_v11  ;;  %v12143_v34 = vadd.f32 %v10552_v62, %v4150_v1 }
 0x3f2   : > { %v12140_v32 = vadd.f32 %v10551_v20, %v4149_v53  ;;  %v4547_v3 = vpop.permute.xlu1 %4546 }
 0x3f3   : > { %13465 = vst [vmem:[#allocation43_spill] sm:$0xff] %v12143_v34 }
 0x3f4   : > { %13464 = vst [vmem:[#allocation44_spill] sm:$0xff] %v12140_v32  ;;  %9586 = vmatprep.mubr.msk.f32.mxu0 %vm454_vm1, %v12140_v32 }
 0x3f5   : > { %9587 = vmatmul.mubr.msk.f32.gmra.mrb[94].mxu0 %vm454_vm1, %v12143_v34 }
 0x3f6   : > { %v4551_v19 = vpop.permute.xlu1 %4550 }
 0x3fa   : > { %v4555_v54 = vpop.permute.xlu1 %4554 }
 0x3fe   : > { %v4559_v56 = vpop.permute.xlu1 %4558 }
 0x49c   : > { %v9555_v16 = vpop.f32.mrb[72].mxu0 }
 0x49d   : > { %v4330_v15 = vadd.f32 %v9555_v16, %v12152_v58  ;;  %v4324_v48 = vpop.f32.mrb[73].mxu0  ;;  %v4563_v16 = vpop.permute.xlu1 %4562 }
 0x49e   : > { %v4325_v30 = vadd.f32 %v12152_v58, %v4324_v48 }
 0x49f   : > { %v4444_v9 = vmax.f32 %v4330_v15, 0.0  ;;  %v13474_v15 = vld [vmem:[#allocation7_spill] sm:$0xff] }
 0x4a0   : > { %v4443_v27 = vmax.f32 %v4325_v30, 0.0  ;;  %v9558_v29 = vpop.f32.mrb[74].mxu0 }
 0x4a1   : > { %v12157_v39 = vmul.f32 %v4444_v9, %v13466_v31  ;;  %v4340_v55 = vadd.f32 %v9558_v29, %v12152_v58  ;;  %v4334_v43 = vpop.f32.mrb[75].mxu0  ;;  %v13476_v29 = vld [vmem:[#allocation8_spill] sm:$0xff] }
 0x4a2   : > { %v12161_v49 = vmul.f32 %v4443_v27, %v13468_v46  ;;  %v4335_v47 = vadd.f32 %v12152_v58, %v4334_v43  ;;  %v4561_v27 = vpop.permute.xlu0 %4560 }
 0x4a3   : > { %13467 = vst [vmem:[#allocation46_spill] sm:$0xff] %v12157_v39  ;;  %v4446_v57 = vmax.f32 %v4340_v55, 0.0  ;;  %v4613_v21 = vsel %vm454_vm1, %v12157_v39, %v4543_v61 }
 0x4a4   : > { %13469 = vst [vmem:[#allocation45_spill] sm:$0xff] %v12161_v49  ;;  %v4445_v40 = vmax.f32 %v4335_v47, 0.0  ;;  %4637 = vst.msk [vmem:[#allocation2 + $0x110] sm:$0xff] %vm1024_vm2, %v4613_v21  ;;  %v4612_v44 = vsel %vm454_vm1, %v12161_v49, %v4541_v63  ;;  %v9561_v0 = vpop.f32.mrb[76].mxu0 }
 0x4a5   : > { %v12170_v25 = vmul.f32 %v4446_v57, %v13470_v41  ;;  %4636 = vst.msk [vmem:[#allocation2 + $0x108] sm:$0xff] %vm1024_vm2, %v4612_v44  ;;  %v4350_v6 = vadd.f32 %v9561_v0, %v12152_v58  ;;  %v4344_v10 = vpop.f32.mrb[77].mxu0  ;;  %v13478_v57 = vld [vmem:[#allocation9_spill] sm:$0xff]  ;;  %v13480_v0 = vld [vmem:[#allocation10_spill] sm:$0xff] }
 0x4a6   : > { %v12175_v4 = vmul.f32 %v4445_v40, %v13472_v59  ;;  %v4345_v1 = vadd.f32 %v12152_v58, %v4344_v10 }
 0x4a7   : > { %13471 = vst [vmem:[#allocation48_spill] sm:$0xff] %v12170_v25  ;;  %v4448_v53 = vmax.f32 %v4350_v6, 0.0  ;;  %v4615_v20 = vsel %vm454_vm1, %v12170_v25, %v4547_v3  ;;  %v4567_v6 = vpop.permute.xlu1 %4566 }
 0x4a8   : > { %13473 = vst [vmem:[#allocation47_spill] sm:$0xff] %v12175_v4  ;;  %v4447_v62 = vmax.f32 %v4345_v1, 0.0  ;;  %4639 = vst.msk [vmem:[#allocation2 + $0x120] sm:$0xff] %vm1024_vm2, %v4615_v20  ;;  %v4614_v61 = vsel %vm454_vm1, %v12175_v4, %v4545_v7  ;;  %v9564_v63 = vpop.f32.mrb[78].mxu0 }
 0x4a9   : > { %v12184_v48 = vmul.f32 %v4448_v53, %v13474_v15  ;;  %4638 = vst.msk [vmem:[#allocation2 + $0x118] sm:$0xff] %vm1024_vm2, %v4614_v61  ;;  %v4360_v30 = vadd.f32 %v9564_v63, %v12152_v58  ;;  %v4354_v9 = vpop.f32.mrb[79].mxu0 }
 0x4aa   : > { %v12189_v31 = vmul.f32 %v4447_v62, %v13476_v29  ;;  %v4355_v3 = vadd.f32 %v12152_v58, %v4354_v9  ;;  %v13482_v62 = vld [vmem:[#allocation11_spill] sm:$0xff] }
 0x4ab   : > { %13475 = vst [vmem:[#allocation50_spill] sm:$0xff] %v12184_v48  ;;  %v4450_v55 = vmax.f32 %v4360_v30, 0.0  ;;  %v4617_v7 = vsel %vm454_vm1, %v12184_v48, %v4551_v19  ;;  %v13484_v30 = vld [vmem:[#allocation12_spill] sm:$0xff] }
 0x4ac   : > { %13477 = vst [vmem:[#allocation49_spill] sm:$0xff] %v12189_v31  ;;  %v4449_v43 = vmax.f32 %v4355_v3, 0.0  ;;  %4641 = vst.msk [vmem:[#allocation2 + $0x130] sm:$0xff] %vm1024_vm2, %v4617_v7  ;;  %v4616_v46 = vsel %vm454_vm1, %v12189_v31, %v4549_v13  ;;  %v9567_v47 = vpop.f32.mrb[80].mxu0  ;;  %v4565_v13 = vpop.permute.xlu0 %4564 }
 0x4ad   : > { %v12198_v21 = vmul.f32 %v4450_v55, %v13478_v57  ;;  %4640 = vst.msk [vmem:[#allocation2 + $0x128] sm:$0xff] %vm1024_vm2, %v4616_v46  ;;  %v4370_v40 = vadd.f32 %v9567_v47, %v12152_v58  ;;  %v4364_v44 = vpop.f32.mrb[81].mxu0  ;;  %v13486_v46 = vld [vmem:[#allocation13_spill] sm:$0xff] }
 0x4ae   : > { %v12203_v41 = vmul.f32 %v4449_v43, %v13480_v0  ;;  %v4365_v19 = vadd.f32 %v12152_v58, %v4364_v44  ;;  %v4571_v43 = vpop.permute.xlu1 %4570  ;;  %v13488_v0 = vld [vmem:[#allocation14_spill] sm:$0xff] }
 0x4af   : > { %13479 = vst [vmem:[#allocation6_spill] sm:$0xff] %v12198_v21  ;;  %v4452_v10 = vmax.f32 %v4370_v40, 0.0  ;;  %v4619_v59 = vsel %vm454_vm1, %v12198_v21, %v4555_v54 }
 0x4b0   : > { %13481 = vst [vmem:[#allocation4_spill] sm:$0xff] %v12203_v41  ;;  %v4451_v1 = vmax.f32 %v4365_v19, 0.0  ;;  %4643 = vst.msk [vmem:[#allocation2 + $0x140] sm:$0xff] %vm1024_vm2, %v4619_v59  ;;  %v4618_v53 = vsel %vm454_vm1, %v12203_v41, %v4553_v14  ;;  %v9570_v20 = vpop.f32.mrb[82].mxu0  ;;  %v4569_v44 = vpop.permute.xlu0 %4568 }
 0x4b1   : > { %v12212_v61 = vmul.f32 %v4452_v10, %v13482_v62  ;;  %4642 = vst.msk [vmem:[#allocation2 + $0x138] sm:$0xff] %vm1024_vm2, %v4618_v53  ;;  %v4380_v63 = vadd.f32 %v9570_v20, %v12152_v58  ;;  %v4374_v15 = vpop.f32.mrb[83].mxu0  ;;  %v13490_v20 = vld [vmem:[#allocation15_spill] sm:$0xff] }
 0x4b2   : > { %v12217_v9 = vmul.f32 %v4451_v1, %v13484_v30  ;;  %v4375_v54 = vadd.f32 %v12152_v58, %v4374_v15  ;;  %v13492_v30 = vld [vmem:[#allocation16_spill] sm:$0xff] }
 0x4b3   : > { %13483 = vst [vmem:[#allocation5_spill] sm:$0xff] %v12212_v61  ;;  %v4454_v29 = vmax.f32 %v4380_v63, 0.0  ;;  %v4621_v3 = vsel %vm454_vm1, %v12212_v61, %v4559_v56 }
 0x4b4   : > { %13485 = vst [vmem:[#allocation3_spill] sm:$0xff] %v12217_v9  ;;  %v4453_v55 = vmax.f32 %v4375_v54, 0.0  ;;  %4645 = vst.msk [vmem:[#allocation2 + $0x150] sm:$0xff] %vm1024_vm2, %v4621_v3  ;;  %v4620_v14 = vsel %vm454_vm1, %v12217_v9, %v4557_v52  ;;  %v9573_v7 = vpop.f32.mrb[84].mxu0 }
 0x4b5   : > { %v12226_v47 = vmul.f32 %v4454_v29, %v13486_v46  ;;  %4644 = vst.msk [vmem:[#allocation2 + $0x148] sm:$0xff] %vm1024_vm2, %v4620_v14  ;;  %v4390_v57 = vadd.f32 %v9573_v7, %v12152_v58  ;;  %v4384_v40 = vpop.f32.mrb[85].mxu0  ;;  %v4575_v29 = vpop.permute.xlu1 %4574 }
 0x4b6   : > { %v12231_v19 = vmul.f32 %v4453_v55, %v13488_v0  ;;  %v4385_v56 = vadd.f32 %v12152_v58, %v4384_v40 }
 0x4b7   : > { %13487 = vst [vmem:[#allocation7_spill] sm:$0xff] %v12226_v47  ;;  %v4456_v10 = vmax.f32 %v4390_v57, 0.0  ;;  %v4623_v52 = vsel %vm454_vm1, %v12226_v47, %v4563_v16  ;;  %v13494_v57 = vld [vmem:[#allocation17_spill] sm:$0xff] }
 0x4b8   : > { %13489 = vst [vmem:[#allocation8_spill] sm:$0xff] %v12231_v19  ;;  %v4455_v59 = vmax.f32 %v4385_v56, 0.0  ;;  %4647 = vst.msk [vmem:[#allocation2 + $0x160] sm:$0xff] %vm1024_vm2, %v4623_v52  ;;  %v4622_v1 = vsel %vm454_vm1, %v12231_v19, %v4561_v27  ;;  %v9576_v53 = vpop.f32.mrb[86].mxu0  ;;  %v4573_v27 = vpop.permute.xlu0 %4572 }
 0x4b9   : > { %v12240_v62 = vmul.f32 %v4456_v10, %v13490_v20  ;;  %4646 = vst.msk [vmem:[#allocation2 + $0x158] sm:$0xff] %vm1024_vm2, %v4622_v1  ;;  %v4400_v63 = vadd.f32 %v9576_v53, %v12152_v58  ;;  %v4394_v15 = vpop.f32.mrb[87].mxu0  ;;  %v13496_v10 = vld [vmem:[#allocation18_spill] sm:$0xff] }
 0x4ba   : > { %v12245_v54 = vmul.f32 %v4455_v59, %v13492_v30  ;;  %v4395_v16 = vadd.f32 %v12152_v58, %v4394_v15  ;;  %v13498_v15 = vld [vmem:[#allocation19_spill] sm:$0xff] }
 0x4bb   : > { %13491 = vst [vmem:[#allocation9_spill] sm:$0xff] %v12240_v62  ;;  %v4458_v3 = vmax.f32 %v4400_v63, 0.0  ;;  %v4625_v55 = vsel %vm454_vm1, %v12240_v62, %v4567_v6  ;;  %v4579_v63 = vpop.permute.xlu1 %4578 }
 0x4bc   : > { %13493 = vst [vmem:[#allocation10_spill] sm:$0xff] %v12245_v54  ;;  %v4457_v14 = vmax.f32 %v4395_v16, 0.0  ;;  %4649 = vst.msk [vmem:[#allocation2 + $0x170] sm:$0xff] %vm1024_vm2, %v4625_v55  ;;  %v4624_v7 = vsel %vm454_vm1, %v12245_v54, %v4565_v13  ;;  %v9579_v46 = vpop.f32.mrb[88].mxu0  ;;  %v4577_v55 = vpop.permute.xlu0 %4576 }
 0x4bd   : > { %v12254_v40 = vmul.f32 %v4458_v3, %v13494_v57  ;;  %4648 = vst.msk [vmem:[#allocation2 + $0x168] sm:$0xff] %vm1024_vm2, %v4624_v7  ;;  %v4410_v0 = vadd.f32 %v9579_v46, %v12152_v58  ;;  %v4404_v56 = vpop.f32.mrb[89].mxu0 }
 0x4be   : > { %v12259_v52 = vmul.f32 %v4457_v14, %v13496_v10  ;;  %v4405_v6 = vadd.f32 %v12152_v58, %v4404_v56  ;;  %v13500_v14 = vld [vmem:[#allocation20_spill] sm:$0xff]  ;;  %v13502_v10 = vld [vmem:[#allocation23_spill] sm:$0xff] }
 0x4bf   : > { %13495 = vst [vmem:[#allocation11_spill] sm:$0xff] %v12254_v40  ;;  %v4460_v59 = vmax.f32 %v4410_v0, 0.0  ;;  %v4627_v1 = vsel %vm454_vm1, %v12254_v40, %v4571_v43 }
 0x4c0   : > { %13497 = vst [vmem:[#allocation12_spill] sm:$0xff] %v12259_v52  ;;  %v4459_v53 = vmax.f32 %v4405_v6, 0.0  ;;  %4651 = vst.msk [vmem:[#allocation2 + $0x180] sm:$0xff] %vm1024_vm2, %v4627_v1  ;;  %v4626_v13 = vsel %vm454_vm1, %v12259_v52, %v4569_v44  ;;  %v9582_v20 = vpop.f32.mrb[90].mxu0 }
 0x4c1   : > { %v12268_v30 = vmul.f32 %v4460_v59, %v13498_v15  ;;  %4650 = vst.msk [vmem:[#allocation2 + $0x178] sm:$0xff] %vm1024_vm2, %v4626_v13  ;;  %v4420_v16 = vadd.f32 %v9582_v20, %v12152_v58  ;;  %v4414_v3 = vpop.f32.mrb[91].mxu0  ;;  %v4583_v20 = vpop.permute.xlu1 %4582 }
 0x4c2   : > { %v12273_v7 = vmul.f32 %v4459_v53, %v13500_v14  ;;  %v4415_v43 = vadd.f32 %v12152_v58, %v4414_v3  ;;  %v13504_v53 = vld [vmem:[#allocation24_spill] sm:$0xff] }
 0x4c3   : > { %13499 = vst [vmem:[#allocation13_spill] sm:$0xff] %v12268_v30  ;;  %v4462_v46 = vmax.f32 %v4420_v16, 0.0  ;;  %v4629_v44 = vsel %vm454_vm1, %v12268_v30, %v4575_v29 }
 0x4c4   : > { %13501 = vst [vmem:[#allocation14_spill] sm:$0xff] %v12273_v7  ;;  %v4461_v57 = vmax.f32 %v4415_v43, 0.0  ;;  %4653 = vst.msk [vmem:[#allocation2 + $0x190] sm:$0xff] %vm1024_vm2, %v4629_v44  ;;  %v4628_v0 = vsel %vm454_vm1, %v12273_v7, %v4573_v27  ;;  %v9585_v56 = vpop.f32.mrb[92].mxu0  ;;  %v4581_v27 = vpop.permute.xlu0 %4580 }
 0x4c5   : > { %v12282_v6 = vmul.f32 %v4462_v46, %v13502_v10  ;;  %4652 = vst.msk [vmem:[#allocation2 + $0x188] sm:$0xff] %vm1024_vm2, %v4628_v0  ;;  %v4430_v59 = vadd.f32 %v9585_v56, %v12152_v58  ;;  %v4424_v1 = vpop.f32.mrb[93].mxu0  ;;  %v13506_v46 = vld [vmem:[#allocation31_spill] sm:$0xff]  ;;  %v13508_v56 = vld [vmem:[#allocation32_spill] sm:$0xff] }
 0x4c6   : > { %v12287_v13 = vmul.f32 %v4461_v57, %v13504_v53  ;;  %v4425_v29 = vadd.f32 %v12152_v58, %v4424_v1 }
 0x4c7   : > { %13503 = vst [vmem:[#allocation15_spill] sm:$0xff] %v12282_v6  ;;  %v4464_v15 = vmax.f32 %v4430_v59, 0.0  ;;  %v4631_v16 = vsel %vm454_vm1, %v12282_v6, %v4579_v63 }
 0x4c8   : > { %13505 = vst [vmem:[#allocation16_spill] sm:$0xff] %v12287_v13  ;;  %v4463_v3 = vmax.f32 %v4425_v29, 0.0  ;;  %4655 = vst.msk [vmem:[#allocation2 + $0x1a0] sm:$0xff] %vm1024_vm2, %v4631_v16  ;;  %v4630_v14 = vsel %vm454_vm1, %v12287_v13, %v4577_v55  ;;  %v9588_v43 = vpop.f32.mrb[94].mxu0  ;;  %v4587_v29 = vpop.permute.xlu1 %4586 }
 0x4c9   : > { %v12296_v44 = vmul.f32 %v4464_v15, %v13506_v46  ;;  %4654 = vst.msk [vmem:[#allocation2 + $0x198] sm:$0xff] %vm1024_vm2, %v4630_v14  ;;  %v4440_v57 = vadd.f32 %v9588_v43, %v12152_v58  ;;  %v4434_v0 = vpop.f32.mrb[95].mxu0  ;;  %v13510_v15 = vld [vmem:[#allocation39_spill] sm:$0xff]  ;;  %v13512_v14 = vld [vmem:[#allocation40_spill] sm:$0xff] }
 0x4ca   : > { %v12301_v10 = vmul.f32 %v4463_v3, %v13508_v56  ;;  %v4435_v63 = vadd.f32 %v12152_v58, %v4434_v0  ;;  %v4585_v3 = vpop.permute.xlu0 %4584 }
 0x4cb   : > { %13507 = vst [vmem:[#allocation17_spill] sm:$0xff] %v12296_v44  ;;  %v4466_v59 = vmax.f32 %v4440_v57, 0.0  ;;  %v4633_v1 = vsel %vm454_vm1, %v12296_v44, %v4583_v20  ;;  %4663 = sbr.rel (%p8220_p8) target bundleno = 1921 (0x781), region = 60 }
 0x4cc   : > { %13509 = vst [vmem:[#allocation18_spill] sm:$0xff] %v12301_v10  ;;  %v4465_v53 = vmax.f32 %v4435_v63, 0.0  ;;  %4657 = vst.msk [vmem:[#allocation2 + $0x1b0] sm:$0xff] %vm1024_vm2, %v4633_v1  ;;  %v4632_v55 = vsel %vm454_vm1, %v12301_v10, %v4581_v27 }
 0x4cd   : > { %v12310_v16 = vmul.f32 %v4466_v59, %v13510_v15  ;;  %4656 = vst.msk [vmem:[#allocation2 + $0x1a8] sm:$0xff] %vm1024_vm2, %v4632_v55 }
 0x4ce   : > { %v12314_v43 = vmul.f32 %v4465_v53, %v13512_v14 }
 0x4cf   : > { %13511 = vst [vmem:[#allocation19_spill] sm:$0xff] %v12310_v16  ;;  %v4635_v58 = vsel %vm454_vm1, %v12310_v16, %v4587_v29 }
 0x4d0   : > { %13513 = vst [vmem:[#allocation20_spill] sm:$0xff] %v12314_v43  ;;  %4659 = vst.msk [vmem:[#allocation2 + $0x1c0] sm:$0xff] %vm1024_vm2, %v4635_v58  ;;  %v4634_v20 = vsel %vm454_vm1, %v12314_v43, %v4585_v3 }
 0x4d1   : > { %4658 = vst.msk [vmem:[#allocation2 + $0x1b8] sm:$0xff] %vm1024_vm2, %v4634_v20 }
 0x4d2   : > { %v8224_v27 = vld [vmem:[%s13240_s4 + $0xf0] sm:$0xff]  ;;  %v8225_v46 = vld [vmem:[%s13240_s4 + $0xf8] sm:$0xff]  ;;  %v8330_v56 = vld [vmem:[%s13240_s4 + $0x140] sm:$0xff] }
 0x4d3   : > { %v8329_v57 = vld [vmem:[%s13240_s4 + $0x138] sm:$0xff]  ;;  %v10057_v0 = vpack.c.bf16 %v8225_v46, %v8224_v27  ;;  %v8226_v59 = vld [vmem:[%s13240_s4 + $0x100] sm:$0xff]  ;;  %v8331_v1 = vld [vmem:[%s13240_s4 + $0x148] sm:$0xff] }
 0x4d4   : > { %v10073_v63 = vpack.c.bf16 %v8330_v56, %v8329_v57  ;;  %v4692_v53 = vld [vmem:[#allocation2 + $0xf8] sm:$0xff]  ;;  %v5852_v55 = vld [vmem:[#allocation2 + $0x108] sm:$0xff]  ;;  %v8356_v29 = vld [vmem:[%s13240_s4 + $0x150] sm:$0xff] }
 0x4d5   : > { %10058 = vmatprep.subr.bf16.mxu1 %v10057_v0  ;;  %9595 = vmatprep.mubr.msk.f32.mxu1 %vm1024_vm2, %v4692_v53  ;;  %v8357_v15 = vld [vmem:[%s13240_s4 + $0x158] sm:$0xff]  ;;  %v4693_v3 = vld [vmem:[#allocation2 + $0x100] sm:$0xff]  ;;  %v5853_v58 = vld [vmem:[#allocation2 + $0x110] sm:$0xff] }
 0x4d6   : > { %10074 = vmatprep.subr.bf16.mxu0 %v10073_v63  ;;  %10060 = vmatpush3.bf16.msra.mxu1 %v10057_v0  ;;  %v10077_v14 = vpack.c.bf16 %v8357_v15, %v8356_v29  ;;  %v12350_v20 = vld [vmem:[#allocation2 + $0x118] sm:$0xff]  ;;  %v8358_v27 = vld [vmem:[%s13240_s4 + $0x160] sm:$0xff]  ;;  %v12367_v56 = vld [vmem:[#allocation2 + $0x128] sm:$0xff] }
 0x4d7   : > { %10076 = vmatpush3.bf16.msra.mxu0 %v10073_v63  ;;  %9593 = vmatprep.subr.mxu1 %v8226_v59  ;;  %v12357_v46 = vld [vmem:[#allocation2 + $0x120] sm:$0xff]  ;;  %v8221_v57 = vld [vmem:[%s13240_s4 + $0xd8] sm:$0xff]  ;;  %v12382_v53 = vld [vmem:[#allocation2 + $0x130] sm:$0xff] }
 0x4d8   : > { %9761 = vmatprep.subr.mxu0 %v8331_v1  ;;  %9763 = vmatprep.mubr.msk.f32.mxu0 %vm1024_vm2, %v5852_v55  ;;  %v8222_v0 = vld [vmem:[%s13240_s4 + $0xe0] sm:$0xff]  ;;  %v12386_v29 = vld [vmem:[#allocation2 + $0x138] sm:$0xff]  ;;  %v8223_v15 = vld [vmem:[%s13240_s4 + $0xe8] sm:$0xff] }
 0x4d9   : > { %v10061_v63 = vpack.c.bf16 %v8222_v0, %v8221_v57  ;;  %v12424_v57 = vld [vmem:[#allocation2 + $0x160] sm:$0xff]  ;;  %v12426_v0 = vld [vmem:[#allocation2 + $0x168] sm:$0xff]  ;;  %v12444_v32 = vld [vmem:[#allocation2 + $0x178] sm:$0xff] }
 0x4da   : > { %9594 = vmatpush3.msra.mxu1 %v8226_v59  ;;  %v8383_v59 = vld [vmem:[%s13240_s4 + $0x168] sm:$0xff]  ;;  %v12466_v34 = vld [vmem:[#allocation2 + $0x190] sm:$0xff]  ;;  %v12468_v33 = vld [vmem:[#allocation2 + $0x198] sm:$0xff] }
 0x4db   : > { %9762 = vmatpush3.msra.mxu0 %v8331_v1  ;;  %9596 = vmatmul.mubr.msk.f32.vlgmr.msra.gmra.mrb[0].mxu1 %vm1024_vm2, %v4693_v3  ;;  %v8384_v1 = vld [vmem:[%s13240_s4 + $0x170] sm:$0xff]  ;;  %v12400_v3 = vld [vmem:[#allocation2 + $0x140] sm:$0xff]  ;;  %13516 = vst [vmem:[#allocation59_spill] sm:$0xff] %v12466_v34  ;;  %13517 = vst [vmem:[#allocation60_spill] sm:$0xff] %v12468_v33 }
 0x4dc   : > { %9764 = vmatmul.mubr.msk.f32.vlgmr.msra.gmra.mrb[0].mxu0 %vm1024_vm2, %v5853_v58  ;;  %10078 = vmatprep.subr.bf16.mxu0 %v10077_v14  ;;  %v12478_v11 = vld [vmem:[#allocation2 + $0x1a0] sm:$0xff]  ;;  %v12480_v24 = vld [vmem:[#allocation2 + $0x1a8] sm:$0xff]  ;;  %v12490_v8 = vld [vmem:[#allocation2 + $0x1b0] sm:$0xff] }
 0x4dd   : > { %10080 = vmatpush3.bf16.msra.mxu0 %v10077_v14  ;;  %9598 = vmatprep.mubr.msk.f32.mxu1 %vm1024_vm2, %v5852_v55  ;;  %v12384_v55 = vpack.c.bf16 %v8384_v1, %v8383_v59  ;;  %v12402_v14 = vld [vmem:[#allocation2 + $0x148] sm:$0xff]  ;;  %v8276_v59 = vld [vmem:[%s13240_s4 + $0x110] sm:$0xff]  ;;  %13518 = vst [vmem:[#allocation61_spill] sm:$0xff] %v12478_v11  ;;  %13519 = vst [vmem:[#allocation62_spill] sm:$0xff] %v12480_v24 }
 0x4de   : > { %9766 = vmatprep.mubr.msk.f32.mxu0 %vm1024_vm2, %v12350_v20  ;;  %9803 = vmatprep.subr.mxu0 %v8358_v27  ;;  %13520 = vst [vmem:[#allocation63_spill] sm:$0xff] %v12490_v8  ;;  %v12492_v51 = vld [vmem:[#allocation2 + $0x1b8] sm:$0xff]  ;;  %v12502_v18 = vld [vmem:[#allocation2 + $0x1c0] sm:$0xff]  ;;  %v12504_v26 = vld [vmem:[#allocation2 + $0x109] sm:$0xff] }
 0x4df   : > { %9599 = vmatmul.mubr.msk.f32.gmra.mrb[2].mxu1 %vm1024_vm2, %v5853_v58  ;;  %10062 = vmatprep.subr.bf16.mxu1 %v10061_v63  ;;  %v12412_v58 = vld [vmem:[#allocation2 + $0x150] sm:$0xff]  ;;  %13521 = vst [vmem:[#allocation64_spill] sm:$0xff] %v12492_v51  ;;  %13522 = vst [vmem:[#allocation65_spill] sm:$0xff] %v12502_v18  ;;  %v4665_v35 = vld [vmem:[#allocation2 + $0xff] sm:$0xff] }
 0x4e0   : > { %9767 = vmatmul.mubr.msk.f32.gmra.mrb[2].mxu0 %vm1024_vm2, %v12357_v46  ;;  %9601 = vmatprep.mubr.msk.f32.mxu1 %vm1024_vm2, %v12350_v20  ;;  %v4664_v37 = vld [vmem:[#allocation2 + $0xf7] sm:$0xff]  ;;  %v12515_v17 = vld [vmem:[#allocation2 + $0x107] sm:$0xff]  ;;  %v12519_v23 = vld [vmem:[#allocation2 + $0x10f] sm:$0xff] }
 0x4e1   : > { %9769 = vmatprep.mubr.msk.f32.mxu0 %vm1024_vm2, %v12367_v56  ;;  %9804 = vmatpush3.msra.mxu0 %v8358_v27  ;;  %v12414_v27 = vld [vmem:[#allocation2 + $0x158] sm:$0xff]  ;;  %v8411_v50 = vld [vmem:[%s13240_s4 + $0x188] sm:$0xff]  ;;  %v8302_v12 = vld [vmem:[%s13240_s4 + $0x120] sm:$0xff] }
 0x4e2   : > { %10082 = vmatprep.subr.bf16.mxu0 %v12384_v55  ;;  %10064 = vmatpush3.bf16.msra.mxu1 %v10061_v63  ;;  %v8275_v63 = vld [vmem:[%s13240_s4 + $0x108] sm:$0xff]  ;;  %v12513_v36 = vld [vmem:[#allocation2 + $0x111] sm:$0xff]  ;;  %v12517_v28 = vld [vmem:[#allocation2 + $0x119] sm:$0xff] }
 0x4e3   : > { %9602 = vmatmul.mubr.msk.f32.gmra.mrb[4].mxu1 %vm1024_vm2, %v12357_v46  ;;  %9635 = vmatprep.subr.mxu1 %v8223_v15  ;;  %v10065_v1 = vpack.c.bf16 %v8276_v59, %v8275_v63  ;;  %v12454_v63 = vld [vmem:[#allocation2 + $0x180] sm:$0xff]  ;;  %v12456_v59 = vld [vmem:[#allocation2 + $0x188] sm:$0xff]  ;;  %v8385_v60 = vld [vmem:[%s13240_s4 + $0x178] sm:$0xff] }
 0x4e4   : > { %9770 = vmatmul.mubr.msk.f32.gmra.mrb[4].mxu0 %vm1024_vm2, %v12382_v53  ;;  %9604 = vmatprep.mubr.msk.f32.mxu1 %vm1024_vm2, %v12367_v56  ;;  %13514 = vst [vmem:[#allocation57_spill] sm:$0xff] %v12454_v63  ;;  %13515 = vst [vmem:[#allocation58_spill] sm:$0xff] %v12456_v59  ;;  %v8303_v38 = vld [vmem:[%s13240_s4 + $0x128] sm:$0xff]  ;;  %v12549_v22 = vld [vmem:[#allocation2 + $0x117] sm:$0xff] }
 0x4e5   : > { %9772 = vmatprep.mubr.msk.f32.mxu0 %vm1024_vm2, %v12386_v29  ;;  %v12547_v42 = vld [vmem:[#allocation2 + $0x121] sm:$0xff]  ;;  %v12551_v2 = vld [vmem:[#allocation2 + $0x129] sm:$0xff]  ;;  %v12557_v5 = vpack.c.bf16 %v8303_v38, %v8302_v12  ;;  %v12601_v43 = vld [vmem:[#allocation2 + $0x151] sm:$0xff] }
 0x4e6   : > { %9636 = vmatpush3.msra.mxu1 %v8223_v15  ;;  %v12442_v15 = vld [vmem:[#allocation2 + $0x170] sm:$0xff]  ;;  %v12585_v12 = vld [vmem:[#allocation2 + $0x141] sm:$0xff]  ;;  %v12605_v10 = vld [vmem:[#allocation2 + $0x159] sm:$0xff] }
 0x4e7   : > { %9605 = vmatmul.mubr.msk.f32.gmra.mrb[6].mxu1 %vm1024_vm2, %v12382_v53  ;;  %10066 = vmatprep.subr.bf16.mxu1 %v10065_v1  ;;  %v12581_v38 = vld [vmem:[#allocation2 + $0x12f] sm:$0xff]  ;;  %v12597_v16 = vld [vmem:[#allocation2 + $0x13f] sm:$0xff]  ;;  %v12603_v44 = vld [vmem:[#allocation2 + $0x147] sm:$0xff] }
 0x4e8   : > { %9773 = vmatmul.mubr.msk.f32.gmra.mrb[6].mxu0 %vm1024_vm2, %v12400_v3  ;;  %9607 = vmatprep.mubr.msk.f32.mxu1 %vm1024_vm2, %v12386_v29  ;;  %v12613_v6 = vld [vmem:[#allocation2 + $0x14f] sm:$0xff]  ;;  %v12617_v13 = vld [vmem:[#allocation2 + $0x161] sm:$0xff]  ;;  %v12619_v30 = vld [vmem:[#allocation2 + $0x157] sm:$0xff] }
 0x4e9   : > { %9775 = vmatprep.mubr.msk.f32.mxu0 %vm1024_vm2, %v12402_v14  ;;  %v12621_v7 = vld [vmem:[#allocation2 + $0x169] sm:$0xff]  ;;  %v12629_v40 = vld [vmem:[#allocation2 + $0x15f] sm:$0xff]  ;;  %v12633_v52 = vld [vmem:[#allocation2 + $0x171] sm:$0xff] }
 0x4ea   : > { %v12635_v62 = vld [vmem:[#allocation2 + $0x167] sm:$0xff]  ;;  %v12637_v54 = vld [vmem:[#allocation2 + $0x179] sm:$0xff]  ;;  %v12645_v47 = vld [vmem:[#allocation2 + $0x16f] sm:$0xff] }
 0x4eb   : > { %9608 = vmatmul.mubr.msk.f32.gmra.mrb[8].mxu1 %vm1024_vm2, %v12400_v3  ;;  %v12649_v19 = vld [vmem:[#allocation2 + $0x181] sm:$0xff]  ;;  %v12651_v61 = vld [vmem:[#allocation2 + $0x177] sm:$0xff]  ;;  %v12653_v9 = vld [vmem:[#allocation2 + $0x189] sm:$0xff] }
 0x4ec   : > { %9776 = vmatmul.mubr.msk.f32.gmra.mrb[8].mxu0 %vm1024_vm2, %v12412_v58  ;;  %9610 = vmatprep.mubr.msk.f32.mxu1 %vm1024_vm2, %v12402_v14  ;;  %v12661_v21 = vld [vmem:[#allocation2 + $0x17f] sm:$0xff]  ;;  %v12665_v41 = vld [vmem:[#allocation2 + $0x191] sm:$0xff]  ;;  %v12667_v48 = vld [vmem:[#allocation2 + $0x187] sm:$0xff] }
 0x4ed   : > { %9778 = vmatprep.mubr.msk.f32.mxu0 %vm1024_vm2, %v12414_v27  ;;  %v12669_v31 = vld [vmem:[#allocation2 + $0x199] sm:$0xff]  ;;  %v12677_v25 = vld [vmem:[#allocation2 + $0x18f] sm:$0xff]  ;;  %v12681_v4 = vld [vmem:[#allocation2 + $0x1a1] sm:$0xff] }
 0x4ee   : > { %v12683_v39 = vld [vmem:[#allocation2 + $0x197] sm:$0xff]  ;;  %v12685_v49 = vld [vmem:[#allocation2 + $0x1a9] sm:$0xff] }
 0x4ef   : > { %9611 = vmatmul.mubr.msk.f32.gmra.mrb[10].mxu1 %vm1024_vm2, %v12412_v58 }
 0x4f0   : > { %9779 = vmatmul.mubr.msk.f32.gmra.mrb[10].mxu0 %vm1024_vm2, %v12424_v57  ;;  %9613 = vmatprep.mubr.msk.f32.mxu1 %vm1024_vm2, %v12414_v27 }
 0x4f1   : > { %9781 = vmatprep.mubr.msk.f32.mxu0 %vm1024_vm2, %v12426_v0 }
 0x4f3   : > { %9614 = vmatmul.mubr.msk.f32.gmra.mrb[12].mxu1 %vm1024_vm2, %v12424_v57 }
 0x4f4   : > { %9782 = vmatmul.mubr.msk.f32.gmra.mrb[12].mxu0 %vm1024_vm2, %v12442_v15  ;;  %9616 = vmatprep.mubr.msk.f32.mxu1 %vm1024_vm2, %v12426_v0 }
 0x4f5   : > { %9784 = vmatprep.mubr.msk.f32.mxu0 %vm1024_vm2, %v12444_v32 }
 0x4f7   : > { %9617 = vmatmul.mubr.msk.f32.gmra.mrb[14].mxu1 %vm1024_vm2, %v12442_v15 }
 0x4f8   : > { %9785 = vmatmul.mubr.msk.f32.gmra.mrb[14].mxu0 %vm1024_vm2, %v12454_v63  ;;  %9619 = vmatprep.mubr.msk.f32.mxu1 %vm1024_vm2, %v12444_v32 }
 0x4f9   : > { %9787 = vmatprep.mubr.msk.f32.mxu0 %vm1024_vm2, %v12456_v59 }
 0x4fb   : > { %9620 = vmatmul.mubr.msk.f32.gmra.mrb[16].mxu1 %vm1024_vm2, %v12454_v63  ;;  %v8437_v63 = vld [vmem:[%s13240_s4 + $0x198] sm:$0xff] }
 0x4fc   : > { %9788 = vmatmul.mubr.msk.f32.gmra.mrb[16].mxu0 %vm1024_vm2, %v12466_v34  ;;  %9622 = vmatprep.mubr.msk.f32.mxu1 %vm1024_vm2, %v12456_v59  ;;  %v5235_v59 = vld [vmem:[#allocation2 + $0x101] sm:$0xff] }
 0x4fd   : > { %9790 = vmatprep.mubr.msk.f32.mxu0 %vm1024_vm2, %v12468_v33 }
 0x4ff   : > { %9623 = vmatmul.mubr.msk.f32.gmra.mrb[18].mxu1 %vm1024_vm2, %v12466_v34  ;;  %v5234_v34 = vld [vmem:[#allocation2 + $0xf9] sm:$0xff] }
 0x500   : > { %9791 = vmatmul.mubr.msk.f32.gmra.mrb[18].mxu0 %vm1024_vm2, %v12478_v11  ;;  %9625 = vmatprep.mubr.msk.f32.mxu1 %vm1024_vm2, %v12468_v33  ;;  %v12713_v33 = vld [vmem:[#allocation2 + $0x1c1] sm:$0xff] }
 0x501   : > { %9793 = vmatprep.mubr.msk.f32.mxu0 %vm1024_vm2, %v12480_v24  ;;  %13524 = vst [vmem:[#allocation67_spill] sm:$0xff] %v12713_v33 }
 0x503   : > { %9626 = vmatmul.mubr.msk.f32.gmra.mrb[20].mxu1 %vm1024_vm2, %v12478_v11  ;;  %v12709_v11 = vld [vmem:[#allocation2 + $0x1af] sm:$0xff] }
 0x504   : > { %9794 = vmatmul.mubr.msk.f32.gmra.mrb[20].mxu0 %vm1024_vm2, %v12490_v8  ;;  %9628 = vmatprep.mubr.msk.f32.mxu1 %vm1024_vm2, %v12480_v24  ;;  %v12701_v24 = vld [vmem:[#allocation2 + $0x1b9] sm:$0xff] }
 0x505   : > { %9796 = vmatprep.mubr.msk.f32.mxu0 %vm1024_vm2, %v12492_v51  ;;  %v12697_v51 = vld [vmem:[#allocation2 + $0x1b1] sm:$0xff]  ;;  %13523 = vst [vmem:[#allocation66_spill] sm:$0xff] %v12701_v24 }
 0x507   : > { %9629 = vmatmul.mubr.msk.f32.gmra.mrb[22].mxu1 %vm1024_vm2, %v12490_v8  ;;  %v12699_v8 = vld [vmem:[#allocation2 + $0x1a7] sm:$0xff] }
 0x508   : > { %9797 = vmatmul.mubr.msk.f32.gmra.mrb[22].mxu0 %vm1024_vm2, %v12502_v18  ;;  %9637 = vmatprep.mubr.msk.f32.mxu1 %vm1024_vm2, %v4664_v37  ;;  %v8410_v37 = vld [vmem:[%s13240_s4 + $0x180] sm:$0xff] }
 0x509   : > { %9805 = vmatprep.mubr.msk.f32.mxu0 %vm1024_vm2, %v12504_v26  ;;  %v12553_v45 = vpack.c.bf16 %v8411_v50, %v8410_v37  ;;  %v12569_v50 = vld [vmem:[#allocation2 + $0x127] sm:$0xff]  ;;  %v12571_v37 = vld [vmem:[#allocation2 + $0x139] sm:$0xff] }
 0x50a   : > { %v12693_v18 = vld [vmem:[#allocation2 + $0x19f] sm:$0xff] }
 0x50b   : > { %9638 = vmatmul.mubr.msk.f32.vlgmr.msra.gmra.mrb[0].mxu1 %vm1024_vm2, %v4665_v35  ;;  %v8277_v35 = vld [vmem:[%s13240_s4 + $0x118] sm:$0xff] }
 0x50c   : > { %9806 = vmatmul.mubr.msk.f32.vlgmr.msra.gmra.mrb[0].mxu0 %vm1024_vm2, %v12513_v36  ;;  %9640 = vmatprep.mubr.msk.f32.mxu1 %vm1024_vm2, %v12515_v17 }
 0x50d   : > { %10084 = vmatpush3.bf16.msra.mxu0 %v12384_v55  ;;  %9808 = vmatprep.mubr.msk.f32.mxu0 %vm1024_vm2, %v12517_v28  ;;  %v12563_v55 = vld [vmem:[#allocation2 + $0x11f] sm:$0xff] }
 0x50e   : > { %9845 = vmatprep.subr.mxu0 %v8385_v60  ;;  %10068 = vmatpush3.bf16.msra.mxu1 %v10065_v1  ;;  %v12567_v1 = vld [vmem:[#allocation2 + $0x131] sm:$0xff] }
 0x50f   : > { %9641 = vmatmul.mubr.msk.f32.gmra.mrb[2].mxu1 %vm1024_vm2, %v12519_v23  ;;  %9677 = vmatprep.subr.mxu1 %v8277_v35 }
 0x510   : > { %9809 = vmatmul.mubr.msk.f32.gmra.mrb[2].mxu0 %vm1024_vm2, %v12547_v42  ;;  %9643 = vmatprep.mubr.msk.f32.mxu1 %vm1024_vm2, %v12549_v22 }
 0x511   : > { %9811 = vmatprep.mubr.msk.f32.mxu0 %vm1024_vm2, %v12551_v2  ;;  %9846 = vmatpush3.msra.mxu0 %v8385_v60  ;;  %v12587_v60 = vld [vmem:[#allocation2 + $0x137] sm:$0xff] }
 0x512   : > { %9678 = vmatpush3.msra.mxu1 %v8277_v35  ;;  %10086 = vmatprep.subr.bf16.mxu0 %v12553_v45  ;;  %v12589_v35 = vld [vmem:[#allocation2 + $0x149] sm:$0xff] }
 0x513   : > { %9644 = vmatmul.mubr.msk.f32.gmra.mrb[4].mxu1 %vm1024_vm2, %v12563_v55  ;;  %10070 = vmatprep.subr.bf16.mxu1 %v12557_v5 }
 0x514   : > { %9812 = vmatmul.mubr.msk.f32.gmra.mrb[4].mxu0 %vm1024_vm2, %v12567_v1  ;;  %9646 = vmatprep.mubr.msk.f32.mxu1 %vm1024_vm2, %v12569_v50 }
 0x515   : > { %9814 = vmatprep.mubr.msk.f32.mxu0 %vm1024_vm2, %v12571_v37 }
 0x517   : > { %9647 = vmatmul.mubr.msk.f32.gmra.mrb[6].mxu1 %vm1024_vm2, %v12581_v38 }
 0x518   : > { %9815 = vmatmul.mubr.msk.f32.gmra.mrb[6].mxu0 %vm1024_vm2, %v12585_v12  ;;  %9649 = vmatprep.mubr.msk.f32.mxu1 %vm1024_vm2, %v12587_v60 }
 0x519   : > { %9817 = vmatprep.mubr.msk.f32.mxu0 %vm1024_vm2, %v12589_v35 }
 0x51b   : > { %9650 = vmatmul.mubr.msk.f32.gmra.mrb[8].mxu1 %vm1024_vm2, %v12597_v16 }
 0x51c   : > { %9818 = vmatmul.mubr.msk.f32.gmra.mrb[8].mxu0 %vm1024_vm2, %v12601_v43  ;;  %9652 = vmatprep.mubr.msk.f32.mxu1 %vm1024_vm2, %v12603_v44 }
 0x51d   : > { %9820 = vmatprep.mubr.msk.f32.mxu0 %vm1024_vm2, %v12605_v10 }
 0x51f   : > { %9653 = vmatmul.mubr.msk.f32.gmra.mrb[10].mxu1 %vm1024_vm2, %v12613_v6 }
 0x520   : > { %9821 = vmatmul.mubr.msk.f32.gmra.mrb[10].mxu0 %vm1024_vm2, %v12617_v13  ;;  %9655 = vmatprep.mubr.msk.f32.mxu1 %vm1024_vm2, %v12619_v30 }
 0x521   : > { %9823 = vmatprep.mubr.msk.f32.mxu0 %vm1024_vm2, %v12621_v7 }
 0x523   : > { %9656 = vmatmul.mubr.msk.f32.gmra.mrb[12].mxu1 %vm1024_vm2, %v12629_v40 }
 0x524   : > { %9824 = vmatmul.mubr.msk.f32.gmra.mrb[12].mxu0 %vm1024_vm2, %v12633_v52  ;;  %9658 = vmatprep.mubr.msk.f32.mxu1 %vm1024_vm2, %v12635_v62 }
 0x525   : > { %9826 = vmatprep.mubr.msk.f32.mxu0 %vm1024_vm2, %v12637_v54 }
 0x527   : > { %9659 = vmatmul.mubr.msk.f32.gmra.mrb[14].mxu1 %vm1024_vm2, %v12645_v47 }
 0x528   : > { %9827 = vmatmul.mubr.msk.f32.gmra.mrb[14].mxu0 %vm1024_vm2, %v12649_v19  ;;  %9661 = vmatprep.mubr.msk.f32.mxu1 %vm1024_vm2, %v12651_v61 }
 0x529   : > { %9829 = vmatprep.mubr.msk.f32.mxu0 %vm1024_vm2, %v12653_v9 }
 0x52b   : > { %9662 = vmatmul.mubr.msk.f32.gmra.mrb[16].mxu1 %vm1024_vm2, %v12661_v21 }
 0x52c   : > { %9830 = vmatmul.mubr.msk.f32.gmra.mrb[16].mxu0 %vm1024_vm2, %v12665_v41  ;;  %9664 = vmatprep.mubr.msk.f32.mxu1 %vm1024_vm2, %v12667_v48 }
 0x52d   : > { %9832 = vmatprep.mubr.msk.f32.mxu0 %vm1024_vm2, %v12669_v31 }
 0x52f   : > { %9665 = vmatmul.mubr.msk.f32.gmra.mrb[18].mxu1 %vm1024_vm2, %v12677_v25 }
 0x530   : > { %9833 = vmatmul.mubr.msk.f32.gmra.mrb[18].mxu0 %vm1024_vm2, %v12681_v4  ;;  %9667 = vmatprep.mubr.msk.f32.mxu1 %vm1024_vm2, %v12683_v39 }
 0x531   : > { %9835 = vmatprep.mubr.msk.f32.mxu0 %vm1024_vm2, %v12685_v49 }
 0x533   : > { %9668 = vmatmul.mubr.msk.f32.gmra.mrb[20].mxu1 %vm1024_vm2, %v12693_v18 }
 0x534   : > { %9836 = vmatmul.mubr.msk.f32.gmra.mrb[20].mxu0 %vm1024_vm2, %v12697_v51  ;;  %9670 = vmatprep.mubr.msk.f32.mxu1 %vm1024_vm2, %v12699_v8 }
 0x535   : > { %9838 = vmatprep.mubr.msk.f32.mxu0 %vm1024_vm2, %v12701_v24  ;;  %v8412_v24 = vld [vmem:[%s13240_s4 + $0x190] sm:$0xff] }
 0x537   : > { %9671 = vmatmul.mubr.msk.f32.gmra.mrb[22].mxu1 %vm1024_vm2, %v12709_v11 }
 0x538   : > { %9839 = vmatmul.mubr.msk.f32.gmra.mrb[22].mxu0 %vm1024_vm2, %v12713_v33  ;;  %9679 = vmatprep.mubr.msk.f32.mxu1 %vm1024_vm2, %v5234_v34  ;;  %v8438_v33 = vld [vmem:[%s13240_s4 + $0x1a0] sm:$0xff]  ;;  %v8304_v34 = vld [vmem:[%s13240_s4 + $0x130] sm:$0xff] }
 0x539   : > { %9847 = vmatprep.mubr.msk.f32.mxu0 %vm1024_vm2, %v12549_v22 }
 0x53b   : > { %9680 = vmatmul.mubr.msk.f32.vlgmr.msra.gmra.mrb[0].mxu1 %vm1024_vm2, %v5235_v59  ;;  %v10089_v59 = vpack.c.bf16 %v8438_v33, %v8437_v63  ;;  %v13528_v33 = vld [vmem:[#allocation60_spill] sm:$0xff] }
 0x53c   : > { %9848 = vmatmul.mubr.msk.f32.vlgmr.msra.gmra.mrb[0].mxu0 %vm1024_vm2, %v12563_v55  ;;  %9682 = vmatprep.mubr.msk.f32.mxu1 %vm1024_vm2, %v12504_v26  ;;  %v6493_v26 = vld [vmem:[#allocation2 + $0x1cf] sm:$0xff] }
 0x53d   : > { %10088 = vmatpush3.bf16.msra.mxu0 %v12553_v45  ;;  %9850 = vmatprep.mubr.msk.f32.mxu0 %vm1024_vm2, %v12569_v50  ;;  %v12807_v45 = vld [vmem:[#allocation2 + $0x1b7] sm:$0xff] }
 0x53e   : > { %9887 = vmatprep.subr.mxu0 %v8412_v24  ;;  %10072 = vmatpush3.bf16.msra.mxu1 %v12557_v5  ;;  %v6491_v5 = vld [vmem:[#allocation2 + $0x1bf] sm:$0xff] }
 0x53f   : > { %9683 = vmatmul.mubr.msk.f32.gmra.mrb[2].mxu1 %vm1024_vm2, %v12513_v36  ;;  %9719 = vmatprep.subr.mxu1 %v8304_v34  ;;  %v6492_v36 = vld [vmem:[#allocation2 + $0x1c7] sm:$0xff] }
 0x540   : > { %9851 = vmatmul.mubr.msk.f32.gmra.mrb[2].mxu0 %vm1024_vm2, %v12581_v38  ;;  %9685 = vmatprep.mubr.msk.f32.mxu1 %vm1024_vm2, %v12517_v28 }
 0x541   : > { %9853 = vmatprep.mubr.msk.f32.mxu0 %vm1024_vm2, %v12587_v60  ;;  %9888 = vmatpush3.msra.mxu0 %v8412_v24  ;;  %v8439_v24 = vld [vmem:[%s13240_s4 + $0x1a8] sm:$0xff] }
 0x542   : > { %9720 = vmatpush3.msra.mxu1 %v8304_v34  ;;  %10090 = vmatprep.subr.bf16.mxu0 %v10089_v59 }
 0x543   : > { %9686 = vmatmul.mubr.msk.f32.gmra.mrb[4].mxu1 %vm1024_vm2, %v12547_v42 }
 0x544   : > { %9854 = vmatmul.mubr.msk.f32.gmra.mrb[4].mxu0 %vm1024_vm2, %v12597_v16  ;;  %9688 = vmatprep.mubr.msk.f32.mxu1 %vm1024_vm2, %v12551_v2 }
 0x545   : > { %9856 = vmatprep.mubr.msk.f32.mxu0 %vm1024_vm2, %v12603_v44 }
 0x547   : > { %9689 = vmatmul.mubr.msk.f32.gmra.mrb[6].mxu1 %vm1024_vm2, %v12567_v1 }
 0x548   : > { %9857 = vmatmul.mubr.msk.f32.gmra.mrb[6].mxu0 %vm1024_vm2, %v12613_v6  ;;  %9691 = vmatprep.mubr.msk.f32.mxu1 %vm1024_vm2, %v12571_v37 }
 0x549   : > { %9859 = vmatprep.mubr.msk.f32.mxu0 %vm1024_vm2, %v12619_v30 }
 0x54b   : > { %9692 = vmatmul.mubr.msk.f32.gmra.mrb[8].mxu1 %vm1024_vm2, %v12585_v12 }
 0x54c   : > { %9860 = vmatmul.mubr.msk.f32.gmra.mrb[8].mxu0 %vm1024_vm2, %v12629_v40  ;;  %9694 = vmatprep.mubr.msk.f32.mxu1 %vm1024_vm2, %v12589_v35 }
 0x54d   : > { %9862 = vmatprep.mubr.msk.f32.mxu0 %vm1024_vm2, %v12635_v62 }
 0x54f   : > { %9695 = vmatmul.mubr.msk.f32.gmra.mrb[10].mxu1 %vm1024_vm2, %v12601_v43 }
 0x550   : > { %9863 = vmatmul.mubr.msk.f32.gmra.mrb[10].mxu0 %vm1024_vm2, %v12645_v47  ;;  %9697 = vmatprep.mubr.msk.f32.mxu1 %vm1024_vm2, %v12605_v10 }
 0x551   : > { %9865 = vmatprep.mubr.msk.f32.mxu0 %vm1024_vm2, %v12651_v61 }
 0x553   : > { %9698 = vmatmul.mubr.msk.f32.gmra.mrb[12].mxu1 %vm1024_vm2, %v12617_v13 }
 0x554   : > { %9866 = vmatmul.mubr.msk.f32.gmra.mrb[12].mxu0 %vm1024_vm2, %v12661_v21  ;;  %9700 = vmatprep.mubr.msk.f32.mxu1 %vm1024_vm2, %v12621_v7 }
 0x555   : > { %9868 = vmatprep.mubr.msk.f32.mxu0 %vm1024_vm2, %v12667_v48 }
 0x557   : > { %9701 = vmatmul.mubr.msk.f32.gmra.mrb[14].mxu1 %vm1024_vm2, %v12633_v52 }
 0x558   : > { %9869 = vmatmul.mubr.msk.f32.gmra.mrb[14].mxu0 %vm1024_vm2, %v12677_v25  ;;  %9703 = vmatprep.mubr.msk.f32.mxu1 %vm1024_vm2, %v12637_v54 }
 0x559   : > { %9871 = vmatprep.mubr.msk.f32.mxu0 %vm1024_vm2, %v12683_v39 }
 0x55b   : > { %9704 = vmatmul.mubr.msk.f32.gmra.mrb[16].mxu1 %vm1024_vm2, %v12649_v19 }
 0x55c   : > { %9872 = vmatmul.mubr.msk.f32.gmra.mrb[16].mxu0 %vm1024_vm2, %v12693_v18  ;;  %9706 = vmatprep.mubr.msk.f32.mxu1 %vm1024_vm2, %v12653_v9 }
 0x55d   : > { %9874 = vmatprep.mubr.msk.f32.mxu0 %vm1024_vm2, %v12699_v8 }
 0x55f   : > { %9707 = vmatmul.mubr.msk.f32.gmra.mrb[18].mxu1 %vm1024_vm2, %v12665_v41 }
 0x560   : > { %9875 = vmatmul.mubr.msk.f32.gmra.mrb[18].mxu0 %vm1024_vm2, %v12709_v11  ;;  %9709 = vmatprep.mubr.msk.f32.mxu1 %vm1024_vm2, %v12669_v31 }
 0x561   : > { %9877 = vmatprep.mubr.msk.f32.mxu0 %vm1024_vm2, %v12807_v45 }
 0x563   : > { %9710 = vmatmul.mubr.msk.f32.gmra.mrb[20].mxu1 %vm1024_vm2, %v12681_v4 }
 0x564   : > { %9878 = vmatmul.mubr.msk.f32.gmra.mrb[20].mxu0 %vm1024_vm2, %v6491_v5  ;;  %9712 = vmatprep.mubr.msk.f32.mxu1 %vm1024_vm2, %v12685_v49 }
 0x565   : > { %9880 = vmatprep.mubr.msk.f32.mxu0 %vm1024_vm2, %v6492_v36  ;;  %v13537_v36 = vld [vmem:[#allocation46_spill] sm:$0xff] }
 0x567   : > { %9713 = vmatmul.mubr.msk.f32.gmra.mrb[22].mxu1 %vm1024_vm2, %v12697_v51 }
 0x568   : > { %9881 = vmatmul.mubr.msk.f32.gmra.mrb[22].mxu0 %vm1024_vm2, %v6493_v26  ;;  %9721 = vmatprep.mubr.msk.f32.mxu1 %vm1024_vm2, %v12515_v17  ;;  %v13527_v17 = vld [vmem:[#allocation59_spill] sm:$0xff] }
 0x569   : > { %9889 = vmatprep.mubr.msk.f32.mxu0 %vm1024_vm2, %v12350_v20 }
 0x56b   : > { %9722 = vmatmul.mubr.msk.f32.vlgmr.msra.gmra.mrb[0].mxu1 %vm1024_vm2, %v12519_v23  ;;  %v13526_v23 = vld [vmem:[#allocation58_spill] sm:$0xff] }
 0x56c   : > { %9890 = vmatmul.mubr.msk.f32.vlgmr.msra.gmra.mrb[0].mxu0 %vm1024_vm2, %v12357_v46  ;;  %9724 = vmatprep.mubr.msk.f32.mxu1 %vm1024_vm2, %v12549_v22  ;;  %v13525_v22 = vld [vmem:[#allocation57_spill] sm:$0xff] }
 0x56d   : > { %10092 = vmatpush3.bf16.msra.mxu0 %v10089_v59  ;;  %9892 = vmatprep.mubr.msk.f32.mxu0 %vm1024_vm2, %v12367_v56 }
 0x56e   : > { %9929 = vmatprep.subr.mxu0 %v8439_v24 }
 0x56f   : > { %9725 = vmatmul.mubr.msk.f32.gmra.mrb[2].mxu1 %vm1024_vm2, %v12563_v55 }
 0x570   : > { %9893 = vmatmul.mubr.msk.f32.gmra.mrb[2].mxu0 %vm1024_vm2, %v12382_v53  ;;  %9727 = vmatprep.mubr.msk.f32.mxu1 %vm1024_vm2, %v12569_v50 }
 0x571   : > { %9895 = vmatprep.mubr.msk.f32.mxu0 %vm1024_vm2, %v12386_v29  ;;  %9930 = vmatpush3.msra.mxu0 %v8439_v24 }
 0x573   : > { %9728 = vmatmul.mubr.msk.f32.gmra.mrb[4].mxu1 %vm1024_vm2, %v12581_v38 }
 0x574   : > { %9896 = vmatmul.mubr.msk.f32.gmra.mrb[4].mxu0 %vm1024_vm2, %v12400_v3  ;;  %9730 = vmatprep.mubr.msk.f32.mxu1 %vm1024_vm2, %v12587_v60 }
 0x575   : > { %9898 = vmatprep.mubr.msk.f32.mxu0 %vm1024_vm2, %v12402_v14 }
 0x577   : > { %9731 = vmatmul.mubr.msk.f32.gmra.mrb[6].mxu1 %vm1024_vm2, %v12597_v16 }
 0x578   : > { %9899 = vmatmul.mubr.msk.f32.gmra.mrb[6].mxu0 %vm1024_vm2, %v12412_v58  ;;  %9733 = vmatprep.mubr.msk.f32.mxu1 %vm1024_vm2, %v12603_v44 }
 0x579   : > { %9901 = vmatprep.mubr.msk.f32.mxu0 %vm1024_vm2, %v12414_v27  ;;  %v13008_v27 = vld [vmem:[%s13241_s5 + $0x1] ss:$0 sm:$0xff] }
 0x57b   : > { %9734 = vmatmul.mubr.msk.f32.gmra.mrb[8].mxu1 %vm1024_vm2, %v12613_v6 }
 0x57c   : > { %9902 = vmatmul.mubr.msk.f32.gmra.mrb[8].mxu0 %vm1024_vm2, %v12424_v57  ;;  %9736 = vmatprep.mubr.msk.f32.mxu1 %vm1024_vm2, %v12619_v30 }
 0x57d   : > { %9904 = vmatprep.mubr.msk.f32.mxu0 %vm1024_vm2, %v12426_v0 }
 0x57f   : > { %9737 = vmatmul.mubr.msk.f32.gmra.mrb[10].mxu1 %vm1024_vm2, %v12629_v40 }
 0x580   : > { %9905 = vmatmul.mubr.msk.f32.gmra.mrb[10].mxu0 %vm1024_vm2, %v12442_v15  ;;  %9739 = vmatprep.mubr.msk.f32.mxu1 %vm1024_vm2, %v12635_v62 }
 0x581   : > { %9907 = vmatprep.mubr.msk.f32.mxu0 %vm1024_vm2, %v12444_v32  ;;  %v13529_v32 = vld [vmem:[#allocation61_spill] sm:$0xff] }
 0x583   : > { %9740 = vmatmul.mubr.msk.f32.gmra.mrb[12].mxu1 %vm1024_vm2, %v12645_v47 }
 0x584   : > { %9908 = vmatmul.mubr.msk.f32.gmra.mrb[12].mxu0 %vm1024_vm2, %v13525_v22  ;;  %9742 = vmatprep.mubr.msk.f32.mxu1 %vm1024_vm2, %v12651_v61  ;;  %v13530_v61 = vld [vmem:[#allocation62_spill] sm:$0xff] }
 0x585   : > { %9910 = vmatprep.mubr.msk.f32.mxu0 %vm1024_vm2, %v13526_v23 }
 0x587   : > { %9743 = vmatmul.mubr.msk.f32.gmra.mrb[14].mxu1 %vm1024_vm2, %v12661_v21  ;;  %v13531_v21 = vld [vmem:[#allocation63_spill] sm:$0xff] }
 0x588   : > { %9911 = vmatmul.mubr.msk.f32.gmra.mrb[14].mxu0 %vm1024_vm2, %v13527_v17  ;;  %9745 = vmatprep.mubr.msk.f32.mxu1 %vm1024_vm2, %v12667_v48  ;;  %v13532_v48 = vld [vmem:[#allocation64_spill] sm:$0xff] }
 0x589   : > { %9913 = vmatprep.mubr.msk.f32.mxu0 %vm1024_vm2, %v13528_v33 }
 0x58b   : > { %9746 = vmatmul.mubr.msk.f32.gmra.mrb[16].mxu1 %vm1024_vm2, %v12677_v25  ;;  %v6801_v25 = vld [vmem:[#allocation2 + $0x1c8] sm:$0xff] }
 0x58c   : > { %9914 = vmatmul.mubr.msk.f32.gmra.mrb[16].mxu0 %vm1024_vm2, %v13529_v32  ;;  %9748 = vmatprep.mubr.msk.f32.mxu1 %vm1024_vm2, %v12683_v39  ;;  %v13533_v39 = vld [vmem:[#allocation65_spill] sm:$0xff] }
 0x58d   : > { %9916 = vmatprep.mubr.msk.f32.mxu0 %vm1024_vm2, %v13530_v61 }
 0x58f   : > { %9749 = vmatmul.mubr.msk.f32.gmra.mrb[18].mxu1 %vm1024_vm2, %v12693_v18  ;;  %v6802_v18 = vld [vmem:[#allocation2 + $0x1d0] sm:$0xff] }
 0x590   : > { %9917 = vmatmul.mubr.msk.f32.gmra.mrb[18].mxu0 %vm1024_vm2, %v13531_v21  ;;  %9751 = vmatprep.mubr.msk.f32.mxu1 %vm1024_vm2, %v12699_v8  ;;  %v7111_v8 = vld [vmem:[#allocation2 + $0x1d1] sm:$0xff] }
 0x591   : > { %9919 = vmatprep.mubr.msk.f32.mxu0 %vm1024_vm2, %v13532_v48  ;;  %v13538_v48 = vld [vmem:[#allocation47_spill] sm:$0xff] }
 0x593   : > { %9752 = vmatmul.mubr.msk.f32.gmra.mrb[20].mxu1 %vm1024_vm2, %v12709_v11  ;;  %v8466_v11 = vld [vmem:[%s13242_s6 + $0x18] sm:$0xff] }
 0x594   : > { %9920 = vmatmul.mubr.msk.f32.gmra.mrb[20].mxu0 %vm1024_vm2, %v13533_v39  ;;  %9754 = vmatprep.mubr.msk.f32.mxu1 %vm1024_vm2, %v12807_v45  ;;  %v13536_v45 = vld [vmem:[#allocation45_spill] sm:$0xff] }
 0x595   : > { %9922 = vmatprep.mubr.msk.f32.mxu0 %vm1024_vm2, %v6801_v25 }
 0x597   : > { %9755 = vmatmul.mubr.msk.f32.gmra.mrb[22].mxu1 %vm1024_vm2, %v6491_v5 }
 0x598   : > { %9923 = vmatmul.mubr.msk.f32.gmra.mrb[22].mxu0 %vm1024_vm2, %v6802_v18 }
 0x599   : > { %9931 = vmatprep.mubr.msk.f32.mxu0 %vm1024_vm2, %v12517_v28  ;;  %v13535_v28 = vld [vmem:[#allocation67_spill] sm:$0xff] }
 0x59c   : > { %9932 = vmatmul.mubr.msk.f32.vlgmr.msra.gmra.mrb[0].mxu0 %vm1024_vm2, %v12547_v42  ;;  %v7110_v42 = vld [vmem:[#allocation2 + $0x1c9] sm:$0xff] }
 0x59d   : > { %9934 = vmatprep.mubr.msk.f32.mxu0 %vm1024_vm2, %v12551_v2  ;;  %v13534_v2 = vld [vmem:[#allocation66_spill] sm:$0xff] }
 0x5a0   : > { %9935 = vmatmul.mubr.msk.f32.gmra.mrb[2].mxu0 %vm1024_vm2, %v12567_v1 }
 0x5a1   : > { %9937 = vmatprep.mubr.msk.f32.mxu0 %vm1024_vm2, %v12571_v37 }
 0x5a4   : > { %9938 = vmatmul.mubr.msk.f32.gmra.mrb[4].mxu0 %vm1024_vm2, %v12585_v12 }
 0x5a5   : > { %9940 = vmatprep.mubr.msk.f32.mxu0 %vm1024_vm2, %v12589_v35 }
 0x5a8   : > { %9941 = vmatmul.mubr.msk.f32.gmra.mrb[6].mxu0 %vm1024_vm2, %v12601_v43 }
 0x5a9   : > { %9943 = vmatprep.mubr.msk.f32.mxu0 %vm1024_vm2, %v12605_v10 }
 0x5ac   : > { %9944 = vmatmul.mubr.msk.f32.gmra.mrb[8].mxu0 %vm1024_vm2, %v12617_v13 }
 0x5ad   : > { %9946 = vmatprep.mubr.msk.f32.mxu0 %vm1024_vm2, %v12621_v7 }
 0x5b0   : > { %9947 = vmatmul.mubr.msk.f32.gmra.mrb[10].mxu0 %vm1024_vm2, %v12633_v52 }
 0x5b1   : > { %9949 = vmatprep.mubr.msk.f32.mxu0 %vm1024_vm2, %v12637_v54 }
 0x5b4   : > { %9950 = vmatmul.mubr.msk.f32.gmra.mrb[12].mxu0 %vm1024_vm2, %v12649_v19 }
 0x5b5   : > { %9952 = vmatprep.mubr.msk.f32.mxu0 %vm1024_vm2, %v12653_v9 }
 0x5b8   : > { %9953 = vmatmul.mubr.msk.f32.gmra.mrb[14].mxu0 %vm1024_vm2, %v12665_v41 }
 0x5b9   : > { %9955 = vmatprep.mubr.msk.f32.mxu0 %vm1024_vm2, %v12669_v31 }
 0x5bc   : > { %9956 = vmatmul.mubr.msk.f32.gmra.mrb[16].mxu0 %vm1024_vm2, %v12681_v4  ;;  %v8468_v4 = vld [vmem:[%s13242_s6 + $0x28] sm:$0xff] }
 0x5bd   : > { %9958 = vmatprep.mubr.msk.f32.mxu0 %vm1024_vm2, %v12685_v49  ;;  %v8467_v49 = vld [vmem:[%s13242_s6 + $0x20] sm:$0xff] }
 0x5c0   : > { %9959 = vmatmul.mubr.msk.f32.gmra.mrb[18].mxu0 %vm1024_vm2, %v12697_v51  ;;  %v10093_v51 = vpack.c.bf16 %v8467_v49, %v8466_v11 }
 0x5c1   : > { %9961 = vmatprep.mubr.msk.f32.mxu0 %vm1024_vm2, %v13534_v2  ;;  %v13539_v2 = vld [vmem:[#allocation48_spill] sm:$0xff] }
 0x5c2   : > { %10094 = vmatprep.subr.bf16.mxu1 %v10093_v51 }
 0x5c3   : > { %10096 = vmatpush3.bf16.msra.mxu1 %v10093_v51 }
 0x5c4   : > { %9962 = vmatmul.mubr.msk.f32.gmra.mrb[20].mxu0 %vm1024_vm2, %v13535_v28  ;;  %9971 = vmatprep.subr.mxu1 %v8468_v4 }
 0x5c5   : > { %9964 = vmatprep.mubr.msk.f32.mxu0 %vm1024_vm2, %v7110_v42 }
 0x5c7   : > { %9972 = vmatpush3.msra.mxu1 %v8468_v4 }
 0x5c8   : > { %9965 = vmatmul.mubr.msk.f32.gmra.mrb[22].mxu0 %vm1024_vm2, %v7111_v8 }
 0x63e   : > { %v9723_v31 = vpop.f32.mrb[0].mxu1 }
 0x63f   : > { %v5709_v41 = vpop.f32.mrb[1].mxu1 }
 0x642   : > { %v9726_v9 = vpop.f32.mrb[2].mxu1 }
 0x643   : > { %v5719_v47 = vpop.f32.mrb[3].mxu1 }
 0x646   : > { %v9729_v19 = vpop.f32.mrb[4].mxu1 }
 0x647   : > { %v5729_v62 = vpop.f32.mrb[5].mxu1 }
 0x64a   : > { %v9732_v54 = vpop.f32.mrb[6].mxu1 }
 0x64b   : > { %v5739_v40 = vpop.f32.mrb[7].mxu1 }
 0x64e   : > { %v9735_v52 = vpop.f32.mrb[8].mxu1 }
 0x64f   : > { %v5749_v30 = vpop.f32.mrb[9].mxu1 }
 0x652   : > { %v12977_v7 = vpop.f32.mrb[10].mxu1 }
 0x653   : > { %v12979_v6 = vpop.f32.mrb[11].mxu1 }
 0x656   : > { %v12981_v13 = vpop.f32.mrb[12].mxu1 }
 0x657   : > { %v12983_v44 = vpop.f32.mrb[13].mxu1 }
 0x65a   : > { %v12985_v10 = vpop.f32.mrb[14].mxu1 }
 0x65b   : > { %v12987_v16 = vpop.f32.mrb[15].mxu1 }
 0x65e   : > { %v12989_v43 = vpop.f32.mrb[16].mxu1 }
 0x65f   : > { %v12991_v20 = vpop.f32.mrb[17].mxu1 }
 0x662   : > { %v12993_v46 = vpop.f32.mrb[18].mxu1 }
 0x663   : > { %v12995_v56 = vpop.f32.mrb[19].mxu1 }
 0x666   : > { %v12997_v53 = vpop.f32.mrb[20].mxu1 }
 0x667   : > { %v12999_v29 = vpop.f32.mrb[21].mxu1 }
 0x66a   : > { %v13001_v3 = vpop.f32.mrb[22].mxu1 }
 0x66b   : > { %v13003_v14 = vpop.f32.mrb[23].mxu1 }
 0x66f   : > { %v9933_v58 = vpop.f32.mrb[0].mxu0 }
 0x670   : > { %v10289_v57 = vadd.f32 %v9933_v58, %v9723_v31  ;;  %v7254_v0 = vpop.f32.mrb[1].mxu0  ;;  %v13540_v31 = vld [vmem:[#allocation49_spill] sm:$0xff] }
 0x671   : > { %v10290_v15 = vadd.f32 %v7254_v0, %v5709_v41 }
 0x672   : > { %v7406_v63 = vadd.f32 %v10289_v57, %v13008_v27 }
 0x673   : > { %v7405_v55 = vadd.f32 %v10290_v15, %v13008_v27  ;;  %v9936_v1 = vpop.f32.mrb[2].mxu0 }
 0x674   : > { %v7430_v50 = vmax.f32 %v7406_v63, 0.0  ;;  %v10291_v37 = vadd.f32 %v9936_v1, %v9726_v9  ;;  %v7264_v38 = vpop.f32.mrb[3].mxu0  ;;  %v13542_v63 = vld [vmem:[#allocation4_spill] sm:$0xff] }
 0x675   : > { %v10292_v12 = vadd.f32 %v7264_v38, %v5719_v47  ;;  %v7429_v60 = vmax.f32 %v7405_v55, 0.0 }
 0x676   : > { %v7408_v35 = vadd.f32 %v10291_v37, %v13008_v27  ;;  %v7454_v26 = vsel %vm454_vm1, %v7430_v50, %v13537_v36  ;;  %v13543_v50 = vld [vmem:[#allocation6_spill] sm:$0xff]  ;;  %v13545_v36 = vld [vmem:[#allocation5_spill] sm:$0xff] }
 0x677   : > { %v7407_v34 = vadd.f32 %v10292_v12, %v13008_v27  ;;  %v9939_v59 = vpop.f32.mrb[4].mxu0  ;;  %v7453_v5 = vsel %vm454_vm1, %v7429_v60, %v13536_v45 }
 0x678   : > { %v10293_v24 = vadd.f32 %v9939_v59, %v9729_v19  ;;  %v7274_v22 = vpop.f32.mrb[5].mxu0  ;;  %9973 = vmatprep.mubr.msk.f32.mxu1 %vm1024_vm2, %v7453_v5  ;;  %v7432_v23 = vmax.f32 %v7408_v35, 0.0  ;;  %v13541_v19 = vld [vmem:[#allocation50_spill] sm:$0xff]  ;;  %v13544_v59 = vld [vmem:[#allocation3_spill] sm:$0xff] }
 0x679   : > { %v10294_v17 = vadd.f32 %v7274_v22, %v5729_v62  ;;  %9974 = vmatmul.mubr.msk.f32.vlgmr.msra.gmra.mrb[24].mxu1 %vm1024_vm2, %v7454_v26  ;;  %v7431_v33 = vmax.f32 %v7407_v34, 0.0 }
 0x67a   : > { %v7410_v32 = vadd.f32 %v10293_v24, %v13008_v27  ;;  %v7456_v42 = vsel %vm454_vm1, %v7432_v23, %v13539_v2 }
 0x67b   : > { %v7409_v61 = vadd.f32 %v10294_v17, %v13008_v27  ;;  %v9942_v21 = vpop.f32.mrb[6].mxu0  ;;  %v7455_v25 = vsel %vm454_vm1, %v7431_v33, %v13538_v48  ;;  %v13547_v48 = vld [vmem:[#allocation7_spill] sm:$0xff] }
 0x67c   : > { %v10295_v39 = vadd.f32 %v9942_v21, %v9732_v54  ;;  %v7284_v18 = vpop.f32.mrb[7].mxu0  ;;  %9976 = vmatprep.mubr.msk.f32.mxu1 %vm1024_vm2, %v7455_v25  ;;  %v7434_v28 = vmax.f32 %v7410_v32, 0.0  ;;  %v13546_v32 = vld [vmem:[#allocation8_spill] sm:$0xff] }
 0x67d   : > { %v10296_v8 = vadd.f32 %v7284_v18, %v5739_v40  ;;  %9977 = vmatmul.mubr.msk.f32.gmra.mrb[26].mxu1 %vm1024_vm2, %v7456_v42  ;;  %v7433_v11 = vmax.f32 %v7409_v61, 0.0 }
 0x67e   : > { %v7412_v49 = vadd.f32 %v10295_v39, %v13008_v27  ;;  %v7458_v62 = vsel %vm454_vm1, %v7434_v28, %v13541_v19 }
 0x67f   : > { %v7411_v51 = vadd.f32 %v10296_v8, %v13008_v27  ;;  %v9945_v4 = vpop.f32.mrb[8].mxu0  ;;  %v7457_v41 = vsel %vm454_vm1, %v7433_v11, %v13540_v31  ;;  %v13548_v8 = vld [vmem:[#allocation10_spill] sm:$0xff] }
 0x680   : > { %v10297_v9 = vadd.f32 %v9945_v4, %v9735_v52  ;;  %v7294_v47 = vpop.f32.mrb[9].mxu0  ;;  %9979 = vmatprep.mubr.msk.f32.mxu1 %vm1024_vm2, %v7457_v41  ;;  %v7436_v54 = vmax.f32 %v7412_v49, 0.0 }
 0x681   : > { %v10298_v40 = vadd.f32 %v7294_v47, %v5749_v30  ;;  %9980 = vmatmul.mubr.msk.f32.gmra.mrb[28].mxu1 %vm1024_vm2, %v7458_v62  ;;  %v7435_v58 = vmax.f32 %v7411_v51, 0.0  ;;  %v13549_v51 = vld [vmem:[#allocation9_spill] sm:$0xff]  ;;  %v13550_v62 = vld [vmem:[#allocation12_spill] sm:$0xff] }
 0x682   : > { %v7414_v57 = vadd.f32 %v10297_v9, %v13008_v27  ;;  %v7460_v37 = vsel %vm454_vm1, %v7436_v54, %v13543_v50 }
 0x683   : > { %v7413_v0 = vadd.f32 %v10298_v40, %v13008_v27  ;;  %v9948_v15 = vpop.f32.mrb[10].mxu0  ;;  %v7459_v55 = vsel %vm454_vm1, %v7435_v58, %v13542_v63  ;;  %v13551_v58 = vld [vmem:[#allocation11_spill] sm:$0xff] }
 0x684   : > { %v10299_v52 = vadd.f32 %v9948_v15, %v12977_v7  ;;  %v7304_v1 = vpop.f32.mrb[11].mxu0  ;;  %9982 = vmatprep.mubr.msk.f32.mxu1 %vm1024_vm2, %v7459_v55  ;;  %v7438_v30 = vmax.f32 %v7414_v57, 0.0 }
 0x685   : > { %v10300_v38 = vadd.f32 %v7304_v1, %v12979_v6  ;;  %9983 = vmatmul.mubr.msk.f32.gmra.mrb[30].mxu1 %vm1024_vm2, %v7460_v37  ;;  %v7437_v12 = vmax.f32 %v7413_v0, 0.0  ;;  %v13552_v1 = vld [vmem:[#allocation14_spill] sm:$0xff] }
 0x686   : > { %v7416_v60 = vadd.f32 %v10299_v52, %v13008_v27  ;;  %v7462_v26 = vsel %vm454_vm1, %v7438_v30, %v13545_v36  ;;  %v13553_v30 = vld [vmem:[#allocation13_spill] sm:$0xff]  ;;  %v13555_v36 = vld [vmem:[#allocation15_spill] sm:$0xff] }
 0x687   : > { %v7415_v35 = vadd.f32 %v10300_v38, %v13008_v27  ;;  %v9951_v34 = vpop.f32.mrb[12].mxu0  ;;  %v7461_v7 = vsel %vm454_vm1, %v7437_v12, %v13544_v59 }
 0x688   : > { %v10301_v45 = vadd.f32 %v9951_v34, %v12981_v13  ;;  %v7314_v5 = vpop.f32.mrb[13].mxu0  ;;  %9985 = vmatprep.mubr.msk.f32.mxu1 %vm1024_vm2, %v7461_v7  ;;  %v7440_v6 = vmax.f32 %v7416_v60, 0.0  ;;  %v13554_v7 = vld [vmem:[#allocation16_spill] sm:$0xff] }
 0x689   : > { %v10302_v24 = vadd.f32 %v7314_v5, %v12983_v44  ;;  %9986 = vmatmul.mubr.msk.f32.gmra.mrb[32].mxu1 %vm1024_vm2, %v7462_v26  ;;  %v7439_v22 = vmax.f32 %v7415_v35, 0.0 }
 0x68a   : > { %v7418_v23 = vadd.f32 %v10301_v45, %v13008_v27  ;;  %v7464_v25 = vsel %vm454_vm1, %v7440_v6, %v13547_v48  ;;  %v13559_v48 = vld [vmem:[#allocation19_spill] sm:$0xff] }
 0x68b   : > { %v7417_v17 = vadd.f32 %v10302_v24, %v13008_v27  ;;  %v9954_v33 = vpop.f32.mrb[14].mxu0  ;;  %v7463_v13 = vsel %vm454_vm1, %v7439_v22, %v13546_v32 }
 0x68c   : > { %v10303_v61 = vadd.f32 %v9954_v33, %v12985_v10  ;;  %v7324_v21 = vpop.f32.mrb[15].mxu0  ;;  %9988 = vmatprep.mubr.msk.f32.mxu1 %vm1024_vm2, %v7463_v13  ;;  %v7442_v44 = vmax.f32 %v7418_v23, 0.0 }
 0x68d   : > { %v10304_v39 = vadd.f32 %v7324_v21, %v12987_v16  ;;  %9989 = vmatmul.mubr.msk.f32.gmra.mrb[34].mxu1 %vm1024_vm2, %v7464_v25  ;;  %v7441_v18 = vmax.f32 %v7417_v17, 0.0  ;;  %v13556_v17 = vld [vmem:[#allocation18_spill] sm:$0xff]  ;;  %v13123_v25 = vld [vmem:[%s13243_s7 + $0x1] ss:$0 sm:$0xff] }
 0x68e   : > { %v7420_v2 = vadd.f32 %v10303_v61, %v13008_v27  ;;  %v7466_v4 = vsel %vm454_vm1, %v7442_v44, %v13549_v51 }
 0x68f   : > { %v7419_v42 = vadd.f32 %v10304_v39, %v13008_v27  ;;  %v9957_v28 = vpop.f32.mrb[16].mxu0  ;;  %v7465_v10 = vsel %vm454_vm1, %v7441_v18, %v13548_v8 }
 0x690   : > { %v10305_v11 = vadd.f32 %v9957_v28, %v12989_v43  ;;  %v7334_v49 = vpop.f32.mrb[17].mxu0  ;;  %9991 = vmatprep.mubr.msk.f32.mxu1 %vm1024_vm2, %v7465_v10  ;;  %v7444_v16 = vmax.f32 %v7420_v2, 0.0  ;;  %v13560_v10 = vld [vmem:[#allocation52_spill] sm:$0xff] }
 0x691   : > { %v10306_v31 = vadd.f32 %v7334_v49, %v12991_v20  ;;  %9992 = vmatmul.mubr.msk.f32.gmra.mrb[36].mxu1 %vm1024_vm2, %v7466_v4  ;;  %v7443_v41 = vmax.f32 %v7419_v42, 0.0  ;;  %v13561_v4 = vld [vmem:[#allocation51_spill] sm:$0xff] }
 0x692   : > { %v7422_v9 = vadd.f32 %v10305_v11, %v13008_v27  ;;  %v7468_v57 = vsel %vm454_vm1, %v7444_v16, %v13551_v58 }
 0x693   : > { %v7421_v47 = vadd.f32 %v10306_v31, %v13008_v27  ;;  %v9960_v19 = vpop.f32.mrb[18].mxu0  ;;  %v7467_v43 = vsel %vm454_vm1, %v7443_v41, %v13550_v62 }
 0x694   : > { %v10307_v54 = vadd.f32 %v9960_v19, %v12993_v46  ;;  %v7344_v40 = vpop.f32.mrb[19].mxu0  ;;  %9994 = vmatprep.mubr.msk.f32.mxu1 %vm1024_vm2, %v7467_v43  ;;  %v7446_v20 = vmax.f32 %v7422_v9, 0.0  ;;  %v13562_v19 = vld [vmem:[#allocation54_spill] sm:$0xff] }
 0x695   : > { %v10308_v0 = vadd.f32 %v7344_v40, %v12995_v56  ;;  %9995 = vmatmul.mubr.msk.f32.gmra.mrb[38].mxu1 %vm1024_vm2, %v7468_v57  ;;  %v7445_v15 = vmax.f32 %v7421_v47, 0.0  ;;  %v13563_v40 = vld [vmem:[#allocation53_spill] sm:$0xff] }
 0x696   : > { %v7424_v63 = vadd.f32 %v10307_v54, %v13008_v27  ;;  %v7470_v38 = vsel %vm454_vm1, %v7446_v20, %v13553_v30 }
 0x697   : > { %v7423_v55 = vadd.f32 %v10308_v0, %v13008_v27  ;;  %v9963_v52 = vpop.f32.mrb[20].mxu0  ;;  %v7469_v46 = vsel %vm454_vm1, %v7445_v15, %v13552_v1 }
 0x698   : > { %v10309_v50 = vadd.f32 %v9963_v52, %v12997_v53  ;;  %v7354_v37 = vpop.f32.mrb[21].mxu0  ;;  %9997 = vmatprep.mubr.msk.f32.mxu1 %vm1024_vm2, %v7469_v46  ;;  %v7448_v56 = vmax.f32 %v7424_v63, 0.0  ;;  %v13564_v63 = vld [vmem:[#allocation56_spill] sm:$0xff]  ;;  %v13565_v46 = vld [vmem:[#allocation55_spill] sm:$0xff] }
 0x699   : > { %v10310_v12 = vadd.f32 %v7354_v37, %v12999_v29  ;;  %9998 = vmatmul.mubr.msk.f32.gmra.mrb[40].mxu1 %vm1024_vm2, %v7470_v38  ;;  %v7447_v60 = vmax.f32 %v7423_v55, 0.0 }
 0x69a   : > { %v7426_v35 = vadd.f32 %v10309_v50, %v13008_v27  ;;  %v7472_v26 = vsel %vm454_vm1, %v7448_v56, %v13555_v36 }
 0x69b   : > { %v7425_v34 = vadd.f32 %v10310_v12, %v13008_v27  ;;  %v9966_v59 = vpop.f32.mrb[22].mxu0  ;;  %v7471_v53 = vsel %vm454_vm1, %v7447_v60, %v13554_v7  ;;  %v13566_v12 = vld [vmem:[#allocation21_spill] sm:$0xff] }
 0x69c   : > { %v10311_v45 = vadd.f32 %v9966_v59, %v13001_v3  ;;  %v7364_v5 = vpop.f32.mrb[23].mxu0  ;;  %10000 = vmatprep.mubr.msk.f32.mxu1 %vm1024_vm2, %v7471_v53  ;;  %v7450_v29 = vmax.f32 %v7426_v35, 0.0  ;;  %v13557_v3 = vld [vmem:[#allocation17_spill] sm:$0xff]  ;;  %v13567_v59 = vld [vmem:[#allocation22_spill] sm:$0xff] }
 0x69d   : > { %v10312_v6 = vadd.f32 %v7364_v5, %v13003_v14  ;;  %10001 = vmatmul.mubr.msk.f32.gmra.mrb[42].mxu1 %vm1024_vm2, %v7472_v26  ;;  %v7449_v24 = vmax.f32 %v7425_v34, 0.0  ;;  %v13558_v14 = vld [vmem:[#allocation20_spill] sm:$0xff]  ;;  %v13568_v26 = vld [vmem:[#allocation25_spill] sm:$0xff] }
 0x69e   : > { %v7428_v22 = vadd.f32 %v10311_v45, %v13008_v27  ;;  %v7474_v32 = vsel %vm454_vm1, %v7450_v29, %v13557_v3 }
 0x69f   : > { %v7427_v23 = vadd.f32 %v10312_v6, %v13008_v27  ;;  %v7473_v33 = vsel %vm454_vm1, %v7449_v24, %v13556_v17 }
 0x6a0   : > { %10003 = vmatprep.mubr.msk.f32.mxu1 %vm1024_vm2, %v7473_v33  ;;  %v7452_v13 = vmax.f32 %v7428_v22, 0.0  ;;  %v13569_v22 = vld [vmem:[#allocation26_spill] sm:$0xff] }
 0x6a1   : > { %10004 = vmatmul.mubr.msk.f32.gmra.mrb[44].mxu1 %vm1024_vm2, %v7474_v32  ;;  %v7451_v61 = vmax.f32 %v7427_v23, 0.0 }
 0x6a2   : > { %v7476_v27 = vsel %vm454_vm1, %v7452_v13, %v13559_v48  ;;  %v13570_v13 = vld [vmem:[#allocation27_spill] sm:$0xff]  ;;  %v13571_v48 = vld [vmem:[#allocation28_spill] sm:$0xff] }
 0x6a3   : > { %v7475_v21 = vsel %vm454_vm1, %v7451_v61, %v13558_v14 }
 0x6a4   : > { %10006 = vmatprep.mubr.msk.f32.mxu1 %vm1024_vm2, %v7475_v21 }
 0x6a5   : > { %10007 = vmatmul.mubr.msk.f32.gmra.mrb[46].mxu1 %vm1024_vm2, %v7476_v27 }
 0x74c   : > { %v9975_v44 = vpop.f32.mrb[24].mxu1 }
 0x74d   : > { %v7633_v39 = vadd.f32 %v9975_v44, %v13123_v25  ;;  %v7627_v18 = vpop.f32.mrb[25].mxu1 }
 0x74e   : > { %v7628_v2 = vadd.f32 %v13123_v25, %v7627_v18 }
 0x74f   : > { %v7747_v42 = vmax.f32 %v7633_v39, 0.0 }
 0x750   : > { %v7746_v28 = vmax.f32 %v7628_v2, 0.0  ;;  %v9978_v8 = vpop.f32.mrb[26].mxu1 }
 0x751   : > { %v7771_v11 = vadd.f32 %v7747_v42, %v13560_v10  ;;  %v7643_v49 = vadd.f32 %v9978_v8, %v13123_v25  ;;  %v7637_v51 = vpop.f32.mrb[27].mxu1  ;;  %v13572_v42 = vld [vmem:[#allocation29_spill] sm:$0xff] }
 0x752   : > { %v7770_v16 = vadd.f32 %v7746_v28, %v13561_v4  ;;  %v7638_v31 = vadd.f32 %v13123_v25, %v7637_v51 }
 0x753   : > { %7795 = vst.msk [vmem:[%s10678_s20 + $0x8] sm:$0xff] %vm454_vm1, %v7771_v11  ;;  %v7749_v41 = vmax.f32 %v7643_v49, 0.0  ;;  %v13573_v11 = vld [vmem:[#allocation30_spill] sm:$0xff] }
 0x754   : > { %7794 = vst.msk [vmem:[%s10678_s20] sm:$0xff] %vm454_vm1, %v7770_v16  ;;  %v7748_v9 = vmax.f32 %v7638_v31, 0.0  ;;  %v9981_v47 = vpop.f32.mrb[28].mxu1 }
 0x755   : > { %v7773_v62 = vadd.f32 %v7749_v41, %v13562_v19  ;;  %v7653_v43 = vadd.f32 %v9981_v47, %v13123_v25  ;;  %v7647_v54 = vpop.f32.mrb[29].mxu1  ;;  %v13574_v41 = vld [vmem:[#allocation33_spill] sm:$0xff] }
 0x756   : > { %v7772_v58 = vadd.f32 %v7748_v9, %v13563_v40  ;;  %v7648_v57 = vadd.f32 %v13123_v25, %v7647_v54 }
 0x757   : > { %7797 = vst.msk [vmem:[%s10678_s20 + $0x18] sm:$0xff] %vm454_vm1, %v7773_v62  ;;  %v7751_v20 = vmax.f32 %v7653_v43, 0.0  ;;  %v13575_v62 = vld [vmem:[#allocation34_spill] sm:$0xff] }
 0x758   : > { %7796 = vst.msk [vmem:[%s10678_s20 + $0x10] sm:$0xff] %vm454_vm1, %v7772_v58  ;;  %v7750_v0 = vmax.f32 %v7648_v57, 0.0  ;;  %v9984_v15 = vpop.f32.mrb[30].mxu1 }
 0x759   : > { %v7775_v55 = vadd.f32 %v7751_v20, %v13564_v63  ;;  %v7663_v52 = vadd.f32 %v9984_v15, %v13123_v25  ;;  %v7657_v1 = vpop.f32.mrb[31].mxu1  ;;  %v13576_v20 = vld [vmem:[#allocation35_spill] sm:$0xff] }
 0x75a   : > { %v7774_v50 = vadd.f32 %v7750_v0, %v13565_v46  ;;  %v7658_v37 = vadd.f32 %v13123_v25, %v7657_v1 }
 0x75b   : > { %7799 = vst.msk [vmem:[%s10678_s20 + $0x28] sm:$0xff] %vm454_vm1, %v7775_v55  ;;  %v7753_v30 = vmax.f32 %v7663_v52, 0.0  ;;  %v13577_v55 = vld [vmem:[#allocation36_spill] sm:$0xff] }
 0x75c   : > { %7798 = vst.msk [vmem:[%s10678_s20 + $0x20] sm:$0xff] %vm454_vm1, %v7774_v50  ;;  %v7752_v38 = vmax.f32 %v7658_v37, 0.0  ;;  %v9987_v56 = vpop.f32.mrb[32].mxu1 }
 0x75d   : > { %v7777_v60 = vadd.f32 %v7753_v30, %v13566_v12  ;;  %v7673_v35 = vadd.f32 %v9987_v56, %v13123_v25  ;;  %v7667_v34 = vpop.f32.mrb[33].mxu1  ;;  %v13578_v30 = vld [vmem:[#allocation37_spill] sm:$0xff] }
 0x75e   : > { %v7776_v7 = vadd.f32 %v7752_v38, %v13567_v59  ;;  %v7668_v53 = vadd.f32 %v13123_v25, %v7667_v34 }
 0x75f   : > { %7801 = vst.msk [vmem:[%s10678_s20 + $0x38] sm:$0xff] %vm454_vm1, %v7777_v60  ;;  %v7755_v45 = vmax.f32 %v7673_v35, 0.0  ;;  %v13579_v60 = vld [vmem:[#allocation38_spill] sm:$0xff] }
 0x760   : > { %7800 = vst.msk [vmem:[%s10678_s20 + $0x30] sm:$0xff] %vm454_vm1, %v7776_v7  ;;  %v7754_v5 = vmax.f32 %v7668_v53, 0.0  ;;  %v9990_v36 = vpop.f32.mrb[34].mxu1 }
 0x761   : > { %v7779_v29 = vadd.f32 %v7755_v45, %v13568_v26  ;;  %v7683_v6 = vadd.f32 %v9990_v36, %v13123_v25  ;;  %v7677_v24 = vpop.f32.mrb[35].mxu1  ;;  %v13580_v45 = vld [vmem:[#allocation41_spill] sm:$0xff] }
 0x762   : > { %v7778_v23 = vadd.f32 %v7754_v5, %v13569_v22  ;;  %v7678_v17 = vadd.f32 %v13123_v25, %v7677_v24 }
 0x763   : > { %7803 = vst.msk [vmem:[%s10678_s20 + $0x48] sm:$0xff] %vm454_vm1, %v7779_v29  ;;  %v7757_v33 = vmax.f32 %v7683_v6, 0.0  ;;  %v13581_v29 = vld [vmem:[#allocation42_spill] sm:$0xff] }
 0x764   : > { %7802 = vst.msk [vmem:[%s10678_s20 + $0x40] sm:$0xff] %vm454_vm1, %v7778_v23  ;;  %v7756_v3 = vmax.f32 %v7678_v17, 0.0  ;;  %v9993_v32 = vpop.f32.mrb[36].mxu1  ;;  %v13582_v17 = vld [vmem:[#allocation43_spill] sm:$0xff] }
 0x765   : > { %v7781_v61 = vadd.f32 %v7757_v33, %v13570_v13  ;;  %v7693_v14 = vadd.f32 %v9993_v32, %v13123_v25  ;;  %v7687_v21 = vpop.f32.mrb[37].mxu1 }
 0x766   : > { %v7780_v27 = vadd.f32 %v7756_v3, %v13571_v48  ;;  %v7688_v44 = vadd.f32 %v13123_v25, %v7687_v21  ;;  %v13583_v3 = vld [vmem:[#allocation44_spill] sm:$0xff] }
 0x767   : > { %7805 = vst.msk [vmem:[%s10678_s20 + $0x58] sm:$0xff] %vm454_vm1, %v7781_v61  ;;  %v7759_v39 = vmax.f32 %v7693_v14, 0.0 }
 0x768   : > { %7804 = vst.msk [vmem:[%s10678_s20 + $0x50] sm:$0xff] %vm454_vm1, %v7780_v27  ;;  %v7758_v18 = vmax.f32 %v7688_v44, 0.0  ;;  %v9996_v2 = vpop.f32.mrb[38].mxu1 }
 0x769   : > { %v7783_v28 = vadd.f32 %v7759_v39, %v13572_v42  ;;  %v7703_v8 = vadd.f32 %v9996_v2, %v13123_v25  ;;  %v7697_v10 = vpop.f32.mrb[39].mxu1 }
 0x76a   : > { %v7782_v49 = vadd.f32 %v7758_v18, %v13573_v11  ;;  %v7698_v51 = vadd.f32 %v13123_v25, %v7697_v10 }
 0x76b   : > { %7807 = vst.msk [vmem:[%s10678_s20 + $0x68] sm:$0xff] %vm454_vm1, %v7783_v28  ;;  %v7761_v4 = vmax.f32 %v7703_v8, 0.0 }
 0x76c   : > { %7806 = vst.msk [vmem:[%s10678_s20 + $0x60] sm:$0xff] %vm454_vm1, %v7782_v49  ;;  %v7760_v16 = vmax.f32 %v7698_v51, 0.0  ;;  %v9999_v31 = vpop.f32.mrb[40].mxu1 }
 0x76d   : > { %v7785_v9 = vadd.f32 %v7761_v4, %v13574_v41  ;;  %v7713_v47 = vadd.f32 %v9999_v31, %v13123_v25  ;;  %v7707_v19 = vpop.f32.mrb[41].mxu1 }
 0x76e   : > { %v7784_v43 = vadd.f32 %v7760_v16, %v13575_v62  ;;  %v7708_v54 = vadd.f32 %v13123_v25, %v7707_v19 }
 0x76f   : > { %7809 = vst.msk [vmem:[%s10678_s20 + $0x78] sm:$0xff] %vm454_vm1, %v7785_v9  ;;  %v7763_v40 = vmax.f32 %v7713_v47, 0.0 }
 0x770   : > { %7808 = vst.msk [vmem:[%s10678_s20 + $0x70] sm:$0xff] %vm454_vm1, %v7784_v43  ;;  %v7762_v58 = vmax.f32 %v7708_v54, 0.0  ;;  %v10002_v57 = vpop.f32.mrb[42].mxu1 }
 0x771   : > { %v7787_v0 = vadd.f32 %v7763_v40, %v13576_v20  ;;  %v7723_v15 = vadd.f32 %v10002_v57, %v13123_v25  ;;  %v7717_v63 = vpop.f32.mrb[43].mxu1 }
 0x772   : > { %v7786_v52 = vadd.f32 %v7762_v58, %v13577_v55  ;;  %v7718_v1 = vadd.f32 %v13123_v25, %v7717_v63 }
 0x773   : > { %7811 = vst.msk [vmem:[%s10678_s20 + $0x88] sm:$0xff] %vm454_vm1, %v7787_v0  ;;  %v7765_v46 = vmax.f32 %v7723_v15, 0.0 }
 0x774   : > { %7810 = vst.msk [vmem:[%s10678_s20 + $0x80] sm:$0xff] %vm454_vm1, %v7786_v52  ;;  %v7764_v50 = vmax.f32 %v7718_v1, 0.0  ;;  %v10005_v37 = vpop.f32.mrb[44].mxu1 }
 0x775   : > { %v7789_v38 = vadd.f32 %v7765_v46, %v13578_v30  ;;  %v7733_v56 = vadd.f32 %v10005_v37, %v13123_v25  ;;  %v7727_v12 = vpop.f32.mrb[45].mxu1 }
 0x776   : > { %v7788_v35 = vadd.f32 %v7764_v50, %v13579_v60  ;;  %v7728_v34 = vadd.f32 %v13123_v25, %v7727_v12 }
 0x777   : > { %7813 = vst.msk [vmem:[%s10678_s20 + $0x98] sm:$0xff] %vm454_vm1, %v7789_v38  ;;  %v7767_v59 = vmax.f32 %v7733_v56, 0.0 }
 0x778   : > { %7812 = vst.msk [vmem:[%s10678_s20 + $0x90] sm:$0xff] %vm454_vm1, %v7788_v35  ;;  %v7766_v7 = vmax.f32 %v7728_v34, 0.0  ;;  %v10008_v53 = vpop.f32.mrb[46].mxu1 }
 0x779   : > { %v7791_v5 = vadd.f32 %v7767_v59, %v13580_v45  ;;  %v7743_v36 = vadd.f32 %v10008_v53, %v13123_v25  ;;  %v7737_v26 = vpop.f32.mrb[47].mxu1 }
 0x77a   : > { %v7790_v6 = vadd.f32 %v7766_v7, %v13581_v29  ;;  %v7738_v24 = vadd.f32 %v13123_v25, %v7737_v26 }
 0x77b   : > { %7815 = vst.msk [vmem:[%s10678_s20 + $0xa8] sm:$0xff] %vm454_vm1, %v7791_v5  ;;  %v7769_v22 = vmax.f32 %v7743_v36, 0.0 }
 0x77c   : > { %7814 = vst.msk [vmem:[%s10678_s20 + $0xa0] sm:$0xff] %vm454_vm1, %v7790_v6  ;;  %v7768_v23 = vmax.f32 %v7738_v24, 0.0 }
 0x77d   : > { %v7793_v33 = vadd.f32 %v7769_v22, %v13582_v17 }
 0x77e   : > { %v7792_v32 = vadd.f32 %v7768_v23, %v13583_v3 }
 0x77f   : > { %7817 = vst.msk [vmem:[%s10678_s20 + $0xb8] sm:$0xff] %vm454_vm1, %v7793_v33 }
 0x780   : > { %7816 = vst.msk [vmem:[%s10678_s20 + $0xb0] sm:$0xff] %vm454_vm1, %v7792_v32 }
 0x781 PF: > { %s18_s9 = sadd.s32 1, %s10591_s9   ;;  %s13584_s27 = smov %s10583_s29 }
 0x782   : > { %p15_p9 = scmp.ge.s32.totalorder %s18_s9, 10   ;;  %s13585_s28 = smov %s10587_s30 }
 0x783   : > { %s13586_s29 = smov %s13589_s10  ;;  %s13587_s30 = smov %s13593_s11 }
 0x784   :  { %17 = sbr.rel (!%p15_p9) target bundleno = 3 (0x3), region = 113 }

</bundles_post_ra>
